<compile_context>
chip_gen: v6e
topology: v6e:2x2x1
jax: 0.10.0
libtpu: 0.0.40
codegen_flags: <defaults>
</compile_context>

<pallas_src>
import jax
import jax.numpy as jnp
from jax.experimental import pallas as pl
from jax.experimental.pallas import tpu as pltpu

EPS = 1e-3  # matches BatchNorm2d(eps=0.001)


def fused_add_conv_bn_kernel(x1_ref, x2_ref, w_ref, gb_ref, o_ref):
    # x1_ref, x2_ref : [Cin, M]   (M = H*W; NCHW with N==1 flattened, no transpose)
    # w_ref          : [tn, Cin]  (tile of conv weight rows = output channels)
    # gb_ref         : [tn, 2]    (col 0 = gamma, col 1 = beta)
    # o_ref          : [tn, M]
    x = x1_ref[...] + x2_ref[...]                                       # elementwise add
    w = w_ref[...]
    y = jnp.dot(w, x, preferred_element_type=jnp.float32)               # 1x1 conv == matmul

    m = y.shape[1]
    inv_m = 1.0 / m

    # Per-output-channel mean via a tiny MXU matmul on the M-reduced input (conv is linear):
    # mean_c = (W @ sum_m x) / M.  Avoids a full cross-lane reduction pass over y.
    sum_x = jnp.sum(x, axis=1, keepdims=True)                           # [Cin, 1] (small XLU reduce)
    mean = jnp.dot(w, sum_x, preferred_element_type=jnp.float32) * inv_m  # [tn, 1]

    # Centered (two-pass) variance: numerically robust and only one traversal of y.
    c = y - mean                                                        # [tn, M]
    var = jnp.sum(c * c, axis=1, keepdims=True) * inv_m                 # [tn, 1]

    gamma = gb_ref[:, 0:1]
    beta = gb_ref[:, 1:2]
    scale = gamma * jax.lax.rsqrt(var + EPS)                            # [tn, 1]
    o_ref[...] = c * scale + beta                                       # (y - mean)*scale + beta


def _pick_cout_tile(cout):
    # Prefer 2 grid steps (v7x: one per TensorCore; v5e/v6e: only one extra ~0.35us step),
    # then a single step, then smaller divisors.  Tile must divide Cout and be a multiple of 8.
    for tn in (672, 1344, 448, 336, 224, 128, 64, 32, 16, 8):
        if cout % tn == 0 and tn <= cout:
            return tn
    return cout


@jax.jit
def fused_add_conv_bn(x524, x509, weight, gamma, beta):
    """x524, x509: [1, Cin, H, W] (NCHW). weight: [Cout, Cin] (1x1 conv). Returns NCHW output."""
    N, Cin, H, W = x524.shape
    Cout = weight.shape[0]
    M = H * W
    assert N == 1, "transpose-free [Cout, M] formulation relies on N == 1"
    # TODO(synk): for N > 1 fall back to an NHWC-flattened [N*H*W, Cin] layout.
    # TODO(synk): training-mode BatchNorm also updates running_mean/running_var with momentum;
    #             only the batch-statistics forward output is produced here.
    # TODO(synk): on v5e, casting `weight` to bf16 here would cut ~23% of HBM traffic; kept f32
    #             to preserve the 1e-3 accuracy bar across all generations.

    # NCHW with N == 1 is already [Cin, M] -> free reshapes, no XLA transposes.
    a = x524.reshape(Cin, M)
    b = x509.reshape(Cin, M)
    gb = jnp.stack([gamma, beta], axis=1)  # [Cout, 2] -> single small operand / DMA

    tn = _pick_cout_tile(Cout)

    out = pl.pallas_call(
        fused_add_conv_bn_kernel,
        out_shape=jax.ShapeDtypeStruct((Cout, M), jnp.float32),
        grid=(Cout // tn,),
        in_specs=[
            pl.BlockSpec((Cin, M), lambda j: (0, 0)),   # same block every step -> fetched once
            pl.BlockSpec((Cin, M), lambda j: (0, 0)),
            pl.BlockSpec((tn, Cin), lambda j: (j, 0)),  # weight streamed per Cout tile
            pl.BlockSpec((tn, 2), lambda j: (j, 0)),    # fused gamma/beta tile
        ],
        out_specs=pl.BlockSpec((tn, M), lambda j: (j, 0)),
        compiler_params=pltpu.CompilerParams(
            dimension_semantics=("parallel",),          # Cout tiles independent -> megacore on v7x
        ),
    )(a, b, weight, gb)

    # [Cout, M] is exactly the NCHW-flattened output for N == 1.
    return out.reshape(N, Cout, H, W)


def reference(x524, x509, weight, gamma, beta):
    x = x524 + x509
    N, Cin, H, W = x.shape
    Cout = weight.shape[0]
    xm = jnp.transpose(x, (0, 2, 3, 1)).reshape(-1, Cin)
    y = xm @ weight.T                                   # [M, Cout]
    mean = jnp.mean(y, axis=0, keepdims=True)
    var = jnp.mean((y - mean) ** 2, axis=0, keepdims=True)
    y = (y - mean) / jnp.sqrt(var + EPS) * gamma.reshape(1, -1) + beta.reshape(1, -1)
    return jnp.transpose(y.reshape(N, H, W, Cout), (0, 3, 1, 2))


if __name__ == "__main__":
    # Module shapes: Conv2d(224 -> 1344, 1x1, no bias), BatchNorm2d(1344, eps=1e-3)
    N, Cin, H, W = 1, 224, 14, 14
    Cout = 1344

    key = jax.random.PRNGKey(0)
    k1, k2, k3, k4, k5 = jax.random.split(key, 5)

    x524 = jax.random.normal(k1, (N, Cin, H, W), dtype=jnp.float32)
    x509 = jax.random.normal(k2, (N, Cin, H, W), dtype=jnp.float32)

    # Deterministic parameter init (kaiming-ish conv weight, non-trivial BN affine)
    fan_in = Cin  # 1x1 kernel
    weight = jax.random.normal(k3, (Cout, Cin), dtype=jnp.float32) * (2.0 / fan_in) ** 0.5
    gamma = 1.0 + 0.1 * jax.random.normal(k4, (Cout,), dtype=jnp.float32)
    beta = 0.1 * jax.random.normal(k5, (Cout,), dtype=jnp.float32)

    out = fused_add_conv_bn(x524, x509, weight, gamma, beta)
    out = jax.block_until_ready(out)

    ref = reference(x524, x509, weight, gamma, beta)
    assert out.shape == (N, Cout, H, W)
    assert jnp.allclose(out, ref, atol=1e-3, rtol=1e-3), "mismatch vs reference"

    print("KERNEL_OK")
</pallas_src>

<mosaic_0001>
module attributes {stable_mosaic.version = 11 : i64} {
  func.func @fused_add_conv_bn_kernel(%arg0: i32, %arg1: memref<224x196xf32, #tpu.memory_space<vmem>>, %arg2: memref<224x196xf32, #tpu.memory_space<vmem>>, %arg3: memref<672x224xf32, #tpu.memory_space<vmem>>, %arg4: memref<672x2xf32, #tpu.memory_space<vmem>>, %arg5: memref<672x196xf32, #tpu.memory_space<vmem>>) attributes {dimension_semantics = [#tpu.dimension_semantics<parallel>], iteration_bounds = array<i64: 2>, scalar_prefetch = 0 : i64, scratch_operands = 0 : i64, tpu.core_type = #tpu.core_type<tc>, window_params = [{pipeline_mode = #tpu.pipeline_mode<synchronous>, transform_indices = @transform_0, window_bounds = array<i64: 224, 196>}, {pipeline_mode = #tpu.pipeline_mode<synchronous>, transform_indices = @transform_1, window_bounds = array<i64: 224, 196>}, {transform_indices = @transform_2, window_bounds = array<i64: 672, 224>}, {transform_indices = @transform_3, window_bounds = array<i64: 672, 2>}, {transform_indices = @transform_4, window_bounds = array<i64: 672, 196>}]} {
    %c0 = arith.constant 0 : index
    %c0_0 = arith.constant 0 : index
    %0 = vector.load %arg1[%c0, %c0_0] : memref<224x196xf32, #tpu.memory_space<vmem>>, vector<224x196xf32>
    %c0_1 = arith.constant 0 : index
    %c0_2 = arith.constant 0 : index
    %1 = vector.load %arg2[%c0_1, %c0_2] : memref<224x196xf32, #tpu.memory_space<vmem>>, vector<224x196xf32>
    %2 = arith.addf %0, %1 : vector<224x196xf32>
    %c0_3 = arith.constant 0 : index
    %c0_4 = arith.constant 0 : index
    %3 = vector.load %arg3[%c0_3, %c0_4] : memref<672x224xf32, #tpu.memory_space<vmem>>, vector<672x224xf32>
    %cst = arith.constant dense<0.000000e+00> : vector<672x196xf32>
    %4 = tpu.matmul %3, %2, %cst {dimension_numbers = #tpu.dot_dimension_numbers<[1], [0], [0], [1], [0, 0, 1, 1], [], []>} : vector<672x224xf32>, vector<224x196xf32>, vector<672x196xf32> -> vector<672x196xf32>
    %cst_5 = arith.constant dense<0.000000e+00> : vector<224xf32>
    %5 = vector.multi_reduction <add>, %2, %cst_5 [1] : vector<224x196xf32> to vector<224xf32>
    %6 = vector.shape_cast %5 : vector<224xf32> to vector<224x1xf32>
    %cst_6 = arith.constant dense<0.000000e+00> : vector<672x1xf32>
    %7 = tpu.matmul %3, %6, %cst_6 {dimension_numbers = #tpu.dot_dimension_numbers<[1], [0], [0], [1], [0, 0, 1, 1], [], []>} : vector<672x224xf32>, vector<224x1xf32>, vector<672x1xf32> -> vector<672x1xf32>
    %cst_7 = arith.constant 0.00510204071 : f32
    %8 = vector.broadcast %cst_7 : f32 to vector<672x1xf32>
    %9 = arith.mulf %7, %8 : vector<672x1xf32>
    %10 = vector.broadcast %9 : vector<672x1xf32> to vector<672x196xf32>
    %11 = arith.subf %4, %10 : vector<672x196xf32>
    %12 = arith.mulf %11, %11 : vector<672x196xf32>
    %cst_8 = arith.constant dense<0.000000e+00> : vector<672xf32>
    %13 = vector.multi_reduction <add>, %12, %cst_8 [1] : vector<672x196xf32> to vector<672xf32>
    %14 = vector.shape_cast %13 : vector<672xf32> to vector<672x1xf32>
    %cst_9 = arith.constant 0.00510204071 : f32
    %15 = vector.broadcast %cst_9 : f32 to vector<672x1xf32>
    %16 = arith.mulf %14, %15 : vector<672x1xf32>
    %c0_10 = arith.constant 0 : index
    %c0_11 = arith.constant 0 : index
    %17 = vector.load %arg4[%c0_10, %c0_11] : memref<672x2xf32, #tpu.memory_space<vmem>>, vector<672x1xf32>
    %c0_12 = arith.constant 0 : index
    %c1 = arith.constant 1 : index
    %18 = vector.load %arg4[%c0_12, %c1] : memref<672x2xf32, #tpu.memory_space<vmem>>, vector<672x1xf32>
    %cst_13 = arith.constant 1.000000e-03 : f32
    %19 = vector.broadcast %cst_13 : f32 to vector<672x1xf32>
    %20 = arith.addf %16, %19 : vector<672x1xf32>
    %21 = math.rsqrt %20 : vector<672x1xf32>
    %22 = arith.mulf %17, %21 : vector<672x1xf32>
    %23 = vector.broadcast %22 : vector<672x1xf32> to vector<672x196xf32>
    %24 = arith.mulf %11, %23 : vector<672x196xf32>
    %25 = vector.broadcast %18 : vector<672x1xf32> to vector<672x196xf32>
    %26 = arith.addf %24, %25 : vector<672x196xf32>
    %c0_14 = arith.constant 0 : index
    %c0_15 = arith.constant 0 : index
    %27 = vector.load %arg5[%c0_14, %c0_15] : memref<672x196xf32, #tpu.memory_space<vmem>>, vector<672x196xf32>
    tpu.vector_store %arg5[%c0_14, %c0_15], %26 {strides = array<i32>} : memref<672x196xf32, #tpu.memory_space<vmem>>, vector<672x196xf32>,
    return
  }
  func.func @transform_0(%arg0: i32) -> (i32, i32) {
    %c0_i32 = arith.constant 0 : i32
    %c0_i32_0 = arith.constant 0 : i32
    %c0_i32_1 = arith.constant 0 : i32
    return %c0_i32, %c0_i32_0 : i32, i32
  }
  func.func @transform_1(%arg0: i32) -> (i32, i32) {
    %c0_i32 = arith.constant 0 : i32
    %c0_i32_0 = arith.constant 0 : i32
    %c0_i32_1 = arith.constant 0 : i32
    return %c0_i32, %c0_i32_0 : i32, i32
  }
  func.func @transform_2(%arg0: i32) -> (i32, i32) {
    %c0_i32 = arith.constant 0 : i32
    %c0_i32_0 = arith.constant 0 : i32
    return %arg0, %c0_i32 : i32, i32
  }
  func.func @transform_3(%arg0: i32) -> (i32, i32) {
    %c0_i32 = arith.constant 0 : i32
    %c0_i32_0 = arith.constant 0 : i32
    return %arg0, %c0_i32 : i32, i32
  }
  func.func @transform_4(%arg0: i32) -> (i32, i32) {
    %c0_i32 = arith.constant 0 : i32
    %c0_i32_0 = arith.constant 0 : i32
    return %arg0, %c0_i32 : i32, i32
  }
}

</mosaic_0001>

<bundles_post_ra>
// kernel: fused_add_conv_bn.1
= control target key start
LH: loop header
LB: loop body
LE: loop exit
PB: predicated region body
PF: predicated region fallthrough
CT: control target
= control target key end

     0   :  { %s5479_s15 = smov 0   ;;  %s8968_s0 = inlined_call_operand.vmem [shape: f32[224,196], index: 0, kind: input, shape index: {}]   ;;  %s8969_s1 = inlined_call_operand.vmem [shape: f32[224,196], index: 1, kind: input, shape index: {}]   ;;  %s8970_s2 = inlined_call_operand.vmem [shape: f32[1344,224], index: 2, kind: input, shape index: {}]   ;;  %s8971_s3 = inlined_call_operand.vmem [shape: f32[1344,2], index: 3, kind: input, shape index: {}]   ;;  %s8972_s4 = inlined_call_operand.vmem [shape: f32[1344,196], index: 4, kind: output, shape index: {}]  }
   0x1 LB: > { %s4994_s16 = sadd.s32 4294967295, %s5449_s15   ;;  %p4998_p0 = scmp.ge.s32.totalorder %s5449_s15, 1  ;;  %s5449_s15 = sphi %s5479_s15, %s14_s15  }
   0x2   : > { %p175_p1 = scmp.lt.s32.totalorder %s5449_s15, 3 }
   0x4   : > { %p176_p2 = pnand %p4998_p0, %p175_p1 }
   0x6   : > { %179 = sbr.rel (%p176_p2) target bundleno = 3087 (0xc0f), region = 36 }
   0xb   : > { %v232_v0 = vld [vmem:[%s8968_s0 + $0x20] sm:$0xff]  ;;  %v233_v1 = vld [vmem:[%s8968_s0 + $0x28] sm:$0xff]  ;;  %vm1386_vm0 = vcmask 556032   ;;  %v8973_v7 = vmov 1   ;;  %v234_v11 = vld [vmem:[%s8968_s0 + $0x30] sm:$0xff]  ;;  %s208_s25 = smul.u32 84, %s4994_s16 }
   0xc   : > { %v288_v2 = vld [vmem:[%s8969_s1 + $0x20] sm:$0xff]  ;;  %v289_v3 = vld [vmem:[%s8969_s1 + $0x28] sm:$0xff]  ;;  %5188 = vset.pattern.permute.xlu0 %v8973_v7  ;;  %5187 = vset.pattern.permute.xlu1 %v8973_v7  ;;  %v235_v14 = vld [vmem:[%s8968_s0 + $0x38] sm:$0xff]  ;;  %vm564_vm1 = vcmask 785408  }
   0xd   : > { %v5499_v4 = vadd.f32 %v288_v2, %v232_v0  ;;  %v228_v5 = vld [vmem:[%s8968_s0] sm:$0xff]  ;;  %v229_v6 = vld [vmem:[%s8968_s0 + $0x8] sm:$0xff]  ;;  %v5509_v8 = vadd.f32 %v289_v3, %v233_v1  ;;  %v290_v15 = vld [vmem:[%s8969_s1 + $0x30] sm:$0xff]  ;;  %p209_p3 = scmp.lt.s32.totalorder %s208_s25, 167 }
   0xe   : > { %v284_v9 = vld [vmem:[%s8969_s1] sm:$0xff]  ;;  %v285_v10 = vld [vmem:[%s8969_s1 + $0x8] sm:$0xff]  ;;  %v291_v16 = vld [vmem:[%s8969_s1 + $0x38] sm:$0xff]  ;;  %v5535_v18 = vadd.f32 %v290_v15, %v234_v11 }
   0xf   : > { %v5520_v12 = vadd.f32 %v284_v9, %v228_v5  ;;  %v5522_v13 = vadd.f32 %v285_v10, %v229_v6  ;;  %v1395_v17 = vsel %vm1386_vm0, %v5509_v8, 0.0  ;;  %v5537_v19 = vadd.f32 %v291_v16, %v235_v14  ;;  %v230_v20 = vld [vmem:[%s8968_s0 + $0x10] sm:$0xff]  ;;  %v231_v21 = vld [vmem:[%s8968_s0 + $0x18] sm:$0xff]  ;;  %v236_v34 = vld [vmem:[%s8968_s0 + $0x40] sm:$0xff]  ;;  %s9710_s25 = smov (!%p209_p3, %s208_s25), 167 }
  0x10   : > { %v286_v22 = vld [vmem:[%s8969_s1 + $0x10] sm:$0xff]  ;;  %v1396_v23 = vadd.f32 %v1395_v17, %v5499_v4  ;;  %v287_v25 = vld [vmem:[%s8969_s1 + $0x18] sm:$0xff]  ;;  %v237_v38 = vld [vmem:[%s8968_s0 + $0x48] sm:$0xff]  ;;  %s5001_s16 = sshll.u32 %s9710_s25, 3  ;;  %s5174_s29 = sshll.u32 %s9710_s25, 4 }
  0x11   : > { %v1387_v24 = vsel %vm1386_vm0, %v5522_v13, 0.0  ;;  %v5554_v26 = vadd.f32 %v286_v22, %v230_v20  ;;  %v238_v27 = vld [vmem:[%s8968_s0 + $0x50] sm:$0xff]  ;;  %v239_v28 = vld [vmem:[%s8968_s0 + $0x58] sm:$0xff]  ;;  %v1399_v30 = vsel %vm1386_vm0, %v5537_v19, 0.0  ;;  %v5565_v31 = vadd.f32 %v287_v25, %v231_v21  ;;  %v292_v39 = vld [vmem:[%s8969_s1 + $0x40] sm:$0xff]  ;;  %s6012_s28 = scalar_lea.vmem %s8971_s3, %s5001_s16  ;;  %s6036_s6 = scalar_lea.vmem %s8970_s2, %s5174_s29 }
  0x12   : > { %v1388_v29 = vadd.f32 %v1387_v24, %v5520_v12  ;;  %v294_v32 = vld [vmem:[%s8969_s1 + $0x50] sm:$0xff]  ;;  %v295_v33 = vld [vmem:[%s8969_s1 + $0x58] sm:$0xff]  ;;  %1397 = vadd.xlane.f32.xlu1 %v1396_v23  ;;  %v1400_v35 = vadd.f32 %v1399_v30, %v5535_v18  ;;  %v293_v40 = vld [vmem:[%s8969_s1 + $0x48] sm:$0xff]  ;;  %v5592_v42 = vadd.f32 %v292_v39, %v236_v34  ;;  %s7631_s9 = scalar_lea.vmem %s8972_s4, %s5174_s29 }
  0x13   : > { %v5577_v36 = vadd.f32 %v294_v32, %v238_v27  ;;  %v5579_v37 = vadd.f32 %v295_v33, %v239_v28  ;;  %v1391_v41 = vsel %vm1386_vm0, %v5565_v31, 0.0  ;;  %v5594_v43 = vadd.f32 %v293_v40, %v237_v38  ;;  %v242_v44 = vld [vmem:[%s8968_s0 + $0x70] sm:$0xff]  ;;  %v243_v45 = vld [vmem:[%s8968_s0 + $0x78] sm:$0xff]  ;;  %v240_v50 = vld [vmem:[%s8968_s0 + $0x60] sm:$0xff] }
  0x14   : > { %1389 = vadd.xlane.f32.xlu0 %v1388_v29  ;;  %v298_v46 = vld [vmem:[%s8969_s1 + $0x70] sm:$0xff]  ;;  %v1392_v47 = vadd.f32 %v1391_v41, %v5554_v26  ;;  %v299_v49 = vld [vmem:[%s8969_s1 + $0x78] sm:$0xff]  ;;  %v241_v51 = vld [vmem:[%s8968_s0 + $0x68] sm:$0xff] }
  0x15   : > { %v1407_v48 = vsel %vm1386_vm0, %v5579_v37, 0.0  ;;  %v1403_v52 = vsel %vm1386_vm0, %v5594_v43, 0.0  ;;  %v5619_v53 = vadd.f32 %v299_v49, %v243_v45  ;;  %v296_v54 = vld [vmem:[%s8969_s1 + $0x60] sm:$0xff]  ;;  %v297_v55 = vld [vmem:[%s8969_s1 + $0x68] sm:$0xff]  ;;  %v5628_v57 = vadd.f32 %v298_v46, %v242_v44  ;;  %v246_v59 = vld [vmem:[%s8968_s0 + $0x90] sm:$0xff] }
  0x16   : > { %1401 = vadd.xlane.f32.xlu1 %v1400_v35  ;;  %v1408_v56 = vadd.f32 %v1407_v48, %v5577_v36  ;;  %v5630_v58 = vadd.f32 %v297_v55, %v241_v51  ;;  %v247_v60 = vld [vmem:[%s8968_s0 + $0x98] sm:$0xff]  ;;  %v1404_v62 = vadd.f32 %v1403_v52, %v5592_v42  ;;  %v5644_v0 = vadd.f32 %v296_v54, %v240_v50  ;;  %v302_v1 = vld [vmem:[%s8969_s1 + $0x90] sm:$0xff]  ;;  %v244_v3 = vld [vmem:[%s8968_s0 + $0x80] sm:$0xff] }
  0x17   : > { %v303_v61 = vld [vmem:[%s8969_s1 + $0x98] sm:$0xff]  ;;  %v1415_v63 = vsel %vm1386_vm0, %v5619_v53, 0.0  ;;  %v245_v5 = vld [vmem:[%s8968_s0 + $0x88] sm:$0xff]  ;;  %v300_v9 = vld [vmem:[%s8969_s1 + $0x80] sm:$0xff]  ;;  %v5674_v17 = vadd.f32 %v302_v1, %v246_v59 }
  0x18   : > { %1393 = vadd.xlane.f32.xlu0 %v1392_v47  ;;  %v5649_v2 = vadd.f32 %v303_v61, %v247_v60  ;;  %v1411_v6 = vsel %vm1386_vm0, %v5630_v58, 0.0  ;;  %v301_v10 = vld [vmem:[%s8969_s1 + $0x88] sm:$0xff]  ;;  %v251_v11 = vld [vmem:[%s8968_s0 + $0xb8] sm:$0xff]  ;;  %v1416_v16 = vadd.f32 %v1415_v63, %v5628_v57  ;;  %v250_v20 = vld [vmem:[%s8968_s0 + $0xb0] sm:$0xff]  ;;  %v5688_v25 = vadd.f32 %v300_v9, %v244_v3 }
  0x19   : > { %v5668_v14 = vadd.f32 %v301_v10, %v245_v5  ;;  %v307_v15 = vld [vmem:[%s8969_s1 + $0xb8] sm:$0xff]  ;;  %v249_v21 = vld [vmem:[%s8968_s0 + $0xa8] sm:$0xff]  ;;  %v1412_v23 = vadd.f32 %v1411_v6, %v5644_v0  ;;  %v306_v27 = vld [vmem:[%s8969_s1 + $0xb0] sm:$0xff] }
  0x1a   : > { %1409 = vadd.xlane.f32.xlu1 %v1408_v56  ;;  %v305_v22 = vld [vmem:[%s8969_s1 + $0xa8] sm:$0xff]  ;;  %v1423_v24 = vsel %vm1386_vm0, %v5649_v2, 0.0  ;;  %v5693_v28 = vadd.f32 %v307_v15, %v251_v11  ;;  %v248_v29 = vld [vmem:[%s8968_s0 + $0xa0] sm:$0xff]  ;;  %v255_v34 = vld [vmem:[%s8968_s0 + $0xd8] sm:$0xff]  ;;  %v362_v46 = vadd.f32 %v306_v27, %v250_v20 }
  0x1b   : > { %v304_v30 = vld [vmem:[%s8969_s1 + $0xa0] sm:$0xff]  ;;  %v1419_v32 = vsel %vm1386_vm0, %v5668_v14, 0.0  ;;  %v5703_v33 = vadd.f32 %v305_v22, %v249_v21  ;;  %v311_v35 = vld [vmem:[%s8969_s1 + $0xd8] sm:$0xff]  ;;  %v254_v38 = vld [vmem:[%s8968_s0 + $0xd0] sm:$0xff]  ;;  %v1424_v45 = vadd.f32 %v1423_v24, %v5674_v17 }
  0x1c   : > { %1405 = vadd.xlane.f32.xlu0 %v1404_v62  ;;  %v310_v39 = vld [vmem:[%s8969_s1 + $0xd0] sm:$0xff]  ;;  %v253_v40 = vld [vmem:[%s8968_s0 + $0xc8] sm:$0xff]  ;;  %v5727_v47 = vadd.f32 %v304_v30, %v248_v29  ;;  %v259_v48 = vld [vmem:[%s8968_s0 + $0xf8] sm:$0xff]  ;;  %v1420_v51 = vadd.f32 %v1419_v32, %v5688_v25  ;;  %v1431_v52 = vsel %vm1386_vm0, %v5693_v28, 0.0  ;;  %v367_v54 = vadd.f32 %v311_v35, %v255_v34 }
  0x1d   : > { %v309_v41 = vld [vmem:[%s8969_s1 + $0xc8] sm:$0xff]  ;;  %v258_v44 = vld [vmem:[%s8968_s0 + $0xf0] sm:$0xff]  ;;  %v315_v50 = vld [vmem:[%s8969_s1 + $0xf8] sm:$0xff]  ;;  %v1427_v61 = vsel %vm1386_vm0, %v5703_v33, 0.0  ;;  %v1432_v9 = vadd.f32 %v1431_v52, %v362_v46  ;;  %v366_v10 = vadd.f32 %v310_v39, %v254_v38 }
  0x1e   : > { %1417 = vadd.xlane.f32.xlu1 %v1416_v16  ;;  %v314_v49 = vld [vmem:[%s8969_s1 + $0xf0] sm:$0xff]  ;;  %v371_v55 = vadd.f32 %v315_v50, %v259_v48  ;;  %v256_v56 = vld [vmem:[%s8968_s0 + $0xe0] sm:$0xff]  ;;  %v257_v59 = vld [vmem:[%s8968_s0 + $0xe8] sm:$0xff]  ;;  %v365_v1 = vadd.f32 %v309_v41, %v253_v40  ;;  %v1428_v15 = vadd.f32 %v1427_v61, %v5727_v47  ;;  %v1439_v16 = vsel %vm1386_vm0, %v367_v54, 0.0 }
  0x1f   : > { %v312_v60 = vld [vmem:[%s8969_s1 + $0xe0] sm:$0xff]  ;;  %v370_v3 = vadd.f32 %v314_v49, %v258_v44  ;;  %v313_v5 = vld [vmem:[%s8969_s1 + $0xe8] sm:$0xff]  ;;  %v263_v22 = vld [vmem:[%s8968_s0 + $0x118] sm:$0xff]  ;;  %v1440_v29 = vadd.f32 %v1439_v16, %v366_v10 }
  0x20   : > { %1413 = vadd.xlane.f32.xlu0 %v1412_v23  ;;  %v252_v62 = vld [vmem:[%s8968_s0 + $0xc0] sm:$0xff]  ;;  %v369_v6 = vadd.f32 %v313_v5, %v257_v59  ;;  %817 = vmatprep.subr.mxu0 %v371_v55  ;;  %v368_v11 = vadd.f32 %v312_v60, %v256_v56  ;;  %v1435_v21 = vsel %vm1386_vm0, %v365_v1, 0.0  ;;  %v319_v23 = vld [vmem:[%s8969_s1 + $0x118] sm:$0xff]  ;;  %v261_v24 = vld [vmem:[%s8968_s0 + $0x108] sm:$0xff]  ;;  %v1447_v32 = vsel %vm1386_vm0, %v371_v55, 0.0 }
  0x21   : > { %v308_v63 = vld [vmem:[%s8969_s1 + $0xc0] sm:$0xff]  ;;  %818 = vmatpush1.msra.mxu0 %v370_v3  ;;  %v317_v27 = vld [vmem:[%s8969_s1 + $0x108] sm:$0xff]  ;;  %v262_v34 = vld [vmem:[%s8968_s0 + $0x110] sm:$0xff]  ;;  %v5783_v38 = vadd.f32 %v319_v23, %v263_v22 }
  0x22   : > { %1425 = vadd.xlane.f32.xlu1 %v1424_v45  ;;  %v364_v20 = vadd.f32 %v308_v63, %v252_v62  ;;  %819 = vmatprep.subr.mxu0 %v369_v6  ;;  %v318_v35 = vld [vmem:[%s8969_s1 + $0x110] sm:$0xff]  ;;  %v260_v39 = vld [vmem:[%s8968_s0 + $0x100] sm:$0xff]  ;;  %v1443_v40 = vsel %vm1386_vm0, %v369_v6, 0.0  ;;  %v5792_v44 = vadd.f32 %v317_v27, %v261_v24  ;;  %v267_v45 = vld [vmem:[%s8968_s0 + $0x138] sm:$0xff] }
  0x23   : > { %820 = vmatpush1.msra.mxu0 %v368_v11  ;;  %v316_v41 = vld [vmem:[%s8969_s1 + $0x100] sm:$0xff]  ;;  %v323_v48 = vld [vmem:[%s8969_s1 + $0x138] sm:$0xff]  ;;  %v265_v49 = vld [vmem:[%s8968_s0 + $0x128] sm:$0xff]  ;;  %v5807_v52 = vadd.f32 %v318_v35, %v262_v34  ;;  %v1455_v55 = vsel %vm1386_vm0, %v5783_v38, 0.0 }
  0x24   : > { %1421 = vadd.xlane.f32.xlu0 %v1420_v51  ;;  %821 = vmatprep.subr.mxu0 %v367_v54  ;;  %v1436_v30 = vadd.f32 %v1435_v21, %v364_v20  ;;  %v321_v50 = vld [vmem:[%s8969_s1 + $0x128] sm:$0xff]  ;;  %v1448_v51 = vadd.f32 %v1447_v32, %v370_v3  ;;  %v1444_v54 = vadd.f32 %v1443_v40, %v368_v11  ;;  %v266_v59 = vld [vmem:[%s8968_s0 + $0x130] sm:$0xff]  ;;  %v1451_v61 = vsel %vm1386_vm0, %v5792_v44, 0.0  ;;  %v320_v62 = vld [vmem:[%s8969_s1 + $0x120] sm:$0xff] }
  0x25   : > { %822 = vmatpush1.msra.mxu0 %v366_v10  ;;  %v5811_v56 = vadd.f32 %v316_v41, %v260_v39  ;;  %v5819_v60 = vadd.f32 %v323_v48, %v267_v45  ;;  %v5830_v63 = vadd.f32 %v321_v50, %v265_v49  ;;  %v327_v3 = vld [vmem:[%s8969_s1 + $0x158] sm:$0xff]  ;;  %v325_v5 = vld [vmem:[%s8969_s1 + $0x148] sm:$0xff]  ;;  %v1456_v6 = vadd.f32 %v1455_v55, %v5807_v52  ;;  %v324_v21 = vld [vmem:[%s8969_s1 + $0x140] sm:$0xff] }
  0x26   : > { %1433 = vadd.xlane.f32.xlu1 %v1432_v9  ;;  %823 = vmatprep.subr.mxu0 %v365_v1  ;;  %v271_v1 = vld [vmem:[%s8968_s0 + $0x158] sm:$0xff]  ;;  %v329_v27 = vld [vmem:[%s8969_s1 + $0x168] sm:$0xff]  ;;  %v274_v35 = vld [vmem:[%s8968_s0 + $0x170] sm:$0xff] }
  0x27   : > { %824 = vmatpush1.msra.mxu0 %v364_v20  ;;  %v1463_v10 = vsel %vm1386_vm0, %v5819_v60, 0.0  ;;  %v5861_v16 = vadd.f32 %v327_v3, %v271_v1  ;;  %v1459_v20 = vsel %vm1386_vm0, %v5830_v63, 0.0  ;;  %v275_v23 = vld [vmem:[%s8968_s0 + $0x178] sm:$0xff]  ;;  %v328_v41 = vld [vmem:[%s8969_s1 + $0x160] sm:$0xff]  ;;  %v333_v50 = vld [vmem:[%s8969_s1 + $0x188] sm:$0xff] }
  0x28   : > { %1429 = vadd.xlane.f32.xlu0 %v1428_v15  ;;  %825 = vmatprep.subr.mxu0 %v5693_v28  ;;  %v322_v28 = vld [vmem:[%s8969_s1 + $0x130] sm:$0xff]  ;;  %v331_v24 = vld [vmem:[%s8969_s1 + $0x178] sm:$0xff]  ;;  %v332_v1 = vld [vmem:[%s8969_s1 + $0x180] sm:$0xff] }
  0x29   : > { %826 = vmatpush1.msra.mxu0 %v362_v46  ;;  %v264_v46 = vld [vmem:[%s8968_s0 + $0x120] sm:$0xff]  ;;  %v5847_v9 = vadd.f32 %v322_v28, %v266_v59  ;;  %v270_v15 = vld [vmem:[%s8968_s0 + $0x150] sm:$0xff]  ;;  %v1471_v32 = vsel %vm1386_vm0, %v5861_v16, 0.0  ;;  %v5903_v39 = vadd.f32 %v331_v24, %v275_v23  ;;  %v279_v48 = vld [vmem:[%s8968_s0 + $0x198] sm:$0xff] }
  0x2a   : > { %1441 = vadd.xlane.f32.xlu1 %v1440_v29  ;;  %827 = vmatprep.subr.mxu0 %v5703_v33  ;;  %v269_v33 = vld [vmem:[%s8968_s0 + $0x148] sm:$0xff]  ;;  %v5853_v11 = vadd.f32 %v320_v62, %v264_v46  ;;  %v335_v49 = vld [vmem:[%s8969_s1 + $0x198] sm:$0xff]  ;;  %v278_v46 = vld [vmem:[%s8968_s0 + $0x190] sm:$0xff] }
  0x2b   : > { %828 = vmatpush1.msra.mxu0 %v5727_v47  ;;  %v1452_v47 = vadd.f32 %v1451_v61, %v5811_v56  ;;  %v5872_v22 = vadd.f32 %v325_v5, %v269_v33  ;;  %v1464_v29 = vadd.f32 %v1463_v10, %v5847_v9  ;;  %v1479_v59 = vsel %vm1386_vm0, %v5903_v39, 0.0  ;;  %v283_v33 = vld [vmem:[%s8968_s0 + $0x1b8] sm:$0xff]  ;;  %v336_v23 = vld [vmem:[%s8969_s1 + $0x1a0] sm:$0xff]  ;;  %v6321_v7 = vld [vmem:[%s6036_s6 + $0x168] sm:$0xff] }
  0x2c   : > { %1437 = vadd.xlane.f32.xlu0 %v1436_v30  ;;  %829 = vmatprep.subr.mxu0 %v5649_v2  ;;  %v326_v2 = vld [vmem:[%s8969_s1 + $0x150] sm:$0xff]  ;;  %v391_v61 = vadd.f32 %v335_v49, %v279_v48  ;;  %v339_v5 = vld [vmem:[%s8969_s1 + $0x1b8] sm:$0xff]  ;;  %v6067_v48 = vld [vmem:[%s6036_s6 + $0x20] sm:$0xff] }
  0x2d   : > { %830 = vmatpush1.msra.mxu0 %v5674_v17  ;;  %v268_v17 = vld [vmem:[%s8968_s0 + $0x140] sm:$0xff]  ;;  %v5889_v30 = vadd.f32 %v326_v2, %v270_v15  ;;  %v1467_v40 = vsel %vm1386_vm0, %v5872_v22, 0.0  ;;  %v6070_v49 = vld [vmem:[%s6036_s6 + $0x38] sm:$0xff] }
  0x2e   : > { %1449 = vadd.xlane.f32.xlu1 %v1448_v51  ;;  %831 = vmatprep.subr.mxu0 %v5668_v14  ;;  %v273_v14 = vld [vmem:[%s8968_s0 + $0x168] sm:$0xff]  ;;  %v5895_v34 = vadd.f32 %v324_v21, %v268_v17  ;;  %v5452_v51 = vmov 0.0   ;;  %v282_v17 = vld [vmem:[%s8968_s0 + $0x1b0] sm:$0xff] }
  0x2f   : > { %832 = vmatpush1.msra.mxu0 %v5688_v25  ;;  %v1460_v25 = vadd.f32 %v1459_v20, %v5853_v11  ;;  %v5914_v45 = vadd.f32 %v329_v27, %v273_v14  ;;  %1499 = vmatprep.subr.mxu1 %v5452_v51  ;;  %v395_v20 = vadd.f32 %v339_v5, %v283_v33  ;;  %v6111_v33 = vld [vmem:[%s6036_s6 + $0x60] sm:$0xff]  ;;  %v6114_v5 = vld [vmem:[%s6036_s6 + $0x78] sm:$0xff] }
  0x30   : > { %1445 = vadd.xlane.f32.xlu0 %v1444_v54  ;;  %833 = vmatprep.subr.mxu0 %v5619_v53  ;;  %v330_v53 = vld [vmem:[%s8969_s1 + $0x170] sm:$0xff]  ;;  %v1472_v54 = vadd.f32 %v1471_v32, %v5889_v30 }
  0x31   : > { %834 = vmatpush1.msra.mxu0 %v5628_v57  ;;  %v272_v57 = vld [vmem:[%s8968_s0 + $0x160] sm:$0xff]  ;;  %v5932_v55 = vadd.f32 %v330_v53, %v274_v35  ;;  %v1475_v62 = vsel %vm1386_vm0, %v5914_v45, 0.0  ;;  %v6048_v35 = vld [vmem:[%s6036_s6 + $0x18] sm:$0xff]  ;;  %v3257_v53 = vld [vmem:[%s6012_s28 + $0x68] sm:$0xff] }
  0x32   : > { %1457 = vadd.xlane.f32.xlu1 %v1456_v6  ;;  %835 = vmatprep.subr.mxu0 %v5630_v58  ;;  %v277_v58 = vld [vmem:[%s8968_s0 + $0x188] sm:$0xff]  ;;  %v5938_v28 = vadd.f32 %v328_v41, %v272_v57  ;;  %v6056_v57 = vld [vmem:[%s6036_s6 + $0x10] sm:$0xff]  ;;  %v3259_v41 = vld [vmem:[%s6012_s28 + $0x78] sm:$0xff] }
  0x33   : > { %836 = vmatpush1.msra.mxu0 %v5644_v0  ;;  %v1468_v0 = vadd.f32 %v1467_v40, %v5895_v34  ;;  %v389_v3 = vadd.f32 %v333_v50, %v277_v58  ;;  %v337_v6 = vld [vmem:[%s8969_s1 + $0x1a8] sm:$0xff]  ;;  %v3262_v50 = vld [vmem:[%s6012_s28 + $0x90] sm:$0xff] }
  0x34   : > { %1453 = vadd.xlane.f32.xlu0 %v1452_v47  ;;  %837 = vmatprep.subr.mxu0 %v5579_v37  ;;  %v334_v37 = vld [vmem:[%s8969_s1 + $0x190] sm:$0xff]  ;;  %v1480_v47 = vadd.f32 %v1479_v59, %v5932_v55  ;;  %v1476_v15 = vadd.f32 %v1475_v62, %v5938_v28  ;;  %v6059_v40 = vld [vmem:[%s6036_s6 + $0x28] sm:$0xff]  ;;  %v3264_v59 = vld [vmem:[%s6012_s28 + $0xa0] sm:$0xff] }
  0x35   : > { %838 = vmatpush1.msra.mxu0 %v5577_v36  ;;  %v276_v36 = vld [vmem:[%s8968_s0 + $0x180] sm:$0xff]  ;;  %v390_v10 = vadd.f32 %v334_v37, %v278_v46  ;;  %v1483_v21 = vsel %vm1386_vm0, %v389_v3, 0.0  ;;  %v3261_v58 = vld [vmem:[%s6012_s28 + $0x88] sm:$0xff]  ;;  %v6092_v46 = vld [vmem:[%s6036_s6 + $0x58] sm:$0xff] }
  0x36   : > { %1465 = vadd.xlane.f32.xlu1 %v1464_v29  ;;  %839 = vmatprep.subr.mxu0 %v5594_v43  ;;  %v281_v43 = vld [vmem:[%s8968_s0 + $0x1a8] sm:$0xff]  ;;  %v388_v2 = vadd.f32 %v332_v1, %v276_v36  ;;  %v1495_v29 = vsel %vm1386_vm0, %v395_v20, 0.0  ;;  %v6100_v36 = vld [vmem:[%s6036_s6 + $0x50] sm:$0xff]  ;;  %v3267_v1 = vld [vmem:[%s6012_s28 + $0xb8] sm:$0xff] }
  0x37   : > { %840 = vmatpush1.msra.mxu0 %v5592_v42  ;;  %v1487_v42 = vsel %vm1386_vm0, %v391_v61, 0.0  ;;  %v393_v24 = vadd.f32 %v337_v6, %v281_v43  ;;  %v3265_v37 = vld [vmem:[%s6012_s28 + $0xa8] sm:$0xff]  ;;  %v3270_v6 = vld [vmem:[%s6012_s28 + $0xd0] sm:$0xff] }
  0x38   : > { %1461 = vadd.xlane.f32.xlu0 %v1460_v25  ;;  %841 = vmatprep.subr.mxu0 %v5537_v19  ;;  %v338_v19 = vld [vmem:[%s8969_s1 + $0x1b0] sm:$0xff]  ;;  %v1488_v14 = vadd.f32 %v1487_v42, %v390_v10  ;;  %v6103_v62 = vld [vmem:[%s6036_s6 + $0x68] sm:$0xff]  ;;  %v3272_v42 = vld [vmem:[%s6012_s28 + $0xe0] sm:$0xff] }
  0x39   : > { %842 = vmatpush1.msra.mxu0 %v5535_v18  ;;  %v280_v18 = vld [vmem:[%s8968_s0 + $0x1a0] sm:$0xff]  ;;  %v394_v27 = vadd.f32 %v338_v19, %v282_v17  ;;  %v1491_v32 = vsel %vm1386_vm0, %v393_v24, 0.0  ;;  %v3269_v43 = vld [vmem:[%s6012_s28 + $0xc8] sm:$0xff]  ;;  %v6136_v17 = vld [vmem:[%s6036_s6 + $0x98] sm:$0xff] }
  0x3a   : > { %1473 = vadd.xlane.f32.xlu1 %v1472_v54  ;;  %843 = vmatprep.subr.mxu0 %v5509_v8  ;;  %v1484_v8 = vadd.f32 %v1483_v21, %v388_v2  ;;  %v392_v25 = vadd.f32 %v336_v23, %v280_v18  ;;  %v6078_v54 = vld [vmem:[%s6036_s6 + $0x30] sm:$0xff]  ;;  %v3273_v19 = vld [vmem:[%s6012_s28 + $0xe8] sm:$0xff]  ;;  %v3275_v23 = vld [vmem:[%s6012_s28 + $0xf8] sm:$0xff] }
  0x3b   : > { %844 = vmatpush1.msra.mxu0 %v5499_v4  ;;  %v1496_v4 = vadd.f32 %v1495_v29, %v394_v27  ;;  %v6144_v21 = vld [vmem:[%s6036_s6 + $0x90] sm:$0xff]  ;;  %v6147_v18 = vld [vmem:[%s6036_s6 + $0xa8] sm:$0xff] }
  0x3c   : > { %1469 = vadd.xlane.f32.xlu0 %v1468_v0  ;;  %845 = vmatprep.subr.mxu0 %v5565_v31  ;;  %v1492_v31 = vadd.f32 %v1491_v32, %v392_v25  ;;  %v3263_v0 = vld [vmem:[%s6012_s28 + $0x98] sm:$0xff]  ;;  %v3278_v29 = vld [vmem:[%s6012_s28 + $0x110] sm:$0xff] }
  0x3d   : > { %846 = vmatpush1.msra.mxu0 %v5554_v26  ;;  %v3245_v26 = vld [vmem:[%s6012_s28 + $0x8] sm:$0xff] }
  0x3e   : > { %1481 = vadd.xlane.f32.xlu1 %v1480_v47  ;;  %847 = vmatprep.subr.mxu0 %v5522_v13  ;;  %v3246_v13 = vld [vmem:[%s6012_s28 + $0x10] sm:$0xff] }
  0x3f   : > { %848 = vmatpush1.msra.mxu0 %v5520_v12  ;;  %v3244_v12 = vld [vmem:[%s6012_s28] sm:$0xff]  ;;  %v6122_v47 = vld [vmem:[%s6036_s6 + $0x70] sm:$0xff] }
  0x40   : > { %1477 = vadd.xlane.f32.xlu0 %v1476_v15  ;;  %857 = vmatprep.subr.mxu0 %v395_v20  ;;  %v3271_v15 = vld [vmem:[%s6012_s28 + $0xd8] sm:$0xff]  ;;  %v3274_v20 = vld [vmem:[%s6012_s28 + $0xf0] sm:$0xff] }
  0x41   : > { %858 = vmatpush2.msra.mxu0 %v394_v27  ;;  %v6158_v27 = vld [vmem:[%s6036_s6 + $0xb8] sm:$0xff] }
  0x42   : > { %1489 = vadd.xlane.f32.xlu1 %v1488_v14  ;;  %859 = vmatprep.subr.mxu0 %v393_v24  ;;  %v3276_v24 = vld [vmem:[%s6012_s28 + $0x100] sm:$0xff] }
  0x43   : > { %860 = vmatpush2.msra.mxu0 %v392_v25  ;;  %v6155_v14 = vld [vmem:[%s6036_s6 + $0xa0] sm:$0xff]  ;;  %v6166_v25 = vld [vmem:[%s6036_s6 + $0xb0] sm:$0xff] }
  0x44   : > { %1485 = vadd.xlane.f32.xlu0 %v1484_v8  ;;  %861 = vmatprep.subr.mxu0 %v391_v61  ;;  %v3266_v61 = vld [vmem:[%s6012_s28 + $0xb0] sm:$0xff]  ;;  %v3277_v8 = vld [vmem:[%s6012_s28 + $0x108] sm:$0xff] }
  0x45   : > { %862 = vmatpush2.msra.mxu0 %v390_v10  ;;  %v6125_v10 = vld [vmem:[%s6036_s6 + $0x88] sm:$0xff] }
  0x46   : > { %1497 = vadd.xlane.f32.xlu1 %v1496_v4  ;;  %863 = vmatprep.subr.mxu0 %v389_v3  ;;  %v3268_v3 = vld [vmem:[%s6012_s28 + $0xc0] sm:$0xff]  ;;  %v6171_v4 = vld [vmem:[%s6036_s6 + $0xc8] sm:$0xff] }
  0x47   : > { %864 = vmatpush2.msra.mxu0 %v388_v2  ;;  %v6133_v2 = vld [vmem:[%s6036_s6 + $0x80] sm:$0xff] }
  0x48   : > { %1493 = vadd.xlane.f32.xlu0 %v1492_v31  ;;  %865 = vmatprep.subr.mxu0 %v5903_v39  ;;  %v3258_v39 = vld [vmem:[%s6012_s28 + $0x70] sm:$0xff] }
  0x49   : > { %866 = vmatpush2.msra.mxu0 %v5932_v55  ;;  %v6081_v55 = vld [vmem:[%s6036_s6 + $0x48] sm:$0xff] }
  0x4a   : > { %867 = vmatprep.subr.mxu0 %v5914_v45  ;;  %v3260_v45 = vld [vmem:[%s6012_s28 + $0x80] sm:$0xff] }
  0x4b   : > { %868 = vmatpush2.msra.mxu0 %v5938_v28  ;;  %v6089_v28 = vld [vmem:[%s6036_s6 + $0x40] sm:$0xff] }
  0x4c   : > { %869 = vmatprep.subr.mxu0 %v5861_v16  ;;  %v3255_v16 = vld [vmem:[%s6012_s28 + $0x58] sm:$0xff] }
  0x4d   : > { %870 = vmatpush2.msra.mxu0 %v5889_v30  ;;  %v3256_v30 = vld [vmem:[%s6012_s28 + $0x60] sm:$0xff] }
  0x4e   : > { %871 = vmatprep.subr.mxu0 %v5872_v22  ;;  %v397_v22 = vld [vmem:[%s6036_s6 + $0x8] sm:$0xff] }
  0x4f   : > { %872 = vmatpush2.msra.mxu0 %v5895_v34  ;;  %5088 = vmatprep.mubr.msk.f32.mxu1 %vm564_vm1, %v397_v22  ;;  %v6044_v34 = vld [vmem:[%s6036_s6] sm:$0xff] }
  0x50   : > { %873 = vmatprep.subr.mxu0 %v5819_v60  ;;  %v3247_v60 = vld [vmem:[%s6012_s28 + $0x18] sm:$0xff]  ;;  %5004 = vmatprep.mubr.msk.f32.mxu0 %vm564_vm1, %v397_v22 }
  0x51   : > { %874 = vmatpush2.msra.mxu0 %v5847_v9  ;;  %v3252_v9 = vld [vmem:[%s6012_s28 + $0x40] sm:$0xff]  ;;  %v3283_v22 = vld [vmem:[%s6012_s28 + $0x138] sm:$0xff] }
  0x52   : > { %875 = vmatprep.subr.mxu0 %v5830_v63  ;;  %v3248_v63 = vld [vmem:[%s6012_s28 + $0x20] sm:$0xff] }
  0x53   : > { %876 = vmatpush2.msra.mxu0 %v5853_v11  ;;  %v3254_v11 = vld [vmem:[%s6012_s28 + $0x50] sm:$0xff] }
  0x54   : > { %877 = vmatprep.subr.mxu0 %v5783_v38  ;;  %v3249_v38 = vld [vmem:[%s6012_s28 + $0x28] sm:$0xff] }
  0x55   : > { %878 = vmatpush2.msra.mxu0 %v5807_v52  ;;  %v3250_v52 = vld [vmem:[%s6012_s28 + $0x30] sm:$0xff] }
  0x56   : > { %879 = vmatprep.subr.mxu0 %v5792_v44  ;;  %v3251_v44 = vld [vmem:[%s6012_s28 + $0x38] sm:$0xff] }
  0x57   : > { %4170 = vperm.xlu1 %5187, %v3244_v12   ;;  %880 = vmatpush2.msra.mxu0 %v5811_v56  ;;  %v3253_v56 = vld [vmem:[%s6012_s28 + $0x48] sm:$0xff]  ;;  %v3279_v12 = vld [vmem:[%s6012_s28 + $0x118] sm:$0xff] }
  0x58   : > { %882 = vmatmul.mubr.f32.vlgmr.msra.gmra.mxu0 %v6044_v34 }
  0x59   : > { %5005 = vmatprep.mubr.msk.f32.mxu0 %vm564_vm1, %v6048_v35 }
  0x5b   : > { %4180 = vperm.xlu1 %5187, %v3246_v13   ;;  %v3280_v13 = vld [vmem:[%s6012_s28 + $0x120] sm:$0xff] }
  0x5c   : > { %888 = vmatmul.mubr.f32.gmra.mxu0 %v6056_v57 }
  0x5d   : > { %5006 = vmatprep.mubr.msk.f32.mxu0 %vm564_vm1, %v6059_v40 }
  0x5e   : > { %4175 = vperm.xlu0 %5188, %v3245_v26   ;;  %v6181_v26 = vld [vmem:[%s6036_s6 + $0xc0] sm:$0xff] }
  0x5f   : > { %4185 = vperm.xlu1 %5187, %v3247_v60  }
  0x60   : > { %894 = vmatmul.mubr.f32.gmra.mxu0 %v6067_v48 }
  0x61   : > { %5007 = vmatprep.mubr.msk.f32.mxu0 %vm564_vm1, %v6070_v49 }
  0x62   : > { %4190 = vperm.xlu0 %5188, %v3248_v63   ;;  %v6186_v63 = vld [vmem:[%s6036_s6 + $0xd8] sm:$0xff] }
  0x63   : > { %4195 = vperm.xlu1 %5187, %v3249_v38  }
  0x64   : > { %900 = vmatmul.mubr.f32.gmra.mxu0 %v6078_v54 }
  0x65   : > { %5008 = vmatprep.mubr.msk.f32.mxu0 %vm564_vm1, %v6081_v55 }
  0x66   : > { %4200 = vperm.xlu0 %5188, %v3250_v52   ;;  %v3281_v52 = vld [vmem:[%s6012_s28 + $0x128] sm:$0xff] }
  0x67   : > { %4205 = vperm.xlu1 %5187, %v3251_v44   ;;  %v3282_v44 = vld [vmem:[%s6012_s28 + $0x130] sm:$0xff] }
  0x68   : > { %906 = vmatmul.mubr.f32.gmra.mxu0 %v6089_v28 }
  0x69   : > { %5009 = vmatprep.mubr.msk.f32.mxu0 %vm564_vm1, %v6092_v46 }
  0x6a   : > { %4210 = vperm.xlu0 %5188, %v3252_v9   ;;  %v6196_v9 = vld [vmem:[%s6036_s6 + $0xd0] sm:$0xff] }
  0x6b   : > { %4215 = vperm.xlu1 %5187, %v3253_v56  }
  0x6c   : > { %912 = vmatmul.mubr.f32.gmra.mxu0 %v6100_v36 }
  0x6d   : > { %5010 = vmatprep.mubr.msk.f32.mxu0 %vm564_vm1, %v6103_v62 }
  0x6e   : > { %4220 = vperm.xlu0 %5188, %v3254_v11   ;;  %v6201_v11 = vld [vmem:[%s6036_s6 + $0xe8] sm:$0xff] }
  0x6f   : > { %4225 = vperm.xlu1 %5187, %v3255_v16  }
  0x70   : > { %918 = vmatmul.mubr.f32.gmra.mxu0 %v6111_v33 }
  0x71   : > { %5011 = vmatprep.mubr.msk.f32.mxu0 %vm564_vm1, %v6114_v5 }
  0x72   : > { %4230 = vperm.xlu0 %5188, %v3256_v30   ;;  %v3284_v30 = vld [vmem:[%s6012_s28 + $0x140] sm:$0xff] }
  0x73   : > { %4235 = vperm.xlu1 %5187, %v3257_v53   ;;  %v6211_v53 = vld [vmem:[%s6036_s6 + $0xe0] sm:$0xff] }
  0x74   : > { %924 = vmatmul.mubr.f32.gmra.mxu0 %v6122_v47 }
  0x75   : > { %5012 = vmatprep.mubr.msk.f32.mxu0 %vm564_vm1, %v6125_v10 }
  0x76   : > { %4240 = vperm.xlu0 %5188, %v3258_v39  }
  0x77   : > { %4245 = vperm.xlu1 %5187, %v3259_v41   ;;  %v6216_v41 = vld [vmem:[%s6036_s6 + $0xf8] sm:$0xff] }
  0x78   : > { %930 = vmatmul.mubr.f32.gmra.mxu0 %v6133_v2 }
  0x79   : > { %5013 = vmatprep.mubr.msk.f32.mxu0 %vm564_vm1, %v6136_v17 }
  0x7a   : > { %4250 = vperm.xlu0 %5188, %v3260_v45  }
  0x7b   : > { %4255 = vperm.xlu1 %5187, %v3261_v58   ;;  %v3285_v58 = vld [vmem:[%s6012_s28 + $0x148] sm:$0xff] }
  0x7c   : > { %936 = vmatmul.mubr.f32.gmra.mxu0 %v6144_v21 }
  0x7d   : > { %5014 = vmatprep.mubr.msk.f32.mxu0 %vm564_vm1, %v6147_v18 }
  0x7e   : > { %4260 = vperm.xlu0 %5188, %v3262_v50   ;;  %v3286_v50 = vld [vmem:[%s6012_s28 + $0x150] sm:$0xff] }
  0x7f   : > { %4265 = vperm.xlu1 %5187, %v3263_v0   ;;  %v6226_v0 = vld [vmem:[%s6036_s6 + $0xf0] sm:$0xff] }
  0x80   : > { %942 = vmatmul.mubr.f32.gmra.mxu0 %v6155_v14 }
  0x81   : > { %5015 = vmatprep.mubr.msk.f32.mxu0 %vm564_vm1, %v6158_v27 }
  0x82   : > { %4270 = vperm.xlu0 %5188, %v3264_v59  }
  0x83   : > { %4275 = vperm.xlu1 %5187, %v3265_v37   ;;  %v6231_v37 = vld [vmem:[%s6036_s6 + $0x108] sm:$0xff] }
  0x84   : > { %948 = vmatmul.mubr.f32.gmra.mxu0 %v6166_v25 }
  0x85   : > { %5016 = vmatprep.mubr.msk.f32.mxu0 %vm564_vm1, %v6171_v4 }
  0x86   : > { %4280 = vperm.xlu0 %5188, %v3266_v61  }
  0x87   : > { %4285 = vperm.xlu1 %5187, %v3267_v1   ;;  %v3287_v1 = vld [vmem:[%s6012_s28 + $0x158] sm:$0xff] }
  0x88   : > { %954 = vmatmul.mubr.f32.gmra.mxu0 %v6181_v26 }
  0x89   : > { %5017 = vmatprep.mubr.msk.f32.mxu0 %vm564_vm1, %v6186_v63 }
  0x8a   : > { %4290 = vperm.xlu0 %5188, %v3268_v3   ;;  %v3288_v3 = vld [vmem:[%s6012_s28 + $0x160] sm:$0xff] }
  0x8b   : > { %4295 = vperm.xlu1 %5187, %v3269_v43   ;;  %v6241_v43 = vld [vmem:[%s6036_s6 + $0x100] sm:$0xff] }
  0x8c   : > { %960 = vmatmul.mubr.f32.gmra.mxu0 %v6196_v9 }
  0x8d   : > { %5018 = vmatprep.mubr.msk.f32.mxu0 %vm564_vm1, %v6201_v11 }
  0x8e   : > { %4300 = vperm.xlu0 %5188, %v3270_v6  }
  0x8f   : > { %4305 = vperm.xlu1 %5187, %v3271_v15   ;;  %v6244_v15 = vld [vmem:[%s6036_s6 + $0x118] sm:$0xff] }
  0x90   : > { %966 = vmatmul.mubr.f32.gmra.mxu0 %v6211_v53 }
  0x91   : > { %5019 = vmatprep.mubr.msk.f32.mxu0 %vm564_vm1, %v6216_v41 }
  0x92   : > { %4310 = vperm.xlu0 %5188, %v3272_v42  }
  0x93   : > { %4315 = vperm.xlu1 %5187, %v3273_v19   ;;  %v3289_v19 = vld [vmem:[%s6012_s28 + $0x168] sm:$0xff] }
  0x94   : > { %972 = vmatmul.mubr.f32.gmra.mxu0 %v6226_v0 }
  0x95   : > { %5020 = vmatprep.mubr.msk.f32.mxu0 %vm564_vm1, %v6231_v37 }
  0x96   : > { %4320 = vperm.xlu0 %5188, %v3274_v20   ;;  %v3290_v20 = vld [vmem:[%s6012_s28 + $0x170] sm:$0xff] }
  0x97   : > { %4325 = vperm.xlu1 %5187, %v3275_v23   ;;  %v6252_v23 = vld [vmem:[%s6036_s6 + $0x110] sm:$0xff] }
  0x98   : > { %978 = vmatmul.mubr.f32.gmra.mxu0 %v6241_v43 }
  0x99   : > { %5021 = vmatprep.mubr.msk.f32.mxu0 %vm564_vm1, %v6244_v15 }
  0x9a   : > { %4330 = vperm.xlu0 %5188, %v3276_v24  }
  0x9b   : > { %v6168_v32 = vpop.xlane.xlu1 %1397  ;;  %4335 = vperm.xlu1 %5187, %v3277_v8   ;;  %v6255_v8 = vld [vmem:[%s6036_s6 + $0x128] sm:$0xff] }
  0x9c   : > { %984 = vmatmul.mubr.f32.gmra.mxu0 %v6252_v23 }
  0x9d   : > { %v6174_v31 = vpop.xlane.xlu0 %1389  ;;  %5022 = vmatprep.mubr.msk.f32.mxu0 %vm564_vm1, %v6255_v8 }
  0x9e   : > { %4340 = vperm.xlu0 %5188, %v3278_v29  }
  0x9f   : > { %v6183_v60 = vpop.xlane.xlu1 %1401  ;;  %4345 = vperm.xlu1 %5187, %v3279_v12   ;;  %v3291_v12 = vld [vmem:[%s6012_s28 + $0x178] sm:$0xff] }
  0xa1   : > { %v6189_v38 = vpop.xlane.xlu0 %1393 }
  0xa2   : > { %4350 = vperm.xlu0 %5188, %v3280_v13   ;;  %v3292_v13 = vld [vmem:[%s6012_s28 + $0x180] sm:$0xff] }
  0xa3   : > { %v6198_v56 = vpop.xlane.xlu1 %1409  ;;  %4355 = vperm.xlu1 %5187, %v3281_v52   ;;  %v6263_v52 = vld [vmem:[%s6036_s6 + $0x120] sm:$0xff] }
  0xa4   : > { %990 = vmatmul.mubr.f32.gmra.mxu0 %v6263_v52 }
  0xa5   : > { %v6204_v16 = vpop.xlane.xlu0 %1405 }
  0xa6   : > { %4360 = vperm.xlu0 %5188, %v3282_v44  }
  0xa7   : > { %v6213_v39 = vpop.xlane.xlu1 %1417  ;;  %4365 = vperm.xlu1 %5187, %v3283_v22   ;;  %v6266_v22 = vld [vmem:[%s6036_s6 + $0x138] sm:$0xff] }
  0xa8   : > { %5023 = vmatprep.mubr.msk.f32.mxu0 %vm564_vm1, %v6266_v22 }
  0xa9   : > { %v6219_v45 = vpop.xlane.xlu0 %1413 }
  0xaa   : > { %4370 = vperm.xlu0 %5188, %v3284_v30  }
  0xab   : > { %v6228_v59 = vpop.xlane.xlu1 %1425  ;;  %4375 = vperm.xlu1 %5187, %v3285_v58   ;;  %v3293_v58 = vld [vmem:[%s6012_s28 + $0x188] sm:$0xff] }
  0xad   : > { %v6234_v61 = vpop.xlane.xlu0 %1421 }
  0xae   : > { %4380 = vperm.xlu0 %5188, %v3286_v50   ;;  %v3294_v50 = vld [vmem:[%s6012_s28 + $0x190] sm:$0xff] }
  0xaf   : > { %v1434_v6 = vpop.xlane.xlu1 %1433  ;;  %4385 = vperm.xlu1 %5187, %v3287_v1  }
  0xb1   : > { %v1430_v42 = vpop.xlane.xlu0 %1429 }
  0xb2   : > { %4390 = vperm.xlu0 %5188, %v3288_v3   ;;  %v6278_v3 = vld [vmem:[%s6036_s6 + $0x130] sm:$0xff] }
  0xb3   : > { %v1442_v24 = vpop.xlane.xlu1 %1441  ;;  %4395 = vperm.xlu1 %5187, %v3289_v19   ;;  %996 = vmatmul.mubr.f32.gmra.mxu0 %v6278_v3 }
  0xb5   : > { %v1438_v29 = vpop.xlane.xlu0 %1437 }
  0xb6   : > { %4400 = vperm.xlu0 %5188, %v3290_v20   ;;  %v3295_v20 = vld [vmem:[%s6012_s28 + $0x198] sm:$0xff] }
  0xb7   : > { %v1450_v44 = vpop.xlane.xlu1 %1449  ;;  %4405 = vperm.xlu1 %5187, %v3291_v12   ;;  %v6286_v12 = vld [vmem:[%s6036_s6 + $0x148] sm:$0xff] }
  0xb8   : > { %1500 = vmatpush1.msra.mxu1 %v1450_v44  ;;  %5024 = vmatprep.mubr.msk.f32.mxu0 %vm564_vm1, %v6286_v12  ;;  %v6295_v44 = vld [vmem:[%s6036_s6 + $0x140] sm:$0xff] }
  0xb9   : > { %v1446_v30 = vpop.xlane.xlu0 %1445  ;;  %1501 = vmatprep.subr.mxu1 %v5452_v51  ;;  %1002 = vmatmul.mubr.f32.gmra.mxu0 %v6295_v44 }
  0xba   : > { %4410 = vperm.xlu0 %5188, %v3292_v13   ;;  %1502 = vmatpush1.msra.mxu1 %v1446_v30  ;;  %v3296_v13 = vld [vmem:[%s6012_s28 + $0x1a0] sm:$0xff] }
  0xbb   : > { %1503 = vmatprep.subr.mxu1 %v5452_v51  ;;  %v6275_v1 = vpop.xlane.xlu1 %1457  ;;  %4415 = vperm.xlu1 %5187, %v3293_v58   ;;  %v3297_v58 = vld [vmem:[%s6012_s28 + $0x1a8] sm:$0xff] }
  0xbc   : > { %1504 = vmatpush1.msra.mxu1 %v1442_v24 }
  0xbd   : > { %v6280_v19 = vpop.xlane.xlu0 %1453  ;;  %1505 = vmatprep.subr.mxu1 %v5452_v51 }
  0xbe   : > { %4420 = vperm.xlu0 %5188, %v3294_v50   ;;  %1506 = vmatpush1.msra.mxu1 %v1438_v29  ;;  %v6303_v29 = vld [vmem:[%s6036_s6 + $0x158] sm:$0xff]  ;;  %v3298_v50 = vld [vmem:[%s6012_s28 + $0x1b0] sm:$0xff] }
  0xbf   : > { %1507 = vmatprep.subr.mxu1 %v5452_v51  ;;  %v6292_v24 = vpop.xlane.xlu1 %1465  ;;  %4425 = vperm.xlu1 %5187, %v3295_v20   ;;  %v6312_v20 = vld [vmem:[%s6036_s6 + $0x150] sm:$0xff] }
  0xc0   : > { %1508 = vmatpush1.msra.mxu1 %v1434_v6  ;;  %5025 = vmatprep.mubr.msk.f32.mxu0 %vm564_vm1, %v6303_v29  ;;  %9202 = vst [vmem:[#allocation2_spill] sm:$0xff] %v6312_v20 }
  0xc1   : > { %v6297_v30 = vpop.xlane.xlu0 %1461  ;;  %1509 = vmatprep.subr.mxu1 %v5452_v51  ;;  %1008 = vmatmul.mubr.f32.gmra.mxu0 %v6312_v20  ;;  %v3301_v20 = vld [vmem:[%s6012_s28 + $0x1c8] sm:$0xff] }
  0xc2   : > { %4430 = vperm.xlu0 %5188, %v3296_v13   ;;  %1510 = vmatpush1.msra.mxu1 %v1430_v42  ;;  %v3299_v13 = vld [vmem:[%s6012_s28 + $0x1b8] sm:$0xff] }
  0xc3   : > { %1511 = vmatprep.subr.mxu1 %v5452_v51  ;;  %v6309_v6 = vpop.xlane.xlu1 %1473  ;;  %4435 = vperm.xlu1 %5187, %v3297_v58   ;;  %v3300_v58 = vld [vmem:[%s6012_s28 + $0x1c0] sm:$0xff] }
  0xc4   : > { %1512 = vmatpush1.msra.mxu1 %v6228_v59  ;;  %5026 = vmatprep.mubr.msk.f32.mxu0 %vm564_vm1, %v6321_v7  ;;  %v6329_v59 = vld [vmem:[%s6036_s6 + $0x160] sm:$0xff] }
  0xc5   : > { %1513 = vmatprep.subr.mxu1 %v5452_v51  ;;  %v6318_v42 = vpop.xlane.xlu0 %1469  ;;  %9203 = vst [vmem:[#allocation3_spill] sm:$0xff] %v6329_v59  ;;  %1014 = vmatmul.mubr.f32.gmra.mxu0 %v6329_v59  ;;  %v6348_v59 = vld [vmem:[%s6036_s6 + $0x170] sm:$0xff] }
  0xc6   : > { %4440 = vperm.xlu0 %5188, %v3298_v50   ;;  %1514 = vmatpush1.msra.mxu1 %v6234_v61  ;;  %v6338_v50 = vld [vmem:[%s6036_s6 + $0x178] sm:$0xff]  ;;  %9205 = vst [vmem:[#allocation5_spill] sm:$0xff] %v6348_v59 }
  0xc7   : > { %1515 = vmatprep.subr.mxu1 %v5452_v51  ;;  %4445 = vperm.xlu1 %5187, %v3299_v13   ;;  %v6335_v61 = vpop.xlane.xlu1 %1481  ;;  %9204 = vst [vmem:[#allocation4_spill] sm:$0xff] %v6338_v50  ;;  %v3302_v13 = vld [vmem:[%s6012_s28 + $0x1d0] sm:$0xff] }
  0xc8   : > { %1516 = vmatpush1.msra.mxu1 %v6213_v39  ;;  %5027 = vmatprep.mubr.msk.f32.mxu0 %vm564_vm1, %v6338_v50  ;;  %v3304_v50 = vld [vmem:[%s6012_s28 + $0x1e0] sm:$0xff] }
  0xc9   : > { %1517 = vmatprep.subr.mxu1 %v5452_v51  ;;  %v6345_v39 = vpop.xlane.xlu0 %1477  ;;  %1020 = vmatmul.mubr.f32.gmra.mxu0 %v6348_v59  ;;  %v3306_v59 = vld [vmem:[%s6012_s28 + $0x1f0] sm:$0xff] }
  0xca   : > { %4450 = vperm.xlu0 %5188, %v3300_v58   ;;  %1518 = vmatpush1.msra.mxu1 %v6219_v45  ;;  %v3303_v58 = vld [vmem:[%s6012_s28 + $0x1d8] sm:$0xff]  ;;  %v6355_v45 = vld [vmem:[%s6036_s6 + $0x188] sm:$0xff] }
  0xcb   : > { %1519 = vmatprep.subr.mxu1 %v5452_v51  ;;  %4455 = vperm.xlu1 %5187, %v3301_v20   ;;  %9206 = vst [vmem:[#allocation6_spill] sm:$0xff] %v6355_v45  ;;  %v6363_v20 = vld [vmem:[%s6036_s6 + $0x180] sm:$0xff] }
  0xcc   : > { %1520 = vmatpush1.msra.mxu1 %v6198_v56  ;;  %5028 = vmatprep.mubr.msk.f32.mxu0 %vm564_vm1, %v6355_v45  ;;  %v1490_v56 = vpop.xlane.xlu1 %1489  ;;  %v6370_v45 = vld [vmem:[%s6036_s6 + $0x198] sm:$0xff] }
  0xcd   : > { %1521 = vmatprep.subr.mxu1 %v5452_v51  ;;  %1026 = vmatmul.mubr.f32.gmra.mxu0 %v6363_v20  ;;  %9207 = vst [vmem:[#allocation7_spill] sm:$0xff] %v6370_v45 }
  0xce   : > { %4460 = vperm.xlu0 %5188, %v3302_v13   ;;  %1522 = vmatpush1.msra.mxu1 %v6204_v16  ;;  %v3305_v13 = vld [vmem:[%s6012_s28 + $0x1e8] sm:$0xff]  ;;  %v1486_v16 = vpop.xlane.xlu0 %1485 }
  0xcf   : > { %1523 = vmatprep.subr.mxu1 %v5452_v51  ;;  %4465 = vperm.xlu1 %5187, %v3303_v58   ;;  %v3307_v58 = vld [vmem:[%s6012_s28 + $0x1f8] sm:$0xff] }
  0xd0   : > { %1524 = vmatpush1.msra.mxu1 %v6183_v60  ;;  %5029 = vmatprep.mubr.msk.f32.mxu0 %vm564_vm1, %v6370_v45  ;;  %v6378_v60 = vld [vmem:[%s6036_s6 + $0x190] sm:$0xff]  ;;  %v3308_v45 = vld [vmem:[%s6012_s28 + $0x200] sm:$0xff] }
  0xd1   : > { %1525 = vmatprep.subr.mxu1 %v5452_v51  ;;  %9208 = vst [vmem:[#allocation8_spill] sm:$0xff] %v6378_v60  ;;  %1032 = vmatmul.mubr.f32.gmra.mxu0 %v6378_v60  ;;  %v3309_v60 = vld [vmem:[%s6012_s28 + $0x208] sm:$0xff] }
  0xd2   : > { %4470 = vperm.xlu0 %5188, %v3304_v50   ;;  %1526 = vmatpush1.msra.mxu1 %v6168_v32  ;;  %v1498_v32 = vpop.xlane.xlu1 %1497  ;;  %v6385_v50 = vld [vmem:[%s6036_s6 + $0x1a8] sm:$0xff] }
  0xd3   : > { %1527 = vmatprep.subr.mxu1 %v5452_v51  ;;  %4475 = vperm.xlu1 %5187, %v3305_v13   ;;  %v6393_v13 = vld [vmem:[%s6036_s6 + $0x1a0] sm:$0xff] }
  0xd4   : > { %1528 = vmatpush1.msra.mxu1 %v6189_v38  ;;  %5030 = vmatprep.mubr.msk.f32.mxu0 %vm564_vm1, %v6385_v50  ;;  %v1494_v38 = vpop.xlane.xlu0 %1493 }
  0xd5   : > { %1529 = vmatprep.subr.mxu1 %v5452_v51  ;;  %1038 = vmatmul.mubr.f32.gmra.mxu0 %v6393_v13 }
  0xd6   : > { %4480 = vperm.xlu0 %5188, %v3306_v59   ;;  %1530 = vmatpush1.msra.mxu1 %v6174_v31  ;;  %v6399_v31 = vld [vmem:[%s6036_s6 + $0x1b8] sm:$0xff]  ;;  %v3310_v59 = vld [vmem:[%s6012_s28 + $0x210] sm:$0xff] }
  0xd7   : > { %1539 = vmatprep.subr.mxu1 %v5452_v51  ;;  %4485 = vperm.xlu1 %5187, %v3307_v58   ;;  %v6406_v58 = vld [vmem:[%s6036_s6 + $0x1b0] sm:$0xff] }
  0xd8   : > { %1540 = vmatpush2.msra.mxu1 %v1498_v32  ;;  %5031 = vmatprep.mubr.msk.f32.mxu0 %vm564_vm1, %v6399_v31  ;;  %v3311_v32 = vld [vmem:[%s6012_s28 + $0x218] sm:$0xff] }
  0xd9   : > { %1541 = vmatprep.subr.mxu1 %v5452_v51  ;;  %1044 = vmatmul.mubr.f32.gmra.mxu0 %v6406_v58 }
  0xda   : > { %4490 = vperm.xlu0 %5188, %v3308_v45   ;;  %1542 = vmatpush2.msra.mxu1 %v1494_v38  ;;  %v6412_v45 = vld [vmem:[%s6036_s6 + $0x1c8] sm:$0xff]  ;;  %v3312_v38 = vld [vmem:[%s6012_s28 + $0x220] sm:$0xff] }
  0xdb   : > { %1543 = vmatprep.subr.mxu1 %v5452_v51  ;;  %4495 = vperm.xlu1 %5187, %v3309_v60   ;;  %v3313_v60 = vld [vmem:[%s6012_s28 + $0x228] sm:$0xff] }
  0xdc   : > { %1544 = vmatpush2.msra.mxu1 %v1490_v56  ;;  %5032 = vmatprep.mubr.msk.f32.mxu0 %vm564_vm1, %v6412_v45  ;;  %v6419_v56 = vld [vmem:[%s6036_s6 + $0x1c0] sm:$0xff] }
  0xdd   : > { %1545 = vmatprep.subr.mxu1 %v5452_v51  ;;  %1050 = vmatmul.mubr.f32.gmra.mxu0 %v6419_v56 }
  0xde   : > { %4500 = vperm.xlu0 %5188, %v3310_v59   ;;  %1546 = vmatpush2.msra.mxu1 %v1486_v16  ;;  %v6426_v16 = vld [vmem:[%s6036_s6 + $0x1d8] sm:$0xff]  ;;  %v3314_v59 = vld [vmem:[%s6012_s28 + $0x230] sm:$0xff] }
  0xdf   : > { %1547 = vmatprep.subr.mxu1 %v5452_v51  ;;  %4505 = vperm.xlu1 %5187, %v3311_v32   ;;  %v3315_v32 = vld [vmem:[%s6012_s28 + $0x238] sm:$0xff] }
  0xe0   : > { %1548 = vmatpush2.msra.mxu1 %v6335_v61  ;;  %5033 = vmatprep.mubr.msk.f32.mxu0 %vm564_vm1, %v6426_v16  ;;  %v6434_v61 = vld [vmem:[%s6036_s6 + $0x1d0] sm:$0xff] }
  0xe1   : > { %1549 = vmatprep.subr.mxu1 %v5452_v51  ;;  %1056 = vmatmul.mubr.f32.gmra.mxu0 %v6434_v61 }
  0xe2   : > { %4510 = vperm.xlu0 %5188, %v3312_v38   ;;  %1550 = vmatpush2.msra.mxu1 %v6345_v39  ;;  %v6441_v39 = vld [vmem:[%s6036_s6 + $0x1e8] sm:$0xff]  ;;  %v3316_v38 = vld [vmem:[%s6012_s28 + $0x240] sm:$0xff] }
  0xe3   : > { %1551 = vmatprep.subr.mxu1 %v5452_v51  ;;  %4515 = vperm.xlu1 %5187, %v3313_v60   ;;  %v3317_v60 = vld [vmem:[%s6012_s28 + $0x248] sm:$0xff] }
  0xe4   : > { %1552 = vmatpush2.msra.mxu1 %v6309_v6  ;;  %5034 = vmatprep.mubr.msk.f32.mxu0 %vm564_vm1, %v6441_v39  ;;  %v6449_v6 = vld [vmem:[%s6036_s6 + $0x1e0] sm:$0xff] }
  0xe5   : > { %1553 = vmatprep.subr.mxu1 %v5452_v51  ;;  %1062 = vmatmul.mubr.f32.gmra.mxu0 %v6449_v6 }
  0xe6   : > { %4520 = vperm.xlu0 %5188, %v3314_v59   ;;  %1554 = vmatpush2.msra.mxu1 %v6318_v42  ;;  %v6456_v42 = vld [vmem:[%s6036_s6 + $0x1f8] sm:$0xff]  ;;  %v3318_v59 = vld [vmem:[%s6012_s28 + $0x250] sm:$0xff] }
  0xe7   : > { %1555 = vmatprep.subr.mxu1 %v5452_v51  ;;  %4525 = vperm.xlu1 %5187, %v3315_v32   ;;  %v3319_v32 = vld [vmem:[%s6012_s28 + $0x258] sm:$0xff] }
  0xe8   : > { %1556 = vmatpush2.msra.mxu1 %v6292_v24  ;;  %5035 = vmatprep.mubr.msk.f32.mxu0 %vm564_vm1, %v6456_v42  ;;  %v6464_v24 = vld [vmem:[%s6036_s6 + $0x1f0] sm:$0xff] }
  0xe9   : > { %1557 = vmatprep.subr.mxu1 %v5452_v51  ;;  %1068 = vmatmul.mubr.f32.gmra.mxu0 %v6464_v24 }
  0xea   : > { %4530 = vperm.xlu0 %5188, %v3316_v38   ;;  %1558 = vmatpush2.msra.mxu1 %v6297_v30  ;;  %v6471_v30 = vld [vmem:[%s6036_s6 + $0x208] sm:$0xff]  ;;  %v3320_v38 = vld [vmem:[%s6012_s28 + $0x260] sm:$0xff] }
  0xeb   : > { %1559 = vmatprep.subr.mxu1 %v5452_v51  ;;  %4535 = vperm.xlu1 %5187, %v3317_v60   ;;  %v6485_v60 = vld [vmem:[%s6036_s6 + $0x218] sm:$0xff] }
  0xec   : > { %1560 = vmatpush2.msra.mxu1 %v6275_v1  ;;  %5036 = vmatprep.mubr.msk.f32.mxu0 %vm564_vm1, %v6471_v30  ;;  %v6479_v1 = vld [vmem:[%s6036_s6 + $0x200] sm:$0xff] }
  0xed   : > { %1561 = vmatprep.subr.mxu1 %v5452_v51  ;;  %v3321_v51 = vld [vmem:[%s6012_s28 + $0x268] sm:$0xff]  ;;  %1074 = vmatmul.mubr.f32.gmra.mxu0 %v6479_v1 }
  0xee   : > { %4540 = vperm.xlu0 %5188, %v3318_v59   ;;  %1562 = vmatpush2.msra.mxu1 %v6280_v19  ;;  %v3322_v19 = vld [vmem:[%s6012_s28 + $0x270] sm:$0xff]  ;;  %v6499_v59 = vld [vmem:[%s6036_s6 + $0x228] sm:$0xff] }
  0xef   : > { %1564 = vmatmul.mubr.f32.vlgmr.msra.gmra.mxu1 %v6044_v34  ;;  %4545 = vperm.xlu1 %5187, %v3319_v32   ;;  %v6493_v34 = vld [vmem:[%s6036_s6 + $0x210] sm:$0xff]  ;;  %v3324_v32 = vld [vmem:[%s6012_s28 + $0x280] sm:$0xff] }
  0xf0   : > { %5089 = vmatprep.mubr.msk.f32.mxu1 %vm564_vm1, %v6048_v35  ;;  %5037 = vmatprep.mubr.msk.f32.mxu0 %vm564_vm1, %v6485_v60  ;;  %v3323_v35 = vld [vmem:[%s6012_s28 + $0x278] sm:$0xff] }
  0xf1   : > { %1080 = vmatmul.mubr.f32.gmra.mxu0 %v6493_v34 }
  0xf2   : > { %4550 = vperm.xlu0 %5188, %v3320_v38   ;;  %5038 = vmatprep.mubr.msk.f32.mxu0 %vm564_vm1, %v6499_v59  ;;  %v6513_v38 = vld [vmem:[%s6036_s6 + $0x238] sm:$0xff] }
  0xf3   : > { %1569 = vmatmul.mubr.f32.gmra.mxu1 %v6056_v57  ;;  %4555 = vperm.xlu1 %5187, %v3321_v51   ;;  %v6507_v57 = vld [vmem:[%s6036_s6 + $0x220] sm:$0xff]  ;;  %v6520_v51 = vld [vmem:[%s6036_s6 + $0x230] sm:$0xff] }
  0xf4   : > { %5090 = vmatprep.mubr.msk.f32.mxu1 %vm564_vm1, %v6059_v40  ;;  %v3325_v40 = vld [vmem:[%s6012_s28 + $0x288] sm:$0xff] }
  0xf5   : > { %1086 = vmatmul.mubr.f32.gmra.mxu0 %v6507_v57 }
  0xf6   : > { %4560 = vperm.xlu0 %5188, %v3322_v19   ;;  %5039 = vmatprep.mubr.msk.f32.mxu0 %vm564_vm1, %v6513_v38 }
  0xf7   : > { %1574 = vmatmul.mubr.f32.gmra.mxu1 %v6067_v48  ;;  %4565 = vperm.xlu1 %5187, %v3323_v35   ;;  %v5453_v48 = vmov 0  }
  0xf8   : > { %5091 = vmatprep.mubr.msk.f32.mxu1 %vm564_vm1, %v6070_v49  ;;  %v9209_v49 = vld [vmem:[#allocation2_spill] sm:$0xff] }
  0xf9   : > { %1092 = vmatmul.mubr.f32.gmra.mxu0 %v6520_v51 }
  0xfa   : > { %4570 = vperm.xlu0 %5188, %v3324_v32  }
  0xfb   : > { %1579 = vmatmul.mubr.f32.gmra.mxu1 %v6078_v54  ;;  %4575 = vperm.xlu1 %5187, %v3325_v40   ;;  %v9210_v54 = vld [vmem:[#allocation3_spill] sm:$0xff] }
  0xfc   : > { %5092 = vmatprep.mubr.msk.f32.mxu1 %vm564_vm1, %v6081_v55  ;;  %v6580_v55 = vpop.permute.xlu1 %4170 }
  0xfe   : > { %5189 = vset.pattern.permute.xlu0 %v5453_v48 }
  0xff   : > { %1584 = vmatmul.mubr.f32.gmra.mxu1 %v6089_v28  ;;  %5190 = vset.pattern.permute.xlu1 %v5453_v48  ;;  %v9211_v28 = vld [vmem:[#allocation4_spill] sm:$0xff] }
 0x100   : > { %5093 = vmatprep.mubr.msk.f32.mxu1 %vm564_vm1, %v6092_v46  ;;  %v9212_v46 = vld [vmem:[#allocation5_spill] sm:$0xff] }
 0x103   : > { %1589 = vmatmul.mubr.f32.gmra.mxu1 %v6100_v36  ;;  %v9213_v36 = vld [vmem:[#allocation6_spill] sm:$0xff] }
 0x104   : > { %5094 = vmatprep.mubr.msk.f32.mxu1 %vm564_vm1, %v6103_v62  ;;  %v6587_v62 = vpop.permute.xlu1 %4180 }
 0x107   : > { %1594 = vmatmul.mubr.f32.gmra.mxu1 %v6111_v33  ;;  %v9214_v33 = vld [vmem:[#allocation7_spill] sm:$0xff] }
 0x108   : > { %5095 = vmatprep.mubr.msk.f32.mxu1 %vm564_vm1, %v6114_v5  ;;  %v6593_v5 = vpop.permute.xlu1 %4185 }
 0x10b   : > { %1599 = vmatmul.mubr.f32.gmra.mxu1 %v6122_v47  ;;  %v469_v47 = vld [vmem:[%s6036_s6 + $0x248] sm:$0xff] }
 0x10c   : > { %5096 = vmatprep.mubr.msk.f32.mxu1 %vm564_vm1, %v6125_v10  ;;  %v468_v10 = vld [vmem:[%s6036_s6 + $0x240] sm:$0xff]  ;;  %5040 = vmatprep.mubr.msk.f32.mxu0 %vm564_vm1, %v469_v47 }
 0x10d   : > { %1098 = vmatmul.mubr.f32.gmra.mxu0 %v468_v10 }
 0x10f   : > { %1604 = vmatmul.mubr.f32.gmra.mxu1 %v6133_v2  ;;  %v6601_v2 = vpop.permute.xlu0 %4175 }
 0x110   : > { %5097 = vmatprep.mubr.msk.f32.mxu1 %vm564_vm1, %v6136_v17  ;;  %v6605_v17 = vpop.permute.xlu1 %4195 }
 0x113   : > { %1609 = vmatmul.mubr.f32.gmra.mxu1 %v6144_v21  ;;  %v6610_v21 = vpop.permute.xlu0 %4190 }
 0x114   : > { %5098 = vmatprep.mubr.msk.f32.mxu1 %vm564_vm1, %v6147_v18  ;;  %v471_v18 = vld [vmem:[%s6036_s6 + $0x258] sm:$0xff] }
 0x115   : > { %5041 = vmatprep.mubr.msk.f32.mxu0 %vm564_vm1, %v471_v18 }
 0x117   : > { %1614 = vmatmul.mubr.f32.gmra.mxu1 %v6155_v14  ;;  %v6614_v14 = vpop.permute.xlu1 %4205 }
 0x118   : > { %5099 = vmatprep.mubr.msk.f32.mxu1 %vm564_vm1, %v6158_v27  ;;  %v470_v27 = vld [vmem:[%s6036_s6 + $0x250] sm:$0xff] }
 0x119   : > { %1104 = vmatmul.mubr.f32.gmra.mxu0 %v470_v27 }
 0x11b   : > { %1619 = vmatmul.mubr.f32.gmra.mxu1 %v6166_v25  ;;  %v6621_v25 = vpop.permute.xlu0 %4200 }
 0x11c   : > { %5100 = vmatprep.mubr.msk.f32.mxu1 %vm564_vm1, %v6171_v4  ;;  %v6625_v4 = vpop.permute.xlu1 %4215 }
 0x11d   : > { %9216 = vst [vmem:[#allocation2_spill] sm:$0xff] %v6625_v4 }
 0x11f   : > { %1624 = vmatmul.mubr.f32.gmra.mxu1 %v6181_v26  ;;  %v6630_v26 = vpop.permute.xlu0 %4210 }
 0x120   : > { %5101 = vmatprep.mubr.msk.f32.mxu1 %vm564_vm1, %v6186_v63  ;;  %9217 = vst [vmem:[#allocation3_spill] sm:$0xff] %v6630_v26  ;;  %v6633_v63 = vpop.permute.xlu1 %4225 }
 0x121   : > { %9218 = vst [vmem:[#allocation4_spill] sm:$0xff] %v6633_v63 }
 0x123   : > { %1629 = vmatmul.mubr.f32.gmra.mxu1 %v6196_v9  ;;  %v6638_v9 = vpop.permute.xlu0 %4220 }
 0x124   : > { %5102 = vmatprep.mubr.msk.f32.mxu1 %vm564_vm1, %v6201_v11  ;;  %9219 = vst [vmem:[#allocation5_spill] sm:$0xff] %v6638_v9  ;;  %v6642_v11 = vpop.permute.xlu1 %4235 }
 0x125   : > { %9220 = vst [vmem:[#allocation6_spill] sm:$0xff] %v6642_v11  ;;  %v559_v11 = vld [vmem:[%s6036_s6 + $0x518] sm:$0xff] }
 0x127   : > { %1634 = vmatmul.mubr.f32.gmra.mxu1 %v6211_v53  ;;  %v6647_v53 = vpop.permute.xlu0 %4230 }
 0x128   : > { %5103 = vmatprep.mubr.msk.f32.mxu1 %vm564_vm1, %v6216_v41  ;;  %9221 = vst [vmem:[#allocation7_spill] sm:$0xff] %v6647_v53  ;;  %v6650_v41 = vpop.permute.xlu1 %4245 }
 0x12b   : > { %1639 = vmatmul.mubr.f32.gmra.mxu1 %v6226_v0  ;;  %v6655_v0 = vpop.permute.xlu0 %4240 }
 0x12c   : > { %5104 = vmatprep.mubr.msk.f32.mxu1 %vm564_vm1, %v6231_v37  ;;  %9223 = vst [vmem:[#allocation9_spill] sm:$0xff] %v6655_v0  ;;  %v6658_v37 = vpop.permute.xlu1 %4255 }
 0x12d   : > { %9224 = vst [vmem:[#allocation10_spill] sm:$0xff] %v6658_v37 }
 0x12f   : > { %1644 = vmatmul.mubr.f32.gmra.mxu1 %v6241_v43  ;;  %v6661_v43 = vpop.permute.xlu0 %4250 }
 0x130   : > { %5105 = vmatprep.mubr.msk.f32.mxu1 %vm564_vm1, %v6244_v15  ;;  %9225 = vst [vmem:[#allocation11_spill] sm:$0xff] %v6661_v43  ;;  %v6663_v15 = vpop.permute.xlu1 %4265 }
 0x131   : > { %9226 = vst [vmem:[#allocation12_spill] sm:$0xff] %v6663_v15 }
 0x133   : > { %1649 = vmatmul.mubr.f32.gmra.mxu1 %v6252_v23  ;;  %v6665_v23 = vpop.permute.xlu0 %4260 }
 0x134   : > { %5106 = vmatprep.mubr.msk.f32.mxu1 %vm564_vm1, %v6255_v8  ;;  %9227 = vst [vmem:[#allocation13_spill] sm:$0xff] %v6665_v23  ;;  %v6667_v8 = vpop.permute.xlu1 %4275  ;;  %v513_v23 = vld [vmem:[%s6036_s6 + $0x3a8] sm:$0xff] }
 0x135   : > { %9228 = vst [vmem:[#allocation14_spill] sm:$0xff] %v6667_v8 }
 0x137   : > { %1654 = vmatmul.mubr.f32.gmra.mxu1 %v6263_v52  ;;  %v473_v52 = vld [vmem:[%s6036_s6 + $0x268] sm:$0xff] }
 0x138   : > { %5107 = vmatprep.mubr.msk.f32.mxu1 %vm564_vm1, %v6266_v22  ;;  %v472_v22 = vld [vmem:[%s6036_s6 + $0x260] sm:$0xff]  ;;  %5042 = vmatprep.mubr.msk.f32.mxu0 %vm564_vm1, %v473_v52 }
 0x139   : > { %1110 = vmatmul.mubr.f32.gmra.mxu0 %v472_v22 }
 0x13b   : > { %1659 = vmatmul.mubr.f32.gmra.mxu1 %v6278_v3  ;;  %v6673_v3 = vpop.permute.xlu0 %4270 }
 0x13c   : > { %5108 = vmatprep.mubr.msk.f32.mxu1 %vm564_vm1, %v6286_v12  ;;  %9229 = vst [vmem:[#allocation15_spill] sm:$0xff] %v6673_v3  ;;  %v6675_v12 = vpop.permute.xlu1 %4285 }
 0x13d   : > { %9230 = vst [vmem:[#allocation16_spill] sm:$0xff] %v6675_v12 }
 0x13f   : > { %1664 = vmatmul.mubr.f32.gmra.mxu1 %v6295_v44  ;;  %v6677_v44 = vpop.permute.xlu0 %4280 }
 0x140   : > { %5109 = vmatprep.mubr.msk.f32.mxu1 %vm564_vm1, %v6303_v29  ;;  %9231 = vst [vmem:[#allocation17_spill] sm:$0xff] %v6677_v44  ;;  %v475_v29 = vld [vmem:[%s6036_s6 + $0x278] sm:$0xff]  ;;  %v509_v44 = vld [vmem:[%s6036_s6 + $0x388] sm:$0xff] }
 0x141   : > { %5043 = vmatprep.mubr.msk.f32.mxu0 %vm564_vm1, %v475_v29 }
 0x143   : > { %1669 = vmatmul.mubr.f32.gmra.mxu1 %v9209_v49 }
 0x144   : > { %5110 = vmatprep.mubr.msk.f32.mxu1 %vm564_vm1, %v6321_v7  ;;  %v9215_v7 = vld [vmem:[#allocation8_spill] sm:$0xff] }
 0x145   : > { %9222 = vst [vmem:[#allocation8_spill] sm:$0xff] %v6650_v41 }
 0x147   : > { %1674 = vmatmul.mubr.f32.gmra.mxu1 %v9210_v54 }
 0x148   : > { %5111 = vmatprep.mubr.msk.f32.mxu1 %vm564_vm1, %v9211_v28  ;;  %v477_v28 = vld [vmem:[%s6036_s6 + $0x288] sm:$0xff] }
 0x14b   : > { %1679 = vmatmul.mubr.f32.gmra.mxu1 %v9212_v46 }
 0x14c   : > { %5112 = vmatprep.mubr.msk.f32.mxu1 %vm564_vm1, %v9213_v36 }
 0x14f   : > { %1684 = vmatmul.mubr.f32.gmra.mxu1 %v6363_v20  ;;  %v474_v20 = vld [vmem:[%s6036_s6 + $0x270] sm:$0xff] }
 0x150   : > { %5113 = vmatprep.mubr.msk.f32.mxu1 %vm564_vm1, %v9214_v33  ;;  %1116 = vmatmul.mubr.f32.gmra.mxu0 %v474_v20  ;;  %v476_v33 = vld [vmem:[%s6036_s6 + $0x280] sm:$0xff] }
 0x151   : > { %5044 = vmatprep.mubr.msk.f32.mxu0 %vm564_vm1, %v477_v28 }
 0x153   : > { %1689 = vmatmul.mubr.f32.gmra.mxu1 %v9215_v7 }
 0x154   : > { %5114 = vmatprep.mubr.msk.f32.mxu1 %vm564_vm1, %v6385_v50  ;;  %v6683_v50 = vpop.permute.xlu1 %4295  ;;  %1122 = vmatmul.mubr.f32.gmra.mxu0 %v476_v33 }
 0x155   : > { %9232 = vst [vmem:[#allocation18_spill] sm:$0xff] %v6683_v50 }
 0x157   : > { %1694 = vmatmul.mubr.f32.gmra.mxu1 %v6393_v13  ;;  %v6685_v13 = vpop.permute.xlu0 %4290 }
 0x158   : > { %5115 = vmatprep.mubr.msk.f32.mxu1 %vm564_vm1, %v6399_v31  ;;  %9233 = vst [vmem:[#allocation19_spill] sm:$0xff] %v6685_v13  ;;  %v6687_v31 = vpop.permute.xlu1 %4305 }
 0x159   : > { %9234 = vst [vmem:[#allocation20_spill] sm:$0xff] %v6687_v31 }
 0x15b   : > { %1699 = vmatmul.mubr.f32.gmra.mxu1 %v6406_v58  ;;  %v6689_v58 = vpop.permute.xlu0 %4300 }
 0x15c   : > { %5116 = vmatprep.mubr.msk.f32.mxu1 %vm564_vm1, %v6412_v45  ;;  %9235 = vst [vmem:[#allocation21_spill] sm:$0xff] %v6689_v58  ;;  %v6691_v45 = vpop.permute.xlu1 %4315  ;;  %v505_v58 = vld [vmem:[%s6036_s6 + $0x368] sm:$0xff] }
 0x15d   : > { %9236 = vst [vmem:[#allocation22_spill] sm:$0xff] %v6691_v45 }
 0x15f   : > { %1704 = vmatmul.mubr.f32.gmra.mxu1 %v6419_v56  ;;  %v6693_v56 = vpop.permute.xlu0 %4310 }
 0x160   : > { %5117 = vmatprep.mubr.msk.f32.mxu1 %vm564_vm1, %v6426_v16  ;;  %9237 = vst [vmem:[#allocation23_spill] sm:$0xff] %v6693_v56  ;;  %v6695_v16 = vpop.permute.xlu1 %4325 }
 0x161   : > { %9238 = vst [vmem:[#allocation24_spill] sm:$0xff] %v6695_v16 }
 0x163   : > { %1709 = vmatmul.mubr.f32.gmra.mxu1 %v6434_v61  ;;  %v6697_v61 = vpop.permute.xlu0 %4320 }
 0x164   : > { %5118 = vmatprep.mubr.msk.f32.mxu1 %vm564_vm1, %v6441_v39  ;;  %9239 = vst [vmem:[#allocation25_spill] sm:$0xff] %v6697_v61  ;;  %v6699_v39 = vpop.permute.xlu1 %4335  ;;  %v501_v61 = vld [vmem:[%s6036_s6 + $0x348] sm:$0xff] }
 0x165   : > { %9240 = vst [vmem:[#allocation26_spill] sm:$0xff] %v6699_v39 }
 0x167   : > { %1714 = vmatmul.mubr.f32.gmra.mxu1 %v6449_v6 }
 0x168   : > { %5119 = vmatprep.mubr.msk.f32.mxu1 %vm564_vm1, %v6456_v42 }
 0x16b   : > { %1719 = vmatmul.mubr.f32.gmra.mxu1 %v6464_v24 }
 0x16c   : > { %5120 = vmatprep.mubr.msk.f32.mxu1 %vm564_vm1, %v6471_v30  ;;  %v6701_v30 = vpop.permute.xlu0 %4330 }
 0x16d   : > { %9241 = vst [vmem:[#allocation27_spill] sm:$0xff] %v6701_v30 }
 0x16f   : > { %1724 = vmatmul.mubr.f32.gmra.mxu1 %v6479_v1 }
 0x170   : > { %5121 = vmatprep.mubr.msk.f32.mxu1 %vm564_vm1, %v6485_v60  ;;  %v6703_v60 = vpop.permute.xlu1 %4345 }
 0x171   : > { %9242 = vst [vmem:[#allocation28_spill] sm:$0xff] %v6703_v60 }
 0x173   : > { %1729 = vmatmul.mubr.f32.gmra.mxu1 %v6493_v34 }
 0x174   : > { %5122 = vmatprep.mubr.msk.f32.mxu1 %vm564_vm1, %v6499_v59  ;;  %v6705_v59 = vpop.permute.xlu0 %4340  ;;  %v6707_v40 = vpop.permute.xlu1 %4355 }
 0x175   : > { %9243 = vst [vmem:[#allocation29_spill] sm:$0xff] %v6705_v59  ;;  %9244 = vst [vmem:[#allocation30_spill] sm:$0xff] %v6707_v40  ;;  %v497_v59 = vld [vmem:[%s6036_s6 + $0x328] sm:$0xff] }
 0x177   : > { %1734 = vmatmul.mubr.f32.gmra.mxu1 %v6507_v57 }
 0x178   : > { %5123 = vmatprep.mubr.msk.f32.mxu1 %vm564_vm1, %v6513_v38  ;;  %v6709_v49 = vpop.permute.xlu0 %4350  ;;  %v6712_v46 = vpop.permute.xlu1 %4365 }
 0x179   : > { %9245 = vst [vmem:[#allocation31_spill] sm:$0xff] %v6709_v49  ;;  %9246 = vst [vmem:[#allocation32_spill] sm:$0xff] %v6712_v46 }
 0x17b   : > { %1739 = vmatmul.mubr.f32.gmra.mxu1 %v6520_v51 }
 0x17c   : > { %5124 = vmatprep.mubr.msk.f32.mxu1 %vm564_vm1, %v469_v47 }
 0x17f   : > { %1744 = vmatmul.mubr.f32.gmra.mxu1 %v468_v10  ;;  %v6717_v10 = vpop.permute.xlu0 %4360 }
 0x180   : > { %5125 = vmatprep.mubr.msk.f32.mxu1 %vm564_vm1, %v471_v18  ;;  %9247 = vst [vmem:[#allocation33_spill] sm:$0xff] %v6717_v10  ;;  %v489_v10 = vld [vmem:[%s6036_s6 + $0x2e8] sm:$0xff] }
 0x183   : > { %1749 = vmatmul.mubr.f32.gmra.mxu1 %v470_v27 }
 0x184   : > { %5126 = vmatprep.mubr.msk.f32.mxu1 %vm564_vm1, %v473_v52  ;;  %v6719_v52 = vpop.permute.xlu1 %4375 }
 0x185   : > { %9248 = vst [vmem:[#allocation34_spill] sm:$0xff] %v6719_v52 }
 0x187   : > { %1754 = vmatmul.mubr.f32.gmra.mxu1 %v472_v22 }
 0x188   : > { %5127 = vmatprep.mubr.msk.f32.mxu1 %vm564_vm1, %v475_v29 }
 0x18b   : > { %1759 = vmatmul.mubr.f32.gmra.mxu1 %v474_v20 }
 0x18c   : > { %5128 = vmatprep.mubr.msk.f32.mxu1 %vm564_vm1, %v477_v28 }
 0x18f   : > { %1764 = vmatmul.mubr.f32.gmra.mxu1 %v476_v33 }
 0x1af   : > { %v1565_v6 = vpop.f32.mrf.mxu1 }
 0x1b0   : > { %v1984_v42 = vmul.f32 0.0051020407, %v1565_v6  ;;  %v479_v6 = vld [vmem:[%s6036_s6 + $0x298] sm:$0xff] }
 0x1b1   : > { %v1567_v24 = vpop.f32.mrf.mxu1  ;;  %5129 = vmatprep.mubr.msk.f32.mxu1 %vm564_vm1, %v479_v6  ;;  %5045 = vmatprep.mubr.msk.f32.mxu0 %vm564_vm1, %v479_v6 }
 0x1b2   : > { %2070 = vperm.xlu0 %5189, %v1984_v42   ;;  %v6722_v42 = vpop.permute.xlu0 %4370  ;;  %v478_v24 = vld [vmem:[%s6036_s6 + $0x290] sm:$0xff] }
 0x1b3   : > { %v1570_v1 = vpop.f32.mrf.mxu1  ;;  %9249 = vst [vmem:[#allocation35_spill] sm:$0xff] %v6722_v42  ;;  %1769 = vmatmul.mubr.f32.gmra.mxu1 %v478_v24  ;;  %1128 = vmatmul.mubr.f32.gmra.mxu0 %v478_v24 }
 0x1b4   : > { %v1985_v19 = vmul.f32 0.0051020407, %v1570_v1 }
 0x1b5   : > { %v1572_v34 = vpop.f32.mrf.mxu1 }
 0x1b6   : > { %2075 = vperm.xlu1 %5190, %v1985_v19   ;;  %v6727_v19 = vpop.permute.xlu1 %4385 }
 0x1b7   : > { %v1575_v35 = vpop.f32.mrf.mxu1  ;;  %9250 = vst [vmem:[#allocation36_spill] sm:$0xff] %v6727_v19 }
 0x1b8   : > { %v1986_v32 = vmul.f32 0.0051020407, %v1575_v35 }
 0x1b9   : > { %v1577_v57 = vpop.f32.mrf.mxu1 }
 0x1ba   : > { %2080 = vperm.xlu1 %5190, %v1986_v32   ;;  %v6729_v57 = vpop.permute.xlu0 %4380 }
 0x1bb   : > { %v1580_v38 = vpop.f32.mrf.mxu1  ;;  %9251 = vst [vmem:[#allocation37_spill] sm:$0xff] %v6729_v57 }
 0x1bc   : > { %v1987_v51 = vmul.f32 0.0051020407, %v1580_v38 }
 0x1bd   : > { %v1582_v48 = vpop.f32.mrf.mxu1 }
 0x1be   : > { %2085 = vperm.xlu1 %5190, %v1987_v51   ;;  %v6731_v48 = vpop.permute.xlu1 %4395  ;;  %v6733_v33 = vpop.permute.xlu0 %4390 }
 0x1bf   : > { %v1585_v54 = vpop.f32.mrf.mxu1  ;;  %9252 = vst [vmem:[#allocation38_spill] sm:$0xff] %v6731_v48  ;;  %9253 = vst [vmem:[#allocation39_spill] sm:$0xff] %v6733_v33 }
 0x1c0   : > { %v1988_v36 = vmul.f32 0.0051020407, %v1585_v54 }
 0x1c1   : > { %v1587_v7 = vpop.f32.mrf.mxu1 }
 0x1c2   : > { %2090 = vperm.xlu1 %5190, %v1988_v36  }
 0x1c3   : > { %v1590_v47 = vpop.f32.mrf.mxu1 }
 0x1c4   : > { %v1989_v18 = vmul.f32 0.0051020407, %v1590_v47  ;;  %v6735_v47 = vpop.permute.xlu1 %4405 }
 0x1c5   : > { %v1592_v27 = vpop.f32.mrf.mxu1  ;;  %9254 = vst [vmem:[#allocation40_spill] sm:$0xff] %v6735_v47 }
 0x1c6   : > { %2095 = vperm.xlu1 %5190, %v1989_v18  }
 0x1c7   : > { %v1595_v22 = vpop.f32.mrf.mxu1 }
 0x1c8   : > { %v1990_v29 = vmul.f32 0.0051020407, %v1595_v22  ;;  %v6739_v24 = vpop.permute.xlu1 %4415 }
 0x1c9   : > { %v1597_v20 = vpop.f32.mrf.mxu1  ;;  %9256 = vst [vmem:[#allocation42_spill] sm:$0xff] %v6739_v24 }
 0x1ca   : > { %2100 = vperm.xlu1 %5190, %v1990_v29   ;;  %v6737_v29 = vpop.permute.xlu0 %4400 }
 0x1cb   : > { %v1600_v1 = vpop.f32.mrf.mxu1  ;;  %9255 = vst [vmem:[#allocation41_spill] sm:$0xff] %v6737_v29 }
 0x1cc   : > { %v1991_v34 = vmul.f32 0.0051020407, %v1600_v1 }
 0x1cd   : > { %v1602_v35 = vpop.f32.mrf.mxu1 }
 0x1ce   : > { %2105 = vperm.xlu1 %5190, %v1991_v34  }
 0x1cf   : > { %v1605_v32 = vpop.f32.mrf.mxu1 }
 0x1d0   : > { %v1992_v38 = vmul.f32 0.0051020407, %v1605_v32  ;;  %v6741_v32 = vpop.permute.xlu0 %4410 }
 0x1d1   : > { %v1607_v51 = vpop.f32.mrf.mxu1  ;;  %9257 = vst [vmem:[#allocation43_spill] sm:$0xff] %v6741_v32  ;;  %v481_v32 = vld [vmem:[%s6036_s6 + $0x2a8] sm:$0xff] }
 0x1d2   : > { %2110 = vperm.xlu1 %5190, %v1992_v38   ;;  %v6743_v51 = vpop.permute.xlu1 %4425  ;;  %5130 = vmatprep.mubr.msk.f32.mxu1 %vm564_vm1, %v481_v32 }
 0x1d3   : > { %v1610_v54 = vpop.f32.mrf.mxu1  ;;  %9258 = vst [vmem:[#allocation44_spill] sm:$0xff] %v6743_v51  ;;  %5046 = vmatprep.mubr.msk.f32.mxu0 %vm564_vm1, %v481_v32 }
 0x1d4   : > { %v1993_v28 = vmul.f32 0.0051020407, %v1610_v54 }
 0x1d5   : > { %v1612_v36 = vpop.f32.mrf.mxu1 }
 0x1d6   : > { %2115 = vperm.xlu0 %5189, %v1993_v28  }
 0x1d7   : > { %v1615_v7 = vpop.f32.mrf.mxu1 }
 0x1d8   : > { %v1994_v18 = vmul.f32 0.0051020407, %v1615_v7  ;;  %v6745_v7 = vpop.permute.xlu0 %4420 }
 0x1d9   : > { %v1617_v27 = vpop.f32.mrf.mxu1  ;;  %9259 = vst [vmem:[#allocation45_spill] sm:$0xff] %v6745_v7 }
 0x1da   : > { %2120 = vperm.xlu1 %5190, %v1994_v18  }
 0x1db   : > { %v1620_v22 = vpop.f32.mrf.mxu1 }
 0x1dc   : > { %v1995_v20 = vmul.f32 0.0051020407, %v1620_v22  ;;  %v6747_v22 = vpop.permute.xlu1 %4435 }
 0x1dd   : > { %v1622_v6 = vpop.f32.mrf.mxu1  ;;  %9260 = vst [vmem:[#allocation46_spill] sm:$0xff] %v6747_v22 }
 0x1de   : > { %2125 = vperm.xlu0 %5189, %v1995_v20  }
 0x1df   : > { %v1625_v1 = vpop.f32.mrf.mxu1 }
 0x1e0   : > { %v1996_v34 = vmul.f32 0.0051020407, %v1625_v1 }
 0x1e1   : > { %v1627_v35 = vpop.f32.mrf.mxu1 }
 0x1e2   : > { %2130 = vperm.xlu1 %5190, %v1996_v34   ;;  %v6749_v34 = vpop.permute.xlu0 %4430 }
 0x1e3   : > { %v1630_v38 = vpop.f32.mrf.mxu1  ;;  %9261 = vst [vmem:[#allocation47_spill] sm:$0xff] %v6749_v34  ;;  %v483_v34 = vld [vmem:[%s6036_s6 + $0x2b8] sm:$0xff] }
 0x1e4   : > { %v1997_v54 = vmul.f32 0.0051020407, %v1630_v38  ;;  %v6751_v38 = vpop.permute.xlu1 %4445 }
 0x1e5   : > { %v1632_v28 = vpop.f32.mrf.mxu1  ;;  %9262 = vst [vmem:[#allocation48_spill] sm:$0xff] %v6751_v38 }
 0x1e6   : > { %2135 = vperm.xlu0 %5189, %v1997_v54  }
 0x1e7   : > { %v1635_v36 = vpop.f32.mrf.mxu1 }
 0x1e8   : > { %v1998_v18 = vmul.f32 0.0051020407, %v1635_v36  ;;  %v6753_v36 = vpop.permute.xlu0 %4440 }
 0x1e9   : > { %v1637_v27 = vpop.f32.mrf.mxu1  ;;  %9263 = vst [vmem:[#allocation49_spill] sm:$0xff] %v6753_v36 }
 0x1ea   : > { %2140 = vperm.xlu1 %5190, %v1998_v18   ;;  %v480_v18 = vld [vmem:[%s6036_s6 + $0x2a0] sm:$0xff] }
 0x1eb   : > { %v1640_v20 = vpop.f32.mrf.mxu1  ;;  %1774 = vmatmul.mubr.f32.gmra.mxu1 %v480_v18  ;;  %1134 = vmatmul.mubr.f32.gmra.mxu0 %v480_v18 }
 0x1ec   : > { %v1999_v6 = vmul.f32 0.0051020407, %v1640_v20  ;;  %v6759_v20 = vpop.permute.xlu1 %4455  ;;  %5131 = vmatprep.mubr.msk.f32.mxu1 %vm564_vm1, %v483_v34  ;;  %5047 = vmatprep.mubr.msk.f32.mxu0 %vm564_vm1, %v483_v34 }
 0x1ed   : > { %v1642_v1 = vpop.f32.mrf.mxu1  ;;  %9264 = vst [vmem:[#allocation50_spill] sm:$0xff] %v6759_v20 }
 0x1ee   : > { %2145 = vperm.xlu0 %5189, %v1999_v6  }
 0x1ef   : > { %v1645_v35 = vpop.f32.mrf.mxu1 }
 0x1f0   : > { %v2000_v54 = vmul.f32 0.0051020407, %v1645_v35 }
 0x1f1   : > { %v1647_v28 = vpop.f32.mrf.mxu1 }
 0x1f2   : > { %2150 = vperm.xlu1 %5190, %v2000_v54   ;;  %v6761_v54 = vpop.permute.xlu0 %4450 }
 0x1f3   : > { %v1650_v7 = vpop.f32.mrf.mxu1  ;;  %9265 = vst [vmem:[#allocation51_spill] sm:$0xff] %v6761_v54 }
 0x1f4   : > { %v2001_v27 = vmul.f32 0.0051020407, %v1650_v7 }
 0x1f5   : > { %v1652_v29 = vpop.f32.mrf.mxu1 }
 0x1f6   : > { %2155 = vperm.xlu0 %5189, %v2001_v27   ;;  %v6763_v29 = vpop.permute.xlu1 %4465  ;;  %v482_v27 = vld [vmem:[%s6036_s6 + $0x2b0] sm:$0xff]  ;;  %v6769_v33 = vpop.permute.xlu0 %4460 }
 0x1f7   : > { %v1655_v6 = vpop.f32.mrf.mxu1  ;;  %9266 = vst [vmem:[#allocation52_spill] sm:$0xff] %v6763_v29  ;;  %9267 = vst [vmem:[#allocation53_spill] sm:$0xff] %v6769_v33  ;;  %1779 = vmatmul.mubr.f32.gmra.mxu1 %v482_v27  ;;  %1140 = vmatmul.mubr.f32.gmra.mxu0 %v482_v27 }
 0x1f8   : > { %v2002_v1 = vmul.f32 0.0051020407, %v1655_v6 }
 0x1f9   : > { %v1657_v35 = vpop.f32.mrf.mxu1 }
 0x1fa   : > { %2160 = vperm.xlu1 %5190, %v2002_v1   ;;  %v6771_v1 = vpop.permute.xlu1 %4475 }
 0x1fb   : > { %v1660_v7 = vpop.f32.mrf.mxu1  ;;  %9268 = vst [vmem:[#allocation54_spill] sm:$0xff] %v6771_v1 }
 0x1fc   : > { %v2003_v28 = vmul.f32 0.0051020407, %v1660_v7 }
 0x1fd   : > { %v1662_v36 = vpop.f32.mrf.mxu1 }
 0x1fe   : > { %2165 = vperm.xlu0 %5189, %v2003_v28   ;;  %v6773_v28 = vpop.permute.xlu0 %4470  ;;  %v6775_v29 = vpop.permute.xlu1 %4485 }
 0x1ff   : > { %v1665_v32 = vpop.f32.mrf.mxu1  ;;  %9269 = vst [vmem:[#allocation55_spill] sm:$0xff] %v6773_v28  ;;  %9270 = vst [vmem:[#allocation56_spill] sm:$0xff] %v6775_v29 }
 0x200   : > { %v2004_v18 = vmul.f32 0.0051020407, %v1665_v32 }
 0x201   : > { %v1667_v6 = vpop.f32.mrf.mxu1 }
 0x202   : > { %2170 = vperm.xlu1 %5190, %v2004_v18   ;;  %v6777_v32 = vpop.permute.xlu0 %4480  ;;  %v6779_v38 = vpop.permute.xlu1 %4495 }
 0x203   : > { %v1670_v35 = vpop.f32.mrf.mxu1  ;;  %9271 = vst [vmem:[#allocation57_spill] sm:$0xff] %v6777_v32  ;;  %9272 = vst [vmem:[#allocation58_spill] sm:$0xff] %v6779_v38 }
 0x204   : > { %v2005_v7 = vmul.f32 0.0051020407, %v1670_v35 }
 0x205   : > { %v1672_v36 = vpop.f32.mrf.mxu1 }
 0x206   : > { %2175 = vperm.xlu0 %5189, %v2005_v7   ;;  %v6781_v1 = vpop.permute.xlu0 %4490  ;;  %v6783_v28 = vpop.permute.xlu1 %4505 }
 0x207   : > { %v1675_v54 = vpop.f32.mrf.mxu1  ;;  %9273 = vst [vmem:[#allocation59_spill] sm:$0xff] %v6781_v1  ;;  %9274 = vst [vmem:[#allocation60_spill] sm:$0xff] %v6783_v28 }
 0x208   : > { %v2006_v20 = vmul.f32 0.0051020407, %v1675_v54 }
 0x209   : > { %v1677_v34 = vpop.f32.mrf.mxu1 }
 0x20a   : > { %2180 = vperm.xlu1 %5190, %v2006_v20   ;;  %v6785_v29 = vpop.permute.xlu0 %4500  ;;  %v6787_v32 = vpop.permute.xlu1 %4515 }
 0x20b   : > { %v1680_v33 = vpop.f32.mrf.mxu1  ;;  %9275 = vst [vmem:[#allocation61_spill] sm:$0xff] %v6785_v29  ;;  %9276 = vst [vmem:[#allocation62_spill] sm:$0xff] %v6787_v32  ;;  %v485_v32 = vld [vmem:[%s6036_s6 + $0x2c8] sm:$0xff] }
 0x20c   : > { %v2007_v27 = vmul.f32 0.0051020407, %v1680_v33  ;;  %5132 = vmatprep.mubr.msk.f32.mxu1 %vm564_vm1, %v485_v32  ;;  %5048 = vmatprep.mubr.msk.f32.mxu0 %vm564_vm1, %v485_v32  ;;  %v486_v32 = vld [vmem:[%s6036_s6 + $0x2d0] sm:$0xff] }
 0x20d   : > { %v1682_v6 = vpop.f32.mrf.mxu1 }
 0x20e   : > { %2185 = vperm.xlu0 %5189, %v2007_v27   ;;  %v6789_v38 = vpop.permute.xlu0 %4510  ;;  %v6791_v1 = vpop.permute.xlu1 %4525 }
 0x20f   : > { %v1685_v18 = vpop.f32.mrf.mxu1  ;;  %9277 = vst [vmem:[#allocation63_spill] sm:$0xff] %v6789_v38  ;;  %9278 = vst [vmem:[#allocation64_spill] sm:$0xff] %v6791_v1 }
 0x210   : > { %v2008_v35 = vmul.f32 0.0051020407, %v1685_v18 }
 0x211   : > { %v1687_v36 = vpop.f32.mrf.mxu1 }
 0x212   : > { %2190 = vperm.xlu1 %5190, %v2008_v35  }
 0x213   : > { %v1690_v7 = vpop.f32.mrf.mxu1 }
 0x214   : > { %v2009_v54 = vmul.f32 0.0051020407, %v1690_v7 }
 0x215   : > { %v1692_v34 = vpop.f32.mrf.mxu1 }
 0x216   : > { %2195 = vperm.xlu0 %5189, %v2009_v54  }
 0x217   : > { %v1695_v20 = vpop.f32.mrf.mxu1 }
 0x218   : > { %v2010_v33 = vmul.f32 0.0051020407, %v1695_v20  ;;  %v6793_v20 = vpop.permute.xlu0 %4520 }
 0x219   : > { %v1697_v6 = vpop.f32.mrf.mxu1  ;;  %9279 = vst [vmem:[#allocation65_spill] sm:$0xff] %v6793_v20 }
 0x21a   : > { %2200 = vperm.xlu1 %5190, %v2010_v33   ;;  %v6795_v33 = vpop.permute.xlu1 %4535 }
 0x21b   : > { %v1700_v27 = vpop.f32.mrf.mxu1  ;;  %9280 = vst [vmem:[#allocation66_spill] sm:$0xff] %v6795_v33  ;;  %v487_v33 = vld [vmem:[%s6036_s6 + $0x2d8] sm:$0xff] }
 0x21c   : > { %v2011_v18 = vmul.f32 0.0051020407, %v1700_v27 }
 0x21d   : > { %v1702_v36 = vpop.f32.mrf.mxu1 }
 0x21e   : > { %2205 = vperm.xlu0 %5189, %v2011_v18   ;;  %v6798_v18 = vpop.permute.xlu0 %4530 }
 0x21f   : > { %v1705_v35 = vpop.f32.mrf.mxu1  ;;  %9281 = vst [vmem:[#allocation67_spill] sm:$0xff] %v6798_v18 }
 0x220   : > { %v2012_v7 = vmul.f32 0.0051020407, %v1705_v35  ;;  %v484_v35 = vld [vmem:[%s6036_s6 + $0x2c0] sm:$0xff] }
 0x221   : > { %v1707_v54 = vpop.f32.mrf.mxu1  ;;  %1784 = vmatmul.mubr.f32.gmra.mxu1 %v484_v35  ;;  %1146 = vmatmul.mubr.f32.gmra.mxu0 %v484_v35 }
 0x222   : > { %2210 = vperm.xlu1 %5190, %v2012_v7   ;;  %5133 = vmatprep.mubr.msk.f32.mxu1 %vm564_vm1, %v487_v33 }
 0x223   : > { %v1710_v34 = vpop.f32.mrf.mxu1  ;;  %5049 = vmatprep.mubr.msk.f32.mxu0 %vm564_vm1, %v487_v33 }
 0x224   : > { %v2013_v6 = vmul.f32 0.0051020407, %v1710_v34 }
 0x225   : > { %v1712_v29 = vpop.f32.mrf.mxu1  ;;  %1789 = vmatmul.mubr.f32.gmra.mxu1 %v486_v32  ;;  %1152 = vmatmul.mubr.f32.gmra.mxu0 %v486_v32 }
 0x226   : > { %2215 = vperm.xlu0 %5189, %v2013_v6   ;;  %v6803_v29 = vpop.permute.xlu1 %4545  ;;  %v6805_v6 = vpop.permute.xlu0 %4540  ;;  %5134 = vmatprep.mubr.msk.f32.mxu1 %vm564_vm1, %v489_v10 }
 0x227   : > { %v1715_v27 = vpop.f32.mrf.mxu1  ;;  %9282 = vst [vmem:[#allocation68_spill] sm:$0xff] %v6803_v29  ;;  %9283 = vst [vmem:[#allocation69_spill] sm:$0xff] %v6805_v6  ;;  %5050 = vmatprep.mubr.msk.f32.mxu0 %vm564_vm1, %v489_v10 }
 0x228   : > { %v2014_v36 = vmul.f32 0.0051020407, %v1715_v27 }
 0x229   : > { %v1717_v38 = vpop.f32.mrf.mxu1 }
 0x22a   : > { %2220 = vperm.xlu1 %5190, %v2014_v36   ;;  %v6807_v18 = vpop.permute.xlu1 %4555 }
 0x22b   : > { %v1720_v7 = vpop.f32.mrf.mxu1  ;;  %9284 = vst [vmem:[#allocation70_spill] sm:$0xff] %v6807_v18 }
 0x22c   : > { %v2015_v54 = vmul.f32 0.0051020407, %v1720_v7  ;;  %v883_v7 = vpop.f32.mrf.mxu0 }
 0x22d   : > { %v1722_v34 = vpop.f32.mrf.mxu1 }
 0x22e   : > { %2225 = vperm.xlu0 %5189, %v2015_v54   ;;  %v6813_v54 = vpop.permute.xlu0 %4550 }
 0x22f   : > { %v1725_v38 = vpop.f32.mrf.mxu1  ;;  %9285 = vst [vmem:[#allocation71_spill] sm:$0xff] %v6813_v54 }
 0x230   : > { %v2016_v27 = vmul.f32 0.0051020407, %v1725_v38  ;;  %v6815_v38 = vpop.permute.xlu1 %4565 }
 0x231   : > { %v1727_v36 = vpop.f32.mrf.mxu1  ;;  %9286 = vst [vmem:[#allocation72_spill] sm:$0xff] %v6815_v38 }
 0x232   : > { %2230 = vperm.xlu1 %5190, %v2016_v27   ;;  %v885_v36 = vpop.f32.mrf.mxu0  ;;  %v6817_v18 = vpop.permute.xlu0 %4560 }
 0x233   : > { %v1730_v20 = vpop.f32.mrf.mxu1  ;;  %9287 = vst [vmem:[#allocation73_spill] sm:$0xff] %v6817_v18 }
 0x234   : > { %v2017_v1 = vmul.f32 0.0051020407, %v1730_v20  ;;  %v889_v20 = vpop.f32.mrf.mxu0  ;;  %v6819_v28 = vpop.permute.xlu1 %4575 }
 0x235   : > { %v1732_v35 = vpop.f32.mrf.mxu1  ;;  %9288 = vst [vmem:[#allocation74_spill] sm:$0xff] %v6819_v28 }
 0x236   : > { %2235 = vperm.xlu0 %5189, %v2017_v1   ;;  %v891_v35 = vpop.f32.mrf.mxu0  ;;  %v6823_v32 = vpop.permute.xlu0 %4570 }
 0x237   : > { %v1735_v34 = vpop.f32.mrf.mxu1  ;;  %9289 = vst [vmem:[#allocation75_spill] sm:$0xff] %v6823_v32 }
 0x238   : > { %v2076_v54 = vpop.permute.xlu1 %2075  ;;  %v895_v51 = vpop.f32.mrf.mxu0 }
 0x239   : > { %v1737_v27 = vpop.f32.mrf.mxu1  ;;  %v6831_v48 = vsub.f32 %v889_v20, %v2076_v54 }
 0x23a   : > { %v2071_v24 = vpop.permute.xlu0 %2070  ;;  %v6827_v27 = vsub.f32 %v891_v35, %v2076_v54 }
 0x23b   : > { %v1740_v6 = vpop.f32.mrf.mxu1  ;;  %v6829_v47 = vsub.f32 %v885_v36, %v2071_v24  ;;  %v6833_v28 = vsub.f32 %v883_v7, %v2071_v24  ;;  %v2658_v36 = vmul.f32 %v6831_v48, %v6831_v48 }
 0x23c   : > { %v2081_v18 = vpop.permute.xlu1 %2080 }
 0x23d   : > { %v1742_v29 = vpop.f32.mrf.mxu1  ;;  %v6845_v57 = vsub.f32 %v895_v51, %v2081_v18  ;;  %v2656_v24 = vmul.f32 %v6833_v28, %v6833_v28 }
 0x23e   : > { %v897_v29 = vpop.f32.mrf.mxu0 }
 0x23f   : > { %v6821_v33 = vpop.f32.mrf.mxu1  ;;  %v6837_v32 = vsub.f32 %v897_v29, %v2081_v18  ;;  %v2660_v29 = vmul.f32 %v6845_v57, %v6845_v57 }
 0x240   : > { %v2020_v40 = vmul.f32 0.0051020407, %v6821_v33 }
 0x241   : > { %v1747_v22 = vpop.f32.mrf.mxu1  ;;  %v2661_v7 = vmul.f32 %v6837_v32, %v6837_v32 }
 0x242   : > { %v2659_v22 = vmul.f32 %v6827_v27, %v6827_v27 }
 0x243   : > { %v6825_v1 = vpop.f32.mrf.mxu1  ;;  %v2832_v51 = vsel %vm1386_vm0, %v2661_v7, 0.0  ;;  %v2086_v7 = vpop.permute.xlu1 %2085 }
 0x244   : > { %v2828_v54 = vsel %vm1386_vm0, %v2659_v22, 0.0  ;;  %v2833_v42 = vadd.f32 %v2832_v51, %v2660_v29  ;;  %v488_v22 = vld [vmem:[%s6036_s6 + $0x2e0] sm:$0xff] }
 0x245   : > { %v1752_v38 = vpop.f32.mrf.mxu1  ;;  %1794 = vmatmul.mubr.f32.gmra.mxu1 %v488_v22  ;;  %1158 = vmatmul.mubr.f32.gmra.mxu0 %v488_v22 }
 0x246   : > { %v2657_v38 = vmul.f32 %v6829_v47, %v6829_v47 }
 0x247   : > { %v6839_v19 = vpop.f32.mrf.mxu1  ;;  %v2091_v10 = vpop.permute.xlu1 %2090 }
 0x248   : > { %v2824_v20 = vsel %vm1386_vm0, %v2657_v38, 0.0  ;;  %v2018_v38 = vmul.f32 0.0051020407, %v1735_v34  ;;  %v2022_v39 = vmul.f32 0.0051020407, %v6839_v19 }
 0x249   : > { %v1757_v35 = vpop.f32.mrf.mxu1  ;;  %v2825_v52 = vadd.f32 %v2824_v20, %v2656_v24  ;;  %v490_v24 = vld [vmem:[%s6036_s6 + $0x2f0] sm:$0xff] }
 0x24a   : > { %v2829_v35 = vadd.f32 %v2828_v54, %v2658_v36  ;;  %v491_v36 = vld [vmem:[%s6036_s6 + $0x2f8] sm:$0xff] }
 0x24b   : > { %v6856_v18 = vpop.f32.mrf.mxu1  ;;  %5135 = vmatprep.mubr.msk.f32.mxu1 %vm564_vm1, %v491_v36  ;;  %5051 = vmatprep.mubr.msk.f32.mxu0 %vm564_vm1, %v491_v36 }
 0x24c   : > { %1799 = vmatmul.mubr.f32.gmra.mxu1 %v490_v24  ;;  %1164 = vmatmul.mubr.f32.gmra.mxu0 %v490_v24 }
 0x24d   : > { %v1762_v46 = vpop.f32.mrf.mxu1 }
 0x24e   : > { %v2019_v46 = vmul.f32 0.0051020407, %v1740_v6 }
 0x24f   : > { %v6872_v51 = vpop.f32.mrf.mxu1 }
 0x250   : > { %v2024_v45 = vmul.f32 0.0051020407, %v6872_v51 }
 0x251   : > { %v1767_v6 = vpop.f32.mrf.mxu1 }
 0x252   : > { %v493_v6 = vld [vmem:[%s6036_s6 + $0x308] sm:$0xff] }
 0x253   : > { %5136 = vmatprep.mubr.msk.f32.mxu1 %vm564_vm1, %v493_v6  ;;  %5052 = vmatprep.mubr.msk.f32.mxu0 %vm564_vm1, %v493_v6 }
 0x255   : > { %2830 = vadd.xlane.f32.xlu0 %v2829_v35 }
 0x256   : > { %2826 = vadd.xlane.f32.xlu1 %v2825_v52  ;;  %v901_v52 = vpop.f32.mrf.mxu0 }
 0x257   : > { %v6868_v34 = vsub.f32 %v901_v52, %v2086_v7 }
 0x259   : > { %2834 = vadd.xlane.f32.xlu0 %v2833_v42  ;;  %v903_v42 = vpop.f32.mrf.mxu0  ;;  %v2662_v36 = vmul.f32 %v6868_v34, %v6868_v34 }
 0x25a   : > { %v6866_v20 = vsub.f32 %v903_v42, %v2086_v7 }
 0x25b   : > { %v907_v54 = vpop.f32.mrf.mxu0 }
 0x25c   : > { %v2663_v22 = vmul.f32 %v6866_v20, %v6866_v20 }
 0x25d   : > { %v909_v29 = vpop.f32.mrf.mxu0 }
 0x25e   : > { %v6870_v35 = vsub.f32 %v909_v29, %v2091_v10 }
 0x260   : > { %v2665_v24 = vmul.f32 %v6870_v35, %v6870_v35 }
 0x262   : > { %v2840_v7 = vsel %vm1386_vm0, %v2665_v24, 0.0  ;;  %v2021_v24 = vmul.f32 0.0051020407, %v6825_v1 }
 0x267   : > { %2240 = vperm.xlu1 %5190, %v2018_v38   ;;  %v6876_v38 = vsub.f32 %v907_v54, %v2091_v10 }
 0x269   : > { %v2664_v52 = vmul.f32 %v6876_v38, %v6876_v38 }
 0x26b   : > { %v2841_v54 = vadd.f32 %v2840_v7, %v2664_v52  ;;  %v913_v52 = vpop.f32.mrf.mxu0  ;;  %v2096_v7 = vpop.permute.xlu1 %2095 }
 0x26f   : > { %2245 = vperm.xlu0 %5189, %v2019_v46   ;;  %v2836_v46 = vsel %vm1386_vm0, %v2663_v22, 0.0  ;;  %v492_v22 = vld [vmem:[%s6036_s6 + $0x300] sm:$0xff]  ;;  %v2101_v6 = vpop.permute.xlu1 %2100 }
 0x270   : > { %v2837_v42 = vadd.f32 %v2836_v46, %v2662_v36  ;;  %1804 = vmatmul.mubr.f32.gmra.mxu1 %v492_v22  ;;  %1170 = vmatmul.mubr.f32.gmra.mxu0 %v492_v22  ;;  %v495_v36 = vld [vmem:[%s6036_s6 + $0x318] sm:$0xff]  ;;  %v494_v46 = vld [vmem:[%s6036_s6 + $0x310] sm:$0xff] }
 0x271   : > { %5137 = vmatprep.mubr.msk.f32.mxu1 %vm564_vm1, %v495_v36  ;;  %5053 = vmatprep.mubr.msk.f32.mxu0 %vm564_vm1, %v495_v36 }
 0x273   : > { %v6886_v29 = vpop.f32.mrf.mxu1 }
 0x274   : > { %1809 = vmatmul.mubr.f32.gmra.mxu1 %v494_v46  ;;  %1176 = vmatmul.mubr.f32.gmra.mxu0 %v494_v46 }
 0x275   : > { %v1772_v10 = vpop.f32.mrf.mxu1  ;;  %5138 = vmatprep.mubr.msk.f32.mxu1 %vm564_vm1, %v497_v59  ;;  %5054 = vmatprep.mubr.msk.f32.mxu0 %vm564_vm1, %v497_v59  ;;  %v2106_v59 = vpop.permute.xlu1 %2105 }
 0x28b   : > { %2838 = vadd.xlane.f32.xlu1 %v2837_v42  ;;  %v915_v42 = vpop.f32.mrf.mxu0 }
 0x28c   : > { %v6898_v10 = vsub.f32 %v915_v42, %v2096_v7 }
 0x28e   : > { %2842 = vadd.xlane.f32.xlu0 %v2841_v54  ;;  %v919_v54 = vpop.f32.mrf.mxu0  ;;  %v2667_v36 = vmul.f32 %v6898_v10, %v6898_v10 }
 0x28f   : > { %v6908_v46 = vsub.f32 %v919_v54, %v2101_v6 }
 0x290   : > { %v921_v33 = vpop.f32.mrf.mxu0 }
 0x291   : > { %v6902_v22 = vsub.f32 %v921_v33, %v2101_v6 }
 0x293   : > { %v2669_v42 = vmul.f32 %v6902_v22, %v6902_v22 }
 0x295   : > { %v2848_v60 = vsel %vm1386_vm0, %v2669_v42, 0.0  ;;  %v925_v42 = vpop.f32.mrf.mxu0 }
 0x29c   : > { %2250 = vperm.xlu1 %5190, %v2020_v40   ;;  %v6900_v40 = vsub.f32 %v913_v52, %v2096_v7  ;;  %v2844_v52 = vsel %vm1386_vm0, %v2667_v36, 0.0  ;;  %v2668_v7 = vmul.f32 %v6908_v46, %v6908_v46  ;;  %v496_v36 = vld [vmem:[%s6036_s6 + $0x320] sm:$0xff] }
 0x29d   : > { %1814 = vmatmul.mubr.f32.gmra.mxu1 %v496_v36  ;;  %1182 = vmatmul.mubr.f32.gmra.mxu0 %v496_v36 }
 0x29e   : > { %v2849_v54 = vadd.f32 %v2848_v60, %v2668_v7  ;;  %v2023_v60 = vmul.f32 0.0051020407, %v6856_v18  ;;  %v927_v7 = vpop.f32.mrf.mxu0 }
 0x2a4   : > { %2255 = vperm.xlu0 %5189, %v2021_v24   ;;  %v2666_v24 = vmul.f32 %v6900_v40, %v6900_v40 }
 0x2a6   : > { %v2845_v33 = vadd.f32 %v2844_v52, %v2666_v24  ;;  %v499_v24 = vld [vmem:[%s6036_s6 + $0x338] sm:$0xff]  ;;  %v498_v52 = vld [vmem:[%s6036_s6 + $0x330] sm:$0xff] }
 0x2a7   : > { %5139 = vmatprep.mubr.msk.f32.mxu1 %vm564_vm1, %v499_v24  ;;  %5055 = vmatprep.mubr.msk.f32.mxu0 %vm564_vm1, %v499_v24 }
 0x2a8   : > { %1819 = vmatmul.mubr.f32.gmra.mxu1 %v498_v52  ;;  %1188 = vmatmul.mubr.f32.gmra.mxu0 %v498_v52 }
 0x2a9   : > { %5140 = vmatprep.mubr.msk.f32.mxu1 %vm564_vm1, %v501_v61  ;;  %5056 = vmatprep.mubr.msk.f32.mxu0 %vm564_vm1, %v501_v61 }
 0x2ab   : > { %v6904_v49 = vpop.f32.mrf.mxu1 }
 0x2ac   : > { %v2026_v50 = vmul.f32 0.0051020407, %v6904_v49 }
 0x2ad   : > { %v1777_v1 = vpop.f32.mrf.mxu1 }
 0x2b7   : > { %v6918_v1 = vpop.f32.mrf.mxu1 }
 0x2b9   : > { %v1782_v6 = vpop.f32.mrf.mxu1 }
 0x2ba   : > { %v2111_v6 = vpop.permute.xlu1 %2110 }
 0x2c0   : > { %2846 = vadd.xlane.f32.xlu1 %v2845_v33  ;;  %v931_v33 = vpop.f32.mrf.mxu0 }
 0x2c1   : > { %v6940_v52 = vsub.f32 %v931_v33, %v2111_v6 }
 0x2c2   : > { %v933_v19 = vpop.f32.mrf.mxu0 }
 0x2c3   : > { %2850 = vadd.xlane.f32.xlu0 %v2849_v54  ;;  %v6930_v54 = vsub.f32 %v927_v7, %v2106_v59  ;;  %v6934_v36 = vsub.f32 %v933_v19, %v2111_v6  ;;  %9291 = vst [vmem:[#allocation77_spill] sm:$0xff] %v6940_v52 }
 0x2c5   : > { %9290 = vst [vmem:[#allocation76_spill] sm:$0xff] %v6934_v36  ;;  %v2671_v24 = vmul.f32 %v6930_v54, %v6930_v54  ;;  %v2673_v7 = vmul.f32 %v6934_v36, %v6934_v36 }
 0x2c7   : > { %v2856_v16 = vsel %vm1386_vm0, %v2673_v7, 0.0  ;;  %v937_v7 = vpop.f32.mrf.mxu0 }
 0x2d1   : > { %2260 = vperm.xlu1 %5190, %v2022_v39   ;;  %v6932_v39 = vsub.f32 %v925_v42, %v2106_v59  ;;  %v2852_v42 = vsel %vm1386_vm0, %v2671_v24, 0.0  ;;  %v2672_v59 = vmul.f32 %v6940_v52, %v6940_v52  ;;  %v500_v24 = vld [vmem:[%s6036_s6 + $0x340] sm:$0xff] }
 0x2d2   : > { %1824 = vmatmul.mubr.f32.gmra.mxu1 %v500_v24  ;;  %1194 = vmatmul.mubr.f32.gmra.mxu0 %v500_v24 }
 0x2d3   : > { %v2857_v33 = vadd.f32 %v2856_v16, %v2672_v59  ;;  %v2025_v16 = vmul.f32 0.0051020407, %v6886_v29  ;;  %v939_v59 = vpop.f32.mrf.mxu0 }
 0x2d5   : > { %v943_v61 = vpop.f32.mrf.mxu0 }
 0x2d7   : > { %v945_v51 = vpop.f32.mrf.mxu0 }
 0x2d9   : > { %2265 = vperm.xlu0 %5189, %v2023_v60   ;;  %v2670_v60 = vmul.f32 %v6932_v39, %v6932_v39 }
 0x2db   : > { %v2853_v19 = vadd.f32 %v2852_v42, %v2670_v60  ;;  %v503_v60 = vld [vmem:[%s6036_s6 + $0x358] sm:$0xff]  ;;  %v502_v42 = vld [vmem:[%s6036_s6 + $0x350] sm:$0xff] }
 0x2dc   : > { %5141 = vmatprep.mubr.msk.f32.mxu1 %vm564_vm1, %v503_v60  ;;  %5057 = vmatprep.mubr.msk.f32.mxu0 %vm564_vm1, %v503_v60 }
 0x2dd   : > { %1829 = vmatmul.mubr.f32.gmra.mxu1 %v502_v42  ;;  %1200 = vmatmul.mubr.f32.gmra.mxu0 %v502_v42 }
 0x2de   : > { %5142 = vmatprep.mubr.msk.f32.mxu1 %vm564_vm1, %v505_v58  ;;  %5058 = vmatprep.mubr.msk.f32.mxu0 %vm564_vm1, %v505_v58 }
 0x2e1   : > { %v6936_v30 = vpop.f32.mrf.mxu1 }
 0x2e2   : > { %v2028_v8 = vmul.f32 0.0051020407, %v6936_v30 }
 0x2e3   : > { %v1787_v18 = vpop.f32.mrf.mxu1 }
 0x2e5   : > { %v6950_v18 = vpop.f32.mrf.mxu1 }
 0x2e7   : > { %v1792_v6 = vpop.f32.mrf.mxu1 }
 0x2e8   : > { %v2121_v6 = vpop.permute.xlu1 %2120 }
 0x2e9   : > { %v6966_v24 = vsub.f32 %v945_v51, %v2121_v6  ;;  %v6972_v42 = vsub.f32 %v943_v61, %v2121_v6 }
 0x2eb   : > { %9294 = vst [vmem:[#allocation80_spill] sm:$0xff] %v6966_v24  ;;  %9295 = vst [vmem:[#allocation81_spill] sm:$0xff] %v6972_v42 }
 0x2f5   : > { %2854 = vadd.xlane.f32.xlu1 %v2853_v19  ;;  %v2116_v19 = vpop.permute.xlu0 %2115 }
 0x2f8   : > { %2858 = vadd.xlane.f32.xlu0 %v2857_v33  ;;  %v6962_v33 = vsub.f32 %v939_v59, %v2116_v19  ;;  %v2677_v59 = vmul.f32 %v6966_v24, %v6966_v24 }
 0x2fa   : > { %9292 = vst [vmem:[#allocation78_spill] sm:$0xff] %v6962_v33  ;;  %v2675_v60 = vmul.f32 %v6962_v33, %v6962_v33  ;;  %v2864_v31 = vsel %vm1386_vm0, %v2677_v59, 0.0  ;;  %v949_v59 = vpop.f32.mrf.mxu0 }
 0x305   : > { %v6968_v56 = vpop.f32.mrf.mxu1 }
 0x306   : > { %2270 = vperm.xlu1 %5190, %v2024_v45   ;;  %v6964_v45 = vsub.f32 %v937_v7, %v2116_v19  ;;  %v2860_v7 = vsel %vm1386_vm0, %v2675_v60, 0.0  ;;  %v2676_v19 = vmul.f32 %v6972_v42, %v6972_v42  ;;  %v504_v60 = vld [vmem:[%s6036_s6 + $0x360] sm:$0xff]  ;;  %v2030_v37 = vmul.f32 0.0051020407, %v6968_v56 }
 0x307   : > { %v1797_v29 = vpop.f32.mrf.mxu1  ;;  %1834 = vmatmul.mubr.f32.gmra.mxu1 %v504_v60  ;;  %1206 = vmatmul.mubr.f32.gmra.mxu0 %v504_v60 }
 0x308   : > { %9293 = vst [vmem:[#allocation79_spill] sm:$0xff] %v6964_v45  ;;  %v2865_v61 = vadd.f32 %v2864_v31, %v2676_v19  ;;  %v2027_v31 = vmul.f32 0.0051020407, %v6918_v1  ;;  %v951_v19 = vpop.f32.mrf.mxu0 }
 0x30a   : > { %v955_v58 = vpop.f32.mrf.mxu0 }
 0x30c   : > { %v6982_v29 = vpop.f32.mrf.mxu1  ;;  %v957_v49 = vpop.f32.mrf.mxu0 }
 0x30e   : > { %2275 = vperm.xlu0 %5189, %v2025_v16   ;;  %v2674_v16 = vmul.f32 %v6964_v45, %v6964_v45  ;;  %v1802_v6 = vpop.f32.mrf.mxu1 }
 0x30f   : > { %v2131_v6 = vpop.permute.xlu1 %2130 }
 0x310   : > { %v2861_v51 = vadd.f32 %v2860_v7, %v2674_v16  ;;  %v507_v16 = vld [vmem:[%s6036_s6 + $0x378] sm:$0xff]  ;;  %v506_v7 = vld [vmem:[%s6036_s6 + $0x370] sm:$0xff]  ;;  %v6998_v60 = vsub.f32 %v957_v49, %v2131_v6 }
 0x311   : > { %5143 = vmatprep.mubr.msk.f32.mxu1 %vm564_vm1, %v507_v16  ;;  %5059 = vmatprep.mubr.msk.f32.mxu0 %vm564_vm1, %v507_v16 }
 0x312   : > { %1839 = vmatmul.mubr.f32.gmra.mxu1 %v506_v7  ;;  %1212 = vmatmul.mubr.f32.gmra.mxu0 %v506_v7  ;;  %9298 = vst [vmem:[#allocation84_spill] sm:$0xff] %v6998_v60  ;;  %v7004_v7 = vsub.f32 %v955_v58, %v2131_v6 }
 0x313   : > { %5144 = vmatprep.mubr.msk.f32.mxu1 %vm564_vm1, %v509_v44  ;;  %5060 = vmatprep.mubr.msk.f32.mxu0 %vm564_vm1, %v509_v44 }
 0x314   : > { %9299 = vst [vmem:[#allocation85_spill] sm:$0xff] %v7004_v7 }
 0x32a   : > { %2862 = vadd.xlane.f32.xlu1 %v2861_v51  ;;  %v2126_v51 = vpop.permute.xlu0 %2125 }
 0x32d   : > { %2866 = vadd.xlane.f32.xlu0 %v2865_v61  ;;  %v6994_v61 = vsub.f32 %v951_v19, %v2126_v51  ;;  %v2681_v19 = vmul.f32 %v6998_v60, %v6998_v60 }
 0x32f   : > { %9296 = vst [vmem:[#allocation82_spill] sm:$0xff] %v6994_v61  ;;  %v2679_v16 = vmul.f32 %v6994_v61, %v6994_v61  ;;  %v2872_v12 = vsel %vm1386_vm0, %v2681_v19, 0.0  ;;  %v961_v19 = vpop.f32.mrf.mxu0 }
 0x330   : > { %v7000_v13 = vpop.f32.mrf.mxu1 }
 0x332   : > { %v1807_v1 = vpop.f32.mrf.mxu1 }
 0x334   : > { %v7014_v1 = vpop.f32.mrf.mxu1 }
 0x336   : > { %v1812_v6 = vpop.f32.mrf.mxu1 }
 0x337   : > { %v2141_v6 = vpop.permute.xlu1 %2140 }
 0x33b   : > { %2280 = vperm.xlu1 %5190, %v2026_v50   ;;  %v6996_v50 = vsub.f32 %v949_v59, %v2126_v51  ;;  %v2868_v59 = vsel %vm1386_vm0, %v2679_v16, 0.0  ;;  %v2680_v51 = vmul.f32 %v7004_v7, %v7004_v7  ;;  %v508_v16 = vld [vmem:[%s6036_s6 + $0x380] sm:$0xff] }
 0x33c   : > { %1844 = vmatmul.mubr.f32.gmra.mxu1 %v508_v16  ;;  %1218 = vmatmul.mubr.f32.gmra.mxu0 %v508_v16 }
 0x33d   : > { %9297 = vst [vmem:[#allocation83_spill] sm:$0xff] %v6996_v50  ;;  %v2873_v58 = vadd.f32 %v2872_v12, %v2680_v51  ;;  %v2029_v12 = vmul.f32 0.0051020407, %v6950_v18  ;;  %v963_v51 = vpop.f32.mrf.mxu0 }
 0x33f   : > { %v967_v44 = vpop.f32.mrf.mxu0 }
 0x341   : > { %v969_v30 = vpop.f32.mrf.mxu0 }
 0x342   : > { %v7030_v16 = vsub.f32 %v969_v30, %v2141_v6 }
 0x343   : > { %2285 = vperm.xlu0 %5189, %v2027_v31   ;;  %v2678_v31 = vmul.f32 %v6996_v50, %v6996_v50 }
 0x344   : > { %9302 = vst [vmem:[#allocation88_spill] sm:$0xff] %v7030_v16 }
 0x345   : > { %v2869_v49 = vadd.f32 %v2868_v59, %v2678_v31  ;;  %v511_v31 = vld [vmem:[%s6036_s6 + $0x398] sm:$0xff]  ;;  %v510_v59 = vld [vmem:[%s6036_s6 + $0x390] sm:$0xff] }
 0x346   : > { %5145 = vmatprep.mubr.msk.f32.mxu1 %vm564_vm1, %v511_v31  ;;  %5061 = vmatprep.mubr.msk.f32.mxu0 %vm564_vm1, %v511_v31 }
 0x347   : > { %1849 = vmatmul.mubr.f32.gmra.mxu1 %v510_v59  ;;  %1224 = vmatmul.mubr.f32.gmra.mxu0 %v510_v59  ;;  %v7036_v59 = vsub.f32 %v967_v44, %v2141_v6 }
 0x348   : > { %5146 = vmatprep.mubr.msk.f32.mxu1 %vm564_vm1, %v513_v23  ;;  %5062 = vmatprep.mubr.msk.f32.mxu0 %vm564_vm1, %v513_v23 }
 0x349   : > { %9303 = vst [vmem:[#allocation89_spill] sm:$0xff] %v7036_v59 }
 0x35d   : > { %v7032_v3 = vpop.f32.mrf.mxu1 }
 0x35f   : > { %2870 = vadd.xlane.f32.xlu1 %v2869_v49  ;;  %v2136_v49 = vpop.permute.xlu0 %2135  ;;  %v1817_v18 = vpop.f32.mrf.mxu1 }
 0x362   : > { %2874 = vadd.xlane.f32.xlu0 %v2873_v58  ;;  %v7026_v58 = vsub.f32 %v963_v51, %v2136_v49  ;;  %v2685_v51 = vmul.f32 %v7030_v16, %v7030_v16 }
 0x364   : > { %9300 = vst [vmem:[#allocation86_spill] sm:$0xff] %v7026_v58  ;;  %v2683_v31 = vmul.f32 %v7026_v58, %v7026_v58  ;;  %v2880_v15 = vsel %vm1386_vm0, %v2685_v51, 0.0  ;;  %v973_v51 = vpop.f32.mrf.mxu0 }
 0x368   : > { %v7046_v18 = vpop.f32.mrf.mxu1 }
 0x36a   : > { %v1822_v6 = vpop.f32.mrf.mxu1 }
 0x36b   : > { %v2151_v6 = vpop.permute.xlu1 %2150 }
 0x370   : > { %2290 = vperm.xlu1 %5190, %v2028_v8   ;;  %v7028_v8 = vsub.f32 %v961_v19, %v2136_v49  ;;  %v2876_v19 = vsel %vm1386_vm0, %v2683_v31, 0.0  ;;  %v2684_v49 = vmul.f32 %v7036_v59, %v7036_v59  ;;  %v512_v31 = vld [vmem:[%s6036_s6 + $0x3a0] sm:$0xff] }
 0x371   : > { %1854 = vmatmul.mubr.f32.gmra.mxu1 %v512_v31  ;;  %1230 = vmatmul.mubr.f32.gmra.mxu0 %v512_v31 }
 0x372   : > { %9301 = vst [vmem:[#allocation87_spill] sm:$0xff] %v7028_v8  ;;  %v2881_v44 = vadd.f32 %v2880_v15, %v2684_v49  ;;  %v2031_v15 = vmul.f32 0.0051020407, %v6982_v29  ;;  %v975_v49 = vpop.f32.mrf.mxu0 }
 0x374   : > { %v979_v23 = vpop.f32.mrf.mxu0 }
 0x376   : > { %v981_v56 = vpop.f32.mrf.mxu0 }
 0x377   : > { %v7062_v31 = vsub.f32 %v981_v56, %v2151_v6 }
 0x378   : > { %2295 = vperm.xlu0 %5189, %v2029_v12   ;;  %v2682_v12 = vmul.f32 %v7028_v8, %v7028_v8 }
 0x379   : > { %9306 = vst [vmem:[#allocation92_spill] sm:$0xff] %v7062_v31 }
 0x37a   : > { %v2877_v30 = vadd.f32 %v2876_v19, %v2682_v12  ;;  %v515_v12 = vld [vmem:[%s6036_s6 + $0x3b8] sm:$0xff]  ;;  %v514_v19 = vld [vmem:[%s6036_s6 + $0x3b0] sm:$0xff] }
 0x37b   : > { %5147 = vmatprep.mubr.msk.f32.mxu1 %vm564_vm1, %v515_v12  ;;  %5063 = vmatprep.mubr.msk.f32.mxu0 %vm564_vm1, %v515_v12 }
 0x37c   : > { %1859 = vmatmul.mubr.f32.gmra.mxu1 %v514_v19  ;;  %1236 = vmatmul.mubr.f32.gmra.mxu0 %v514_v19  ;;  %v7068_v19 = vsub.f32 %v979_v23, %v2151_v6 }
 0x37e   : > { %9307 = vst [vmem:[#allocation93_spill] sm:$0xff] %v7068_v19 }
 0x392   : > { %v7064_v43 = vpop.f32.mrf.mxu1 }
 0x394   : > { %2878 = vadd.xlane.f32.xlu1 %v2877_v30  ;;  %v2146_v30 = vpop.permute.xlu0 %2145  ;;  %v1827_v29 = vpop.f32.mrf.mxu1 }
 0x397   : > { %2882 = vadd.xlane.f32.xlu0 %v2881_v44  ;;  %v7058_v44 = vsub.f32 %v975_v49, %v2146_v30  ;;  %v2689_v49 = vmul.f32 %v7062_v31, %v7062_v31  ;;  %v2032_v31 = vmul.f32 0.0051020407, %v7000_v13 }
 0x399   : > { %9304 = vst [vmem:[#allocation90_spill] sm:$0xff] %v7058_v44  ;;  %v2687_v12 = vmul.f32 %v7058_v44, %v7058_v44  ;;  %v2888_v41 = vsel %vm1386_vm0, %v2689_v49, 0.0  ;;  %v517_v44 = vld [vmem:[%s6036_s6 + $0x3c8] sm:$0xff]  ;;  %v985_v49 = vpop.f32.mrf.mxu0 }
 0x39a   : > { %5148 = vmatprep.mubr.msk.f32.mxu1 %vm564_vm1, %v517_v44  ;;  %5064 = vmatprep.mubr.msk.f32.mxu0 %vm564_vm1, %v517_v44 }
 0x39d   : > { %v7078_v29 = vpop.f32.mrf.mxu1 }
 0x39f   : > { %v1832_v6 = vpop.f32.mrf.mxu1 }
 0x3a0   : > { %v2161_v6 = vpop.permute.xlu1 %2160 }
 0x3a5   : > { %2300 = vperm.xlu1 %5190, %v2030_v37   ;;  %v7060_v37 = vsub.f32 %v973_v51, %v2146_v30  ;;  %v2884_v51 = vsel %vm1386_vm0, %v2687_v12, 0.0  ;;  %v2688_v30 = vmul.f32 %v7068_v19, %v7068_v19  ;;  %v516_v12 = vld [vmem:[%s6036_s6 + $0x3c0] sm:$0xff] }
 0x3a6   : > { %1864 = vmatmul.mubr.f32.gmra.mxu1 %v516_v12  ;;  %1242 = vmatmul.mubr.f32.gmra.mxu0 %v516_v12 }
 0x3a7   : > { %9305 = vst [vmem:[#allocation91_spill] sm:$0xff] %v7060_v37  ;;  %v2889_v23 = vadd.f32 %v2888_v41, %v2688_v30  ;;  %v2033_v41 = vmul.f32 0.0051020407, %v7014_v1  ;;  %v987_v30 = vpop.f32.mrf.mxu0 }
 0x3a9   : > { %v991_v44 = vpop.f32.mrf.mxu0 }
 0x3ab   : > { %v993_v13 = vpop.f32.mrf.mxu0 }
 0x3ac   : > { %v7094_v12 = vsub.f32 %v993_v13, %v2161_v6 }
 0x3ad   : > { %2305 = vperm.xlu0 %5189, %v2031_v15   ;;  %v2686_v15 = vmul.f32 %v7060_v37, %v7060_v37 }
 0x3ae   : > { %9310 = vst [vmem:[#allocation96_spill] sm:$0xff] %v7094_v12 }
 0x3af   : > { %v2885_v56 = vadd.f32 %v2884_v51, %v2686_v15  ;;  %v519_v15 = vld [vmem:[%s6036_s6 + $0x3d8] sm:$0xff]  ;;  %v518_v51 = vld [vmem:[%s6036_s6 + $0x3d0] sm:$0xff] }
 0x3b0   : > { %5149 = vmatprep.mubr.msk.f32.mxu1 %vm564_vm1, %v519_v15  ;;  %5065 = vmatprep.mubr.msk.f32.mxu0 %vm564_vm1, %v519_v15 }
 0x3b1   : > { %1869 = vmatmul.mubr.f32.gmra.mxu1 %v518_v51  ;;  %1248 = vmatmul.mubr.f32.gmra.mxu0 %v518_v51  ;;  %v7100_v51 = vsub.f32 %v991_v44, %v2161_v6 }
 0x3b3   : > { %9311 = vst [vmem:[#allocation97_spill] sm:$0xff] %v7100_v51 }
 0x3c7   : > { %v7096_v19 = vpop.f32.mrf.mxu1 }
 0x3c9   : > { %2886 = vadd.xlane.f32.xlu1 %v2885_v56  ;;  %v2156_v56 = vpop.permute.xlu0 %2155  ;;  %v1837_v1 = vpop.f32.mrf.mxu1 }
 0x3cc   : > { %2890 = vadd.xlane.f32.xlu0 %v2889_v23  ;;  %v7090_v23 = vsub.f32 %v987_v30, %v2156_v56  ;;  %v2693_v30 = vmul.f32 %v7094_v12, %v7094_v12  ;;  %v2034_v12 = vmul.f32 0.0051020407, %v7032_v3 }
 0x3ce   : > { %9308 = vst [vmem:[#allocation94_spill] sm:$0xff] %v7090_v23  ;;  %v2691_v15 = vmul.f32 %v7090_v23, %v7090_v23  ;;  %v2896_v23 = vsel %vm1386_vm0, %v2693_v30, 0.0  ;;  %v997_v30 = vpop.f32.mrf.mxu0 }
 0x3d2   : > { %v7110_v1 = vpop.f32.mrf.mxu1 }
 0x3d4   : > { %v1842_v6 = vpop.f32.mrf.mxu1 }
 0x3d5   : > { %v2171_v6 = vpop.permute.xlu1 %2170 }
 0x3da   : > { %2310 = vperm.xlu1 %5190, %v2032_v31   ;;  %v7092_v31 = vsub.f32 %v985_v49, %v2156_v56  ;;  %v2892_v49 = vsel %vm1386_vm0, %v2691_v15, 0.0  ;;  %v2692_v56 = vmul.f32 %v7100_v51, %v7100_v51  ;;  %v520_v15 = vld [vmem:[%s6036_s6 + $0x3e0] sm:$0xff] }
 0x3dc   : > { %9309 = vst [vmem:[#allocation95_spill] sm:$0xff] %v7092_v31  ;;  %v2897_v44 = vadd.f32 %v2896_v23, %v2692_v56  ;;  %v2035_v23 = vmul.f32 0.0051020407, %v7046_v18  ;;  %v999_v56 = vpop.f32.mrf.mxu0 }
 0x3e2   : > { %2315 = vperm.xlu0 %5189, %v2033_v41   ;;  %v2690_v41 = vmul.f32 %v7092_v31, %v7092_v31  ;;  %v521_v31 = vld [vmem:[%s6036_s6 + $0x3e8] sm:$0xff] }
 0x3e3   : > { %5150 = vmatprep.mubr.msk.f32.mxu1 %vm564_vm1, %v521_v31  ;;  %5066 = vmatprep.mubr.msk.f32.mxu0 %vm564_vm1, %v521_v31  ;;  %v1003_v31 = vpop.f32.mrf.mxu0 }
 0x3e4   : > { %v2893_v13 = vadd.f32 %v2892_v49, %v2690_v41  ;;  %1874 = vmatmul.mubr.f32.gmra.mxu1 %v520_v15  ;;  %1254 = vmatmul.mubr.f32.gmra.mxu0 %v520_v15  ;;  %v523_v41 = vld [vmem:[%s6036_s6 + $0x3f8] sm:$0xff]  ;;  %v522_v49 = vld [vmem:[%s6036_s6 + $0x3f0] sm:$0xff] }
 0x3e5   : > { %5151 = vmatprep.mubr.msk.f32.mxu1 %vm564_vm1, %v523_v41  ;;  %5067 = vmatprep.mubr.msk.f32.mxu0 %vm564_vm1, %v523_v41  ;;  %v1005_v3 = vpop.f32.mrf.mxu0 }
 0x3e6   : > { %v7126_v15 = vsub.f32 %v1005_v3, %v2171_v6 }
 0x3e8   : > { %1879 = vmatmul.mubr.f32.gmra.mxu1 %v522_v49  ;;  %1260 = vmatmul.mubr.f32.gmra.mxu0 %v522_v49  ;;  %9314 = vst [vmem:[#allocation100_spill] sm:$0xff] %v7126_v15  ;;  %v7132_v49 = vsub.f32 %v1003_v31, %v2171_v6 }
 0x3ea   : > { %9315 = vst [vmem:[#allocation101_spill] sm:$0xff] %v7132_v49 }
 0x3fc   : > { %v7128_v51 = vpop.f32.mrf.mxu1 }
 0x3fe   : > { %2894 = vadd.xlane.f32.xlu1 %v2893_v13  ;;  %v2166_v13 = vpop.permute.xlu0 %2165  ;;  %v1847_v18 = vpop.f32.mrf.mxu1 }
 0x401   : > { %2898 = vadd.xlane.f32.xlu0 %v2897_v44  ;;  %v7122_v44 = vsub.f32 %v999_v56, %v2166_v13  ;;  %v2697_v56 = vmul.f32 %v7126_v15, %v7126_v15  ;;  %v2036_v15 = vmul.f32 0.0051020407, %v7064_v43 }
 0x403   : > { %9312 = vst [vmem:[#allocation98_spill] sm:$0xff] %v7122_v44  ;;  %v2695_v41 = vmul.f32 %v7122_v44, %v7122_v44  ;;  %v2904_v44 = vsel %vm1386_vm0, %v2697_v56, 0.0  ;;  %v1009_v56 = vpop.f32.mrf.mxu0 }
 0x407   : > { %v7142_v18 = vpop.f32.mrf.mxu1 }
 0x409   : > { %v1852_v6 = vpop.f32.mrf.mxu1 }
 0x40a   : > { %v2181_v6 = vpop.permute.xlu1 %2180 }
 0x40f   : > { %2320 = vperm.xlu1 %5190, %v2034_v12   ;;  %v7124_v12 = vsub.f32 %v997_v30, %v2166_v13  ;;  %v2900_v30 = vsel %vm1386_vm0, %v2695_v41, 0.0  ;;  %v2696_v13 = vmul.f32 %v7132_v49, %v7132_v49  ;;  %v524_v41 = vld [vmem:[%s6036_s6 + $0x400] sm:$0xff] }
 0x411   : > { %9313 = vst [vmem:[#allocation99_spill] sm:$0xff] %v7124_v12  ;;  %v2905_v31 = vadd.f32 %v2904_v44, %v2696_v13  ;;  %v2037_v44 = vmul.f32 0.0051020407, %v7078_v29  ;;  %v1011_v13 = vpop.f32.mrf.mxu0 }
 0x417   : > { %2325 = vperm.xlu0 %5189, %v2035_v23   ;;  %v2694_v23 = vmul.f32 %v7124_v12, %v7124_v12  ;;  %v525_v12 = vld [vmem:[%s6036_s6 + $0x408] sm:$0xff] }
 0x418   : > { %5152 = vmatprep.mubr.msk.f32.mxu1 %vm564_vm1, %v525_v12  ;;  %5068 = vmatprep.mubr.msk.f32.mxu0 %vm564_vm1, %v525_v12  ;;  %v1015_v12 = vpop.f32.mrf.mxu0 }
 0x419   : > { %v2901_v3 = vadd.f32 %v2900_v30, %v2694_v23  ;;  %1884 = vmatmul.mubr.f32.gmra.mxu1 %v524_v41  ;;  %1266 = vmatmul.mubr.f32.gmra.mxu0 %v524_v41  ;;  %v527_v23 = vld [vmem:[%s6036_s6 + $0x418] sm:$0xff]  ;;  %v526_v30 = vld [vmem:[%s6036_s6 + $0x410] sm:$0xff] }
 0x41a   : > { %5153 = vmatprep.mubr.msk.f32.mxu1 %vm564_vm1, %v527_v23  ;;  %5069 = vmatprep.mubr.msk.f32.mxu0 %vm564_vm1, %v527_v23  ;;  %v1017_v43 = vpop.f32.mrf.mxu0 }
 0x41b   : > { %v7158_v41 = vsub.f32 %v1017_v43, %v2181_v6 }
 0x41d   : > { %1889 = vmatmul.mubr.f32.gmra.mxu1 %v526_v30  ;;  %1272 = vmatmul.mubr.f32.gmra.mxu0 %v526_v30  ;;  %9318 = vst [vmem:[#allocation104_spill] sm:$0xff] %v7158_v41  ;;  %v7164_v30 = vsub.f32 %v1015_v12, %v2181_v6 }
 0x41f   : > { %9319 = vst [vmem:[#allocation105_spill] sm:$0xff] %v7164_v30 }
 0x431   : > { %v7160_v49 = vpop.f32.mrf.mxu1 }
 0x433   : > { %2902 = vadd.xlane.f32.xlu1 %v2901_v3  ;;  %v2176_v3 = vpop.permute.xlu0 %2175  ;;  %v1857_v29 = vpop.f32.mrf.mxu1 }
 0x436   : > { %2906 = vadd.xlane.f32.xlu0 %v2905_v31  ;;  %v7154_v31 = vsub.f32 %v1011_v13, %v2176_v3  ;;  %v2701_v13 = vmul.f32 %v7158_v41, %v7158_v41  ;;  %v2038_v41 = vmul.f32 0.0051020407, %v7096_v19 }
 0x438   : > { %9316 = vst [vmem:[#allocation102_spill] sm:$0xff] %v7154_v31  ;;  %v2699_v23 = vmul.f32 %v7154_v31, %v7154_v31  ;;  %v2912_v31 = vsel %vm1386_vm0, %v2701_v13, 0.0  ;;  %v1021_v13 = vpop.f32.mrf.mxu0 }
 0x43c   : > { %v7174_v29 = vpop.f32.mrf.mxu1 }
 0x43e   : > { %v1862_v6 = vpop.f32.mrf.mxu1 }
 0x43f   : > { %v2191_v6 = vpop.permute.xlu1 %2190 }
 0x444   : > { %2330 = vperm.xlu1 %5190, %v2036_v15   ;;  %v7156_v15 = vsub.f32 %v1009_v56, %v2176_v3  ;;  %v2908_v56 = vsel %vm1386_vm0, %v2699_v23, 0.0  ;;  %v2700_v3 = vmul.f32 %v7164_v30, %v7164_v30  ;;  %v528_v23 = vld [vmem:[%s6036_s6 + $0x420] sm:$0xff] }
 0x446   : > { %9317 = vst [vmem:[#allocation103_spill] sm:$0xff] %v7156_v15  ;;  %v2913_v12 = vadd.f32 %v2912_v31, %v2700_v3  ;;  %v2039_v31 = vmul.f32 0.0051020407, %v7110_v1  ;;  %v1023_v3 = vpop.f32.mrf.mxu0 }
 0x44c   : > { %2335 = vperm.xlu0 %5189, %v2037_v44   ;;  %v2698_v44 = vmul.f32 %v7156_v15, %v7156_v15  ;;  %v529_v15 = vld [vmem:[%s6036_s6 + $0x428] sm:$0xff] }
 0x44d   : > { %5154 = vmatprep.mubr.msk.f32.mxu1 %vm564_vm1, %v529_v15  ;;  %5070 = vmatprep.mubr.msk.f32.mxu0 %vm564_vm1, %v529_v15  ;;  %v1027_v15 = vpop.f32.mrf.mxu0 }
 0x44e   : > { %v2909_v43 = vadd.f32 %v2908_v56, %v2698_v44  ;;  %1894 = vmatmul.mubr.f32.gmra.mxu1 %v528_v23  ;;  %1278 = vmatmul.mubr.f32.gmra.mxu0 %v528_v23  ;;  %v531_v44 = vld [vmem:[%s6036_s6 + $0x438] sm:$0xff]  ;;  %v530_v56 = vld [vmem:[%s6036_s6 + $0x430] sm:$0xff] }
 0x44f   : > { %5155 = vmatprep.mubr.msk.f32.mxu1 %vm564_vm1, %v531_v44  ;;  %5071 = vmatprep.mubr.msk.f32.mxu0 %vm564_vm1, %v531_v44  ;;  %v1029_v19 = vpop.f32.mrf.mxu0 }
 0x450   : > { %v7190_v23 = vsub.f32 %v1029_v19, %v2191_v6 }
 0x452   : > { %1899 = vmatmul.mubr.f32.gmra.mxu1 %v530_v56  ;;  %1284 = vmatmul.mubr.f32.gmra.mxu0 %v530_v56  ;;  %9322 = vst [vmem:[#allocation108_spill] sm:$0xff] %v7190_v23  ;;  %v7196_v56 = vsub.f32 %v1027_v15, %v2191_v6 }
 0x454   : > { %9323 = vst [vmem:[#allocation109_spill] sm:$0xff] %v7196_v56 }
 0x466   : > { %v7192_v30 = vpop.f32.mrf.mxu1 }
 0x468   : > { %2910 = vadd.xlane.f32.xlu1 %v2909_v43  ;;  %v2186_v43 = vpop.permute.xlu0 %2185  ;;  %v1867_v1 = vpop.f32.mrf.mxu1 }
 0x46b   : > { %2914 = vadd.xlane.f32.xlu0 %v2913_v12  ;;  %v7186_v12 = vsub.f32 %v1023_v3, %v2186_v43  ;;  %v2705_v3 = vmul.f32 %v7190_v23, %v7190_v23  ;;  %v2040_v23 = vmul.f32 0.0051020407, %v7128_v51 }
 0x46d   : > { %9320 = vst [vmem:[#allocation106_spill] sm:$0xff] %v7186_v12  ;;  %v2703_v44 = vmul.f32 %v7186_v12, %v7186_v12  ;;  %v2920_v12 = vsel %vm1386_vm0, %v2705_v3, 0.0  ;;  %v1033_v3 = vpop.f32.mrf.mxu0 }
 0x471   : > { %v7206_v1 = vpop.f32.mrf.mxu1 }
 0x473   : > { %v1872_v6 = vpop.f32.mrf.mxu1 }
 0x474   : > { %v2201_v6 = vpop.permute.xlu1 %2200 }
 0x479   : > { %2340 = vperm.xlu1 %5190, %v2038_v41   ;;  %v7188_v41 = vsub.f32 %v1021_v13, %v2186_v43  ;;  %v2916_v13 = vsel %vm1386_vm0, %v2703_v44, 0.0  ;;  %v2704_v43 = vmul.f32 %v7196_v56, %v7196_v56  ;;  %v532_v44 = vld [vmem:[%s6036_s6 + $0x440] sm:$0xff] }
 0x47b   : > { %9321 = vst [vmem:[#allocation107_spill] sm:$0xff] %v7188_v41  ;;  %v2921_v15 = vadd.f32 %v2920_v12, %v2704_v43  ;;  %v2041_v12 = vmul.f32 0.0051020407, %v7142_v18  ;;  %v1035_v43 = vpop.f32.mrf.mxu0 }
 0x481   : > { %2345 = vperm.xlu0 %5189, %v2039_v31   ;;  %v2702_v31 = vmul.f32 %v7188_v41, %v7188_v41  ;;  %v533_v41 = vld [vmem:[%s6036_s6 + $0x448] sm:$0xff] }
 0x482   : > { %5156 = vmatprep.mubr.msk.f32.mxu1 %vm564_vm1, %v533_v41  ;;  %5072 = vmatprep.mubr.msk.f32.mxu0 %vm564_vm1, %v533_v41  ;;  %v1039_v41 = vpop.f32.mrf.mxu0 }
 0x483   : > { %v2917_v19 = vadd.f32 %v2916_v13, %v2702_v31  ;;  %1904 = vmatmul.mubr.f32.gmra.mxu1 %v532_v44  ;;  %1290 = vmatmul.mubr.f32.gmra.mxu0 %v532_v44  ;;  %v535_v31 = vld [vmem:[%s6036_s6 + $0x458] sm:$0xff]  ;;  %v534_v13 = vld [vmem:[%s6036_s6 + $0x450] sm:$0xff] }
 0x484   : > { %5157 = vmatprep.mubr.msk.f32.mxu1 %vm564_vm1, %v535_v31  ;;  %5073 = vmatprep.mubr.msk.f32.mxu0 %vm564_vm1, %v535_v31  ;;  %v1041_v51 = vpop.f32.mrf.mxu0 }
 0x485   : > { %v7222_v44 = vsub.f32 %v1041_v51, %v2201_v6 }
 0x487   : > { %1909 = vmatmul.mubr.f32.gmra.mxu1 %v534_v13  ;;  %1296 = vmatmul.mubr.f32.gmra.mxu0 %v534_v13  ;;  %9326 = vst [vmem:[#allocation112_spill] sm:$0xff] %v7222_v44  ;;  %v7228_v13 = vsub.f32 %v1039_v41, %v2201_v6 }
 0x489   : > { %9327 = vst [vmem:[#allocation113_spill] sm:$0xff] %v7228_v13 }
 0x49d   : > { %2918 = vadd.xlane.f32.xlu1 %v2917_v19  ;;  %v2196_v19 = vpop.permute.xlu0 %2195 }
 0x4a0   : > { %2922 = vadd.xlane.f32.xlu0 %v2921_v15  ;;  %v7218_v15 = vsub.f32 %v1035_v43, %v2196_v19  ;;  %v2709_v43 = vmul.f32 %v7222_v44, %v7222_v44  ;;  %v2042_v44 = vmul.f32 0.0051020407, %v7160_v49 }
 0x4a2   : > { %9324 = vst [vmem:[#allocation110_spill] sm:$0xff] %v7218_v15  ;;  %v2707_v31 = vmul.f32 %v7218_v15, %v7218_v15  ;;  %v2928_v15 = vsel %vm1386_vm0, %v2709_v43, 0.0  ;;  %v1045_v43 = vpop.f32.mrf.mxu0 }
 0x4a4   : > { %v7224_v56 = vpop.f32.mrf.mxu1 }
 0x4a6   : > { %v1877_v18 = vpop.f32.mrf.mxu1 }
 0x4a8   : > { %v7238_v18 = vpop.f32.mrf.mxu1 }
 0x4aa   : > { %v1882_v6 = vpop.f32.mrf.mxu1 }
 0x4ab   : > { %v2211_v6 = vpop.permute.xlu1 %2210 }
 0x4ae   : > { %2350 = vperm.xlu1 %5190, %v2040_v23   ;;  %v7220_v23 = vsub.f32 %v1033_v3, %v2196_v19  ;;  %v2924_v3 = vsel %vm1386_vm0, %v2707_v31, 0.0  ;;  %v2708_v19 = vmul.f32 %v7228_v13, %v7228_v13  ;;  %v536_v31 = vld [vmem:[%s6036_s6 + $0x460] sm:$0xff] }
 0x4b0   : > { %9325 = vst [vmem:[#allocation111_spill] sm:$0xff] %v7220_v23  ;;  %v2929_v41 = vadd.f32 %v2928_v15, %v2708_v19  ;;  %v2043_v15 = vmul.f32 0.0051020407, %v7174_v29  ;;  %v1047_v19 = vpop.f32.mrf.mxu0 }
 0x4b6   : > { %2355 = vperm.xlu0 %5189, %v2041_v12   ;;  %v2706_v12 = vmul.f32 %v7220_v23, %v7220_v23  ;;  %v537_v23 = vld [vmem:[%s6036_s6 + $0x468] sm:$0xff] }
 0x4b7   : > { %5158 = vmatprep.mubr.msk.f32.mxu1 %vm564_vm1, %v537_v23  ;;  %5074 = vmatprep.mubr.msk.f32.mxu0 %vm564_vm1, %v537_v23  ;;  %v1051_v23 = vpop.f32.mrf.mxu0 }
 0x4b8   : > { %v2925_v51 = vadd.f32 %v2924_v3, %v2706_v12  ;;  %1914 = vmatmul.mubr.f32.gmra.mxu1 %v536_v31  ;;  %1302 = vmatmul.mubr.f32.gmra.mxu0 %v536_v31  ;;  %v539_v12 = vld [vmem:[%s6036_s6 + $0x478] sm:$0xff]  ;;  %v538_v3 = vld [vmem:[%s6036_s6 + $0x470] sm:$0xff] }
 0x4b9   : > { %5159 = vmatprep.mubr.msk.f32.mxu1 %vm564_vm1, %v539_v12  ;;  %5075 = vmatprep.mubr.msk.f32.mxu0 %vm564_vm1, %v539_v12  ;;  %v1053_v49 = vpop.f32.mrf.mxu0 }
 0x4ba   : > { %v7254_v31 = vsub.f32 %v1053_v49, %v2211_v6 }
 0x4bc   : > { %1919 = vmatmul.mubr.f32.gmra.mxu1 %v538_v3  ;;  %1308 = vmatmul.mubr.f32.gmra.mxu0 %v538_v3  ;;  %9330 = vst [vmem:[#allocation116_spill] sm:$0xff] %v7254_v31  ;;  %v7260_v3 = vsub.f32 %v1051_v23, %v2211_v6 }
 0x4be   : > { %9331 = vst [vmem:[#allocation117_spill] sm:$0xff] %v7260_v3 }
 0x4d2   : > { %2926 = vadd.xlane.f32.xlu1 %v2925_v51  ;;  %v2206_v51 = vpop.permute.xlu0 %2205 }
 0x4d5   : > { %2930 = vadd.xlane.f32.xlu0 %v2929_v41  ;;  %v7250_v41 = vsub.f32 %v1047_v19, %v2206_v51  ;;  %v2713_v19 = vmul.f32 %v7254_v31, %v7254_v31  ;;  %v2044_v31 = vmul.f32 0.0051020407, %v7192_v30 }
 0x4d7   : > { %9328 = vst [vmem:[#allocation114_spill] sm:$0xff] %v7250_v41  ;;  %v2711_v12 = vmul.f32 %v7250_v41, %v7250_v41  ;;  %v2936_v49 = vsel %vm1386_vm0, %v2713_v19, 0.0  ;;  %v541_v41 = vld [vmem:[%s6036_s6 + $0x488] sm:$0xff]  ;;  %v542_v19 = vld [vmem:[%s6036_s6 + $0x490] sm:$0xff] }
 0x4d8   : > { %5160 = vmatprep.mubr.msk.f32.mxu1 %vm564_vm1, %v541_v41  ;;  %5076 = vmatprep.mubr.msk.f32.mxu0 %vm564_vm1, %v541_v41 }
 0x4d9   : > { %v7256_v13 = vpop.f32.mrf.mxu1 }
 0x4db   : > { %v1887_v29 = vpop.f32.mrf.mxu1 }
 0x4dd   : > { %v7270_v29 = vpop.f32.mrf.mxu1 }
 0x4df   : > { %v1892_v6 = vpop.f32.mrf.mxu1 }
 0x4e0   : > { %v2221_v6 = vpop.permute.xlu1 %2220 }
 0x4e3   : > { %2360 = vperm.xlu1 %5190, %v2042_v44   ;;  %v7252_v44 = vsub.f32 %v1045_v43, %v2206_v51  ;;  %v2932_v43 = vsel %vm1386_vm0, %v2711_v12, 0.0  ;;  %v2712_v51 = vmul.f32 %v7260_v3, %v7260_v3  ;;  %v540_v12 = vld [vmem:[%s6036_s6 + $0x480] sm:$0xff] }
 0x4e4   : > { %1924 = vmatmul.mubr.f32.gmra.mxu1 %v540_v12  ;;  %1314 = vmatmul.mubr.f32.gmra.mxu0 %v540_v12 }
 0x4e5   : > { %9329 = vst [vmem:[#allocation115_spill] sm:$0xff] %v7252_v44  ;;  %v2937_v23 = vadd.f32 %v2936_v49, %v2712_v51  ;;  %v2216_v49 = vpop.permute.xlu0 %2215 }
 0x4eb   : > { %2365 = vperm.xlu0 %5189, %v2043_v15   ;;  %v2710_v15 = vmul.f32 %v7252_v44, %v7252_v44 }
 0x4ed   : > { %v2933_v37 = vadd.f32 %v2932_v43, %v2710_v15  ;;  %v2045_v15 = vmul.f32 0.0051020407, %v7206_v1  ;;  %v1057_v43 = vpop.f32.mrf.mxu0 }
 0x4ef   : > { %v1059_v51 = vpop.f32.mrf.mxu0 }
 0x4f1   : > { %v1063_v41 = vpop.f32.mrf.mxu0 }
 0x4f3   : > { %v1065_v30 = vpop.f32.mrf.mxu0 }
 0x4f4   : > { %v7286_v1 = vsub.f32 %v1065_v30, %v2221_v6 }
 0x4f6   : > { %9334 = vst [vmem:[#allocation120_spill] sm:$0xff] %v7286_v1  ;;  %v2717_v3 = vmul.f32 %v7286_v1, %v7286_v1 }
 0x4f8   : > { %v2944_v30 = vsel %vm1386_vm0, %v2717_v3, 0.0  ;;  %v2047_v3 = vmul.f32 0.0051020407, %v7238_v18 }
 0x507   : > { %2934 = vadd.xlane.f32.xlu1 %v2933_v37  ;;  %v543_v37 = vld [vmem:[%s6036_s6 + $0x498] sm:$0xff] }
 0x508   : > { %5161 = vmatprep.mubr.msk.f32.mxu1 %vm564_vm1, %v543_v37  ;;  %5077 = vmatprep.mubr.msk.f32.mxu0 %vm564_vm1, %v543_v37 }
 0x509   : > { %1929 = vmatmul.mubr.f32.gmra.mxu1 %v542_v19  ;;  %1320 = vmatmul.mubr.f32.gmra.mxu0 %v542_v19 }
 0x50a   : > { %2938 = vadd.xlane.f32.xlu0 %v2937_v23  ;;  %v7282_v23 = vsub.f32 %v1059_v51, %v2216_v49 }
 0x50c   : > { %9332 = vst [vmem:[#allocation118_spill] sm:$0xff] %v7282_v23  ;;  %v2715_v37 = vmul.f32 %v7282_v23, %v7282_v23  ;;  %v545_v23 = vld [vmem:[%s6036_s6 + $0x4a8] sm:$0xff] }
 0x50d   : > { %5162 = vmatprep.mubr.msk.f32.mxu1 %vm564_vm1, %v545_v23  ;;  %5078 = vmatprep.mubr.msk.f32.mxu0 %vm564_vm1, %v545_v23  ;;  %v2231_v23 = vpop.permute.xlu1 %2230 }
 0x50e   : > { %v7288_v12 = vpop.f32.mrf.mxu1 }
 0x510   : > { %v1897_v19 = vpop.f32.mrf.mxu1 }
 0x512   : > { %v7302_v19 = vpop.f32.mrf.mxu1 }
 0x518   : > { %2370 = vperm.xlu1 %5190, %v2044_v31   ;;  %v7284_v31 = vsub.f32 %v1057_v43, %v2216_v49  ;;  %v2940_v43 = vsel %vm1386_vm0, %v2715_v37, 0.0  ;;  %v544_v37 = vld [vmem:[%s6036_s6 + $0x4a0] sm:$0xff] }
 0x519   : > { %1934 = vmatmul.mubr.f32.gmra.mxu1 %v544_v37  ;;  %1326 = vmatmul.mubr.f32.gmra.mxu0 %v544_v37 }
 0x51a   : > { %9333 = vst [vmem:[#allocation119_spill] sm:$0xff] %v7284_v31  ;;  %v2714_v51 = vmul.f32 %v7284_v31, %v7284_v31  ;;  %v2046_v31 = vmul.f32 0.0051020407, %v7224_v56  ;;  %v1069_v56 = vpop.f32.mrf.mxu0 }
 0x51c   : > { %v2941_v44 = vadd.f32 %v2940_v43, %v2714_v51  ;;  %v546_v51 = vld [vmem:[%s6036_s6 + $0x4b0] sm:$0xff]  ;;  %v1071_v43 = vpop.f32.mrf.mxu0 }
 0x520   : > { %2375 = vperm.xlu0 %5189, %v2045_v15   ;;  %v7292_v15 = vsub.f32 %v1063_v41, %v2221_v6  ;;  %v1902_v6 = vpop.f32.mrf.mxu1 }
 0x522   : > { %9335 = vst [vmem:[#allocation121_spill] sm:$0xff] %v7292_v15  ;;  %v2716_v49 = vmul.f32 %v7292_v15, %v7292_v15 }
 0x524   : > { %v2945_v41 = vadd.f32 %v2944_v30, %v2716_v49  ;;  %v1075_v49 = vpop.f32.mrf.mxu0  ;;  %v2226_v30 = vpop.permute.xlu0 %2225 }
 0x526   : > { %v1077_v6 = vpop.f32.mrf.mxu0 }
 0x527   : > { %v7318_v18 = vsub.f32 %v1077_v6, %v2231_v23 }
 0x529   : > { %9338 = vst [vmem:[#allocation124_spill] sm:$0xff] %v7318_v18  ;;  %v2721_v1 = vmul.f32 %v7318_v18, %v7318_v18 }
 0x52b   : > { %v2952_v6 = vsel %vm1386_vm0, %v2721_v1, 0.0  ;;  %v2049_v1 = vmul.f32 0.0051020407, %v7270_v29 }
 0x53c   : > { %2942 = vadd.xlane.f32.xlu1 %v2941_v44  ;;  %v547_v44 = vld [vmem:[%s6036_s6 + $0x4b8] sm:$0xff] }
 0x53d   : > { %5163 = vmatprep.mubr.msk.f32.mxu1 %vm564_vm1, %v547_v44  ;;  %5079 = vmatprep.mubr.msk.f32.mxu0 %vm564_vm1, %v547_v44 }
 0x53e   : > { %1939 = vmatmul.mubr.f32.gmra.mxu1 %v546_v51  ;;  %1332 = vmatmul.mubr.f32.gmra.mxu0 %v546_v51 }
 0x53f   : > { %2946 = vadd.xlane.f32.xlu0 %v2945_v41  ;;  %v7314_v41 = vsub.f32 %v1071_v43, %v2226_v30 }
 0x541   : > { %9336 = vst [vmem:[#allocation122_spill] sm:$0xff] %v7314_v41  ;;  %v2719_v44 = vmul.f32 %v7314_v41, %v7314_v41  ;;  %v2048_v41 = vmul.f32 0.0051020407, %v7256_v13  ;;  %v1081_v13 = vpop.f32.mrf.mxu0 }
 0x543   : > { %v7320_v37 = vpop.f32.mrf.mxu1 }
 0x545   : > { %v1907_v51 = vpop.f32.mrf.mxu1 }
 0x54d   : > { %2380 = vperm.xlu1 %5190, %v2046_v31   ;;  %v7316_v31 = vsub.f32 %v1069_v56, %v2226_v30  ;;  %v2948_v56 = vsel %vm1386_vm0, %v2719_v44, 0.0  ;;  %v548_v44 = vld [vmem:[%s6036_s6 + $0x4c0] sm:$0xff] }
 0x54f   : > { %9337 = vst [vmem:[#allocation123_spill] sm:$0xff] %v7316_v31  ;;  %v2718_v43 = vmul.f32 %v7316_v31, %v7316_v31  ;;  %v549_v31 = vld [vmem:[%s6036_s6 + $0x4c8] sm:$0xff] }
 0x550   : > { %5164 = vmatprep.mubr.msk.f32.mxu1 %vm564_vm1, %v549_v31  ;;  %5080 = vmatprep.mubr.msk.f32.mxu0 %vm564_vm1, %v549_v31 }
 0x551   : > { %v2949_v15 = vadd.f32 %v2948_v56, %v2718_v43  ;;  %1944 = vmatmul.mubr.f32.gmra.mxu1 %v548_v44  ;;  %1338 = vmatmul.mubr.f32.gmra.mxu0 %v548_v44  ;;  %v550_v43 = vld [vmem:[%s6036_s6 + $0x4d0] sm:$0xff]  ;;  %v7346_v56 = vpop.xlane.xlu1 %2826 }
 0x555   : > { %2385 = vperm.xlu0 %5189, %v2047_v3   ;;  %v7324_v3 = vsub.f32 %v1075_v49, %v2231_v23  ;;  %v7334_v49 = vpop.f32.mrf.mxu1  ;;  %v2241_v31 = vpop.permute.xlu1 %2240 }
 0x557   : > { %9339 = vst [vmem:[#allocation125_spill] sm:$0xff] %v7324_v3  ;;  %v2720_v30 = vmul.f32 %v7324_v3, %v7324_v3  ;;  %v1912_v51 = vpop.f32.mrf.mxu1 }
 0x559   : > { %v2953_v23 = vadd.f32 %v2952_v6, %v2720_v30  ;;  %v2236_v6 = vpop.permute.xlu0 %2235 }
 0x55a   : > { %v7350_v29 = vsub.f32 %v1081_v13, %v2236_v6 }
 0x55c   : > { %9341 = vst [vmem:[#allocation127_spill] sm:$0xff] %v7350_v29  ;;  %v2722_v3 = vmul.f32 %v7350_v29, %v7350_v29 }
 0x571   : > { %2950 = vadd.xlane.f32.xlu1 %v2949_v15  ;;  %v551_v15 = vld [vmem:[%s6036_s6 + $0x4d8] sm:$0xff] }
 0x572   : > { %5165 = vmatprep.mubr.msk.f32.mxu1 %vm564_vm1, %v551_v15  ;;  %5081 = vmatprep.mubr.msk.f32.mxu0 %vm564_vm1, %v551_v15 }
 0x573   : > { %1949 = vmatmul.mubr.f32.gmra.mxu1 %v550_v43  ;;  %1344 = vmatmul.mubr.f32.gmra.mxu0 %v550_v43 }
 0x574   : > { %2954 = vadd.xlane.f32.xlu0 %v2953_v23 }
 0x582   : > { %2390 = vperm.xlu1 %5190, %v2048_v41   ;;  %v1083_v41 = vpop.f32.mrf.mxu0 }
 0x583   : > { %v7348_v23 = vsub.f32 %v1083_v41, %v2236_v6 }
 0x584   : > { %v1087_v30 = vpop.f32.mrf.mxu0 }
 0x585   : > { %9340 = vst [vmem:[#allocation126_spill] sm:$0xff] %v7348_v23  ;;  %v2723_v15 = vmul.f32 %v7348_v23, %v7348_v23  ;;  %v7358_v18 = vsub.f32 %v1087_v30, %v2241_v31  ;;  %v2050_v23 = vmul.f32 0.0051020407, %v7288_v12 }
 0x586   : > { %v1089_v51 = vpop.f32.mrf.mxu0 }
 0x587   : > { %v7352_v44 = vsub.f32 %v1089_v51, %v2241_v31  ;;  %9343 = vst [vmem:[#allocation129_spill] sm:$0xff] %v7358_v18  ;;  %v2956_v13 = vsel %vm1386_vm0, %v2723_v15, 0.0  ;;  %v2724_v6 = vmul.f32 %v7358_v18, %v7358_v18  ;;  %v2051_v15 = vmul.f32 0.0051020407, %v7302_v19  ;;  %v552_v18 = vld [vmem:[%s6036_s6 + $0x4e0] sm:$0xff] }
 0x588   : > { %v2957_v0 = vadd.f32 %v2956_v13, %v2722_v3  ;;  %v7379_v3 = vpop.xlane.xlu0 %2830  ;;  %v1093_v12 = vpop.f32.mrf.mxu0 }
 0x589   : > { %9342 = vst [vmem:[#allocation128_spill] sm:$0xff] %v7352_v44  ;;  %v2725_v41 = vmul.f32 %v7352_v44, %v7352_v44  ;;  %v553_v44 = vld [vmem:[%s6036_s6 + $0x4e8] sm:$0xff]  ;;  %v7384_v13 = vpop.xlane.xlu1 %2838 }
 0x58a   : > { %2395 = vperm.xlu0 %5189, %v2049_v1   ;;  %v7354_v1 = vpop.f32.mrf.mxu1  ;;  %5166 = vmatprep.mubr.msk.f32.mxu1 %vm564_vm1, %v553_v44 }
 0x58b   : > { %v2960_v51 = vsel %vm1386_vm0, %v2725_v41, 0.0  ;;  %5082 = vmatprep.mubr.msk.f32.mxu0 %vm564_vm1, %v553_v44  ;;  %1954 = vmatmul.mubr.f32.gmra.mxu1 %v552_v18  ;;  %v1095_v41 = vpop.f32.mrf.mxu0 }
 0x58c   : > { %v1917_v43 = vpop.f32.mrf.mxu1  ;;  %v2961_v30 = vadd.f32 %v2960_v51, %v2724_v6  ;;  %1350 = vmatmul.mubr.f32.gmra.mxu0 %v552_v18  ;;  %v7382_v19 = vpop.xlane.xlu0 %2834 }
 0x58d   : > { %v1099_v44 = vpop.f32.mrf.mxu0  ;;  %v2251_v51 = vpop.permute.xlu1 %2250 }
 0x58e   : > { %v7368_v43 = vpop.f32.mrf.mxu1  ;;  %v7396_v16 = vsub.f32 %v1099_v44, %v2251_v51 }
 0x590   : > { %v1922_v31 = vpop.f32.mrf.mxu1  ;;  %v2246_v6 = vpop.permute.xlu0 %2245  ;;  %9347 = vst [vmem:[#allocation133_spill] sm:$0xff] %v7396_v16 }
 0x591   : > { %v7386_v18 = vsub.f32 %v1095_v41, %v2246_v6  ;;  %v7388_v31 = vsub.f32 %v1093_v12, %v2246_v6  ;;  %v2728_v6 = vmul.f32 %v7396_v16, %v7396_v16  ;;  %v556_v16 = vld [vmem:[%s6036_s6 + $0x500] sm:$0xff] }
 0x593   : > { %9344 = vst [vmem:[#allocation130_spill] sm:$0xff] %v7386_v18  ;;  %9345 = vst [vmem:[#allocation131_spill] sm:$0xff] %v7388_v31  ;;  %v2726_v59 = vmul.f32 %v7388_v31, %v7388_v31  ;;  %v2052_v31 = vmul.f32 0.0051020407, %v7320_v37 }
 0x594   : > { %v7417_v37 = vpop.xlane.xlu0 %2842 }
 0x5a6   : > { %2958 = vadd.xlane.f32.xlu1 %v2957_v0  ;;  %v555_v0 = vld [vmem:[%s6036_s6 + $0x4f8] sm:$0xff] }
 0x5a7   : > { %5167 = vmatprep.mubr.msk.f32.mxu1 %vm564_vm1, %v555_v0  ;;  %5083 = vmatprep.mubr.msk.f32.mxu0 %vm564_vm1, %v555_v0  ;;  %v7392_v0 = vpop.f32.mrf.mxu1 }
 0x5a9   : > { %2962 = vadd.xlane.f32.xlu0 %v2961_v30  ;;  %v1101_v30 = vpop.f32.mrf.mxu0  ;;  %v1927_v29 = vpop.f32.mrf.mxu1 }
 0x5b7   : > { %2400 = vperm.xlu1 %5190, %v2050_v23   ;;  %v554_v23 = vld [vmem:[%s6036_s6 + $0x4f0] sm:$0xff] }
 0x5b8   : > { %1959 = vmatmul.mubr.f32.gmra.mxu1 %v554_v23  ;;  %1356 = vmatmul.mubr.f32.gmra.mxu0 %v554_v23  ;;  %v2727_v23 = vmul.f32 %v7386_v18, %v7386_v18 }
 0x5ba   : > { %v2964_v12 = vsel %vm1386_vm0, %v2727_v23, 0.0  ;;  %v557_v23 = vld [vmem:[%s6036_s6 + $0x508] sm:$0xff] }
 0x5bb   : > { %v2965_v18 = vadd.f32 %v2964_v12, %v2726_v59  ;;  %5168 = vmatprep.mubr.msk.f32.mxu1 %vm564_vm1, %v557_v23  ;;  %5084 = vmatprep.mubr.msk.f32.mxu0 %vm564_vm1, %v557_v23  ;;  %v1105_v59 = vpop.f32.mrf.mxu0 }
 0x5bc   : > { %1964 = vmatmul.mubr.f32.gmra.mxu1 %v556_v16  ;;  %1362 = vmatmul.mubr.f32.gmra.mxu0 %v556_v16 }
 0x5bd   : > { %5169 = vmatprep.mubr.msk.f32.mxu1 %vm564_vm1, %v559_v11  ;;  %5085 = vmatprep.mubr.msk.f32.mxu0 %vm564_vm1, %v559_v11 }
 0x5bf   : > { %2405 = vperm.xlu0 %5189, %v2051_v15   ;;  %v7390_v15 = vsub.f32 %v1101_v30, %v2251_v51 }
 0x5c1   : > { %9346 = vst [vmem:[#allocation132_spill] sm:$0xff] %v7390_v15  ;;  %v2729_v41 = vmul.f32 %v7390_v15, %v7390_v15  ;;  %v2053_v15 = vmul.f32 0.0051020407, %v7334_v49  ;;  %v558_v49 = vld [vmem:[%s6036_s6 + $0x510] sm:$0xff] }
 0x5c2   : > { %1969 = vmatmul.mubr.f32.gmra.mxu1 %v558_v49  ;;  %1368 = vmatmul.mubr.f32.gmra.mxu0 %v558_v49 }
 0x5c3   : > { %v2968_v30 = vsel %vm1386_vm0, %v2729_v41, 0.0  ;;  %v2256_v41 = vpop.permute.xlu0 %2255 }
 0x5c4   : > { %v2969_v29 = vadd.f32 %v2968_v30, %v2728_v6 }
 0x5c9   : > { %v7406_v44 = vpop.f32.mrf.mxu1 }
 0x5cb   : > { %v1932_v51 = vpop.f32.mrf.mxu1 }
 0x5d9   : > { %v7436_v58 = vpop.f32.mrf.mxu1 }
 0x5db   : > { %2966 = vadd.xlane.f32.xlu1 %v2965_v18  ;;  %v1107_v18 = vpop.f32.mrf.mxu0  ;;  %v1937_v8 = vpop.f32.mrf.mxu1 }
 0x5dc   : > { %v7422_v12 = vsub.f32 %v1107_v18, %v2256_v41  ;;  %v2054_v8 = vmul.f32 0.0051020407, %v7354_v1  ;;  %v560_v1 = vld [vmem:[%s6036_s6 + $0x520] sm:$0xff] }
 0x5de   : > { %2970 = vadd.xlane.f32.xlu0 %v2969_v29  ;;  %9348 = vst [vmem:[#allocation134_spill] sm:$0xff] %v7422_v12  ;;  %v7424_v29 = vsub.f32 %v1105_v59, %v2256_v41  ;;  %v2731_v11 = vmul.f32 %v7422_v12, %v7422_v12 }
 0x5e0   : > { %9349 = vst [vmem:[#allocation135_spill] sm:$0xff] %v7424_v29  ;;  %v2730_v23 = vmul.f32 %v7424_v29, %v7424_v29  ;;  %v2972_v18 = vsel %vm1386_vm0, %v2731_v11, 0.0  ;;  %v7446_v11 = vpop.xlane.xlu0 %2850 }
 0x5ec   : > { %2410 = vperm.xlu1 %5190, %v2052_v31   ;;  %v7419_v31 = vpop.xlane.xlu1 %2846 }
 0x5f0   : > { %v2261_v6 = vpop.permute.xlu1 %2260 }
 0x5f4   : > { %2415 = vperm.xlu0 %5189, %v2053_v15   ;;  %v1111_v15 = vpop.f32.mrf.mxu0 }
 0x5f5   : > { %v7430_v51 = vsub.f32 %v1111_v15, %v2261_v6 }
 0x5f6   : > { %v1113_v30 = vpop.f32.mrf.mxu0 }
 0x5f7   : > { %v7426_v16 = vsub.f32 %v1113_v30, %v2261_v6  ;;  %9351 = vst [vmem:[#allocation137_spill] sm:$0xff] %v7430_v51  ;;  %v2732_v59 = vmul.f32 %v7430_v51, %v7430_v51  ;;  %v2973_v30 = vadd.f32 %v2972_v18, %v2730_v23  ;;  %v3160_v6 = vmul.f32 0.0051020407, %v7346_v56  ;;  %v2266_v23 = vpop.permute.xlu0 %2265  ;;  %v5361_v56 = vld [vmem:[%s6012_s28] sm:$0xff] }
 0x5f9   : > { %9350 = vst [vmem:[#allocation136_spill] sm:$0xff] %v7426_v16  ;;  %v2733_v49 = vmul.f32 %v7426_v16, %v7426_v16  ;;  %v3328_v29 = vadd.f32 0.001, %v3160_v6  ;;  %v1117_v6 = vpop.f32.mrf.mxu0 }
 0x5fb   : > { %v2976_v41 = vsel %vm1386_vm0, %v2733_v49, 0.0  ;;  %5193 = vrsqrt.f32 %v3328_v29  ;;  %v2055_v49 = vmul.f32 0.0051020407, %v7368_v43  ;;  %v7455_v29 = vpop.xlane.xlu1 %2854 }
 0x5fc   : > { %v2977_v15 = vadd.f32 %v2976_v41, %v2732_v59  ;;  %v7449_v59 = vpop.xlane.xlu0 %2858 }
 0x5fe   : > { %v7443_v12 = vpop.f32.mrf.mxu1 }
 0x600   : > { %v1942_v16 = vpop.f32.mrf.mxu1 }
 0x601   : > { %v561_v16 = vld [vmem:[%s6036_s6 + $0x528] sm:$0xff] }
 0x602   : > { %5170 = vmatprep.mubr.msk.f32.mxu1 %vm564_vm1, %v561_v16  ;;  %5086 = vmatprep.mubr.msk.f32.mxu0 %vm564_vm1, %v561_v16  ;;  %v7474_v16 = vsub.f32 %v1117_v6, %v2266_v23 }
 0x603   : > { %1974 = vmatmul.mubr.f32.gmra.mxu1 %v560_v1  ;;  %1374 = vmatmul.mubr.f32.gmra.mxu0 %v560_v1 }
 0x604   : > { %9354 = vst [vmem:[#allocation140_spill] sm:$0xff] %v7474_v16  ;;  %v2734_v61 = vmul.f32 %v7474_v16, %v7474_v16 }
 0x608   : > { %v5194_v18 = vpop.eup %5193 }
 0x609   : > { %v3496_v41 = vmul.f32 %v5361_v56, %v5194_v18  ;;  %v1119_v18 = vpop.f32.mrf.mxu0 }
 0x60a   : > { %v7470_v51 = vsub.f32 %v1119_v18, %v2266_v23  ;;  %v3161_v18 = vmul.f32 0.0051020407, %v7379_v3 }
 0x60b   : > { %v1123_v53 = vpop.f32.mrf.mxu0 }
 0x60c   : > { %9352 = vst [vmem:[#allocation138_spill] sm:$0xff] %v7470_v51  ;;  %v2735_v1 = vmul.f32 %v7470_v51, %v7470_v51  ;;  %v3329_v4 = vadd.f32 0.001, %v3161_v18 }
 0x60e   : > { %v2980_v9 = vsel %vm1386_vm0, %v2735_v1, 0.0  ;;  %5195 = vrsqrt.f32 %v3329_v4 }
 0x60f   : > { %v2981_v51 = vadd.f32 %v2980_v9, %v2734_v61 }
 0x610   : > { %2974 = vadd.xlane.f32.xlu1 %v2973_v30  ;;  %v7452_v30 = vpop.permute.xlu0 %2275 }
 0x611   : > { %v7494_v42 = vpop.f32.mrf.mxu1 }
 0x613   : > { %2978 = vadd.xlane.f32.xlu0 %v2977_v15  ;;  %v563_v15 = vld [vmem:[%s6036_s6 + $0x538] sm:$0xff] }
 0x614   : > { %5171 = vmatprep.mubr.msk.f32.mxu1 %vm564_vm1, %v563_v15  ;;  %v7462_v43 = vpop.xlane.xlu0 %2866  ;;  %5087 = vmatprep.mubr.msk.f32.mxu0 %vm564_vm1, %v563_v15  ;;  %v1125_v15 = vpop.f32.mrf.mxu0 }
 0x61b   : > { %v5196_v4 = vpop.eup %5195 }
 0x621   : > { %2420 = vperm.xlu1 %5190, %v2054_v8   ;;  %v2271_v8 = vpop.permute.xlu1 %2270 }
 0x622   : > { %v7482_v50 = vsub.f32 %v1125_v15, %v2271_v8  ;;  %v7490_v6 = vsub.f32 %v1123_v53, %v2271_v8  ;;  %v1947_v15 = vpop.f32.mrf.mxu1 }
 0x624   : > { %9355 = vst [vmem:[#allocation141_spill] sm:$0xff] %v7482_v50  ;;  %9357 = vst [vmem:[#allocation143_spill] sm:$0xff] %v7490_v6  ;;  %v2736_v3 = vmul.f32 %v7490_v6, %v7490_v6 }
 0x625   : > { %v7467_v56 = vpop.xlane.xlu1 %2862 }
 0x629   : > { %2425 = vperm.xlu0 %5189, %v2055_v49   ;;  %v7465_v49 = vpop.permute.xlu0 %2285  ;;  %v2281_v63 = vpop.permute.xlu1 %2280 }
 0x62d   : > { %3582 = vperm.xlu0 %5189, %v3496_v41   ;;  %v562_v41 = vld [vmem:[%s6036_s6 + $0x530] sm:$0xff]  ;;  %v7472_v60 = vpop.xlane.xlu0 %2874  ;;  %v7488_v23 = vpop.xlane.xlu1 %2870 }
 0x62e   : > { %9353 = vst [vmem:[#allocation139_spill] sm:$0xff] %v7472_v60  ;;  %1979 = vmatmul.mubr.f32.gmra.mxu1 %v562_v41  ;;  %1380 = vmatmul.mubr.f32.gmra.mxu0 %v562_v41  ;;  %v2737_v41 = vmul.f32 %v7482_v50, %v7482_v50 }
 0x630   : > { %v2984_v1 = vsel %vm1386_vm0, %v2737_v41, 0.0  ;;  %v2056_v41 = vmul.f32 0.0051020407, %v7392_v0 }
 0x631   : > { %v7478_v7 = vpop.permute.xlu0 %2295  ;;  %v2985_v8 = vadd.f32 %v2984_v1, %v2736_v3  ;;  %v5362_v1 = vld [vmem:[%s6012_s28 + $0x8] sm:$0xff] }
 0x633   : > { %v7509_v18 = vpop.f32.mrf.mxu1 }
 0x635   : > { %v7486_v24 = vpop.xlane.xlu0 %2882 }
 0x636   : > { %9356 = vst [vmem:[#allocation142_spill] sm:$0xff] %v7486_v24  ;;  %v7501_v24 = vpop.permute.xlu1 %2290 }
 0x639   : > { %v7496_v16 = vpop.permute.xlu0 %2305 }
 0x63a   : > { %v7505_v9 = vpop.xlane.xlu1 %2878 }
 0x63b   : > { %9359 = vst [vmem:[#allocation145_spill] sm:$0xff] %v7505_v9 }
 0x63d   : > { %v7503_v53 = vpop.xlane.xlu0 %2890 }
 0x63e   : > { %9358 = vst [vmem:[#allocation144_spill] sm:$0xff] %v7503_v53  ;;  %v7513_v50 = vpop.permute.xlu1 %2300  ;;  %v3497_v53 = vmul.f32 %v5362_v1, %v5196_v4 }
 0x641   : > { %v7507_v61 = vpop.permute.xlu0 %2315 }
 0x642   : > { %v7518_v33 = vpop.xlane.xlu1 %2886 }
 0x643   : > { %9361 = vst [vmem:[#allocation147_spill] sm:$0xff] %v7518_v33 }
 0x645   : > { %2982 = vadd.xlane.f32.xlu1 %v2981_v51  ;;  %v1952_v51 = vpop.f32.mrf.mxu1  ;;  %v7511_v15 = vpop.xlane.xlu0 %2898 }
 0x646   : > { %9360 = vst [vmem:[#allocation146_spill] sm:$0xff] %v7511_v15  ;;  %v2057_v15 = vmul.f32 0.0051020407, %v7406_v44 }
 0x649   : > { %v7516_v6 = vpop.permute.xlu0 %2325 }
 0x64c   : > { %2986 = vadd.xlane.f32.xlu0 %v2985_v8  ;;  %v7523_v8 = vpop.permute.xlu1 %2310 }
 0x64d   : > { %v7520_v3 = vpop.xlane.xlu0 %2906 }
 0x64e   : > { %9362 = vst [vmem:[#allocation148_spill] sm:$0xff] %v7520_v3 }
 0x650   : > { %v7528_v45 = vpop.xlane.xlu1 %2894 }
 0x651   : > { %v7525_v51 = vpop.permute.xlu0 %2335  ;;  %9364 = vst [vmem:[#allocation150_spill] sm:$0xff] %v7528_v45 }
 0x652   : > { %9363 = vst [vmem:[#allocation149_spill] sm:$0xff] %v7525_v51 }
 0x654   : > { %v7534_v33 = vpop.permute.xlu1 %2320 }
 0x655   : > { %v7530_v0 = vpop.xlane.xlu0 %2914 }
 0x656   : > { %2430 = vperm.xlu1 %5190, %v2056_v41   ;;  %9365 = vst [vmem:[#allocation151_spill] sm:$0xff] %v7530_v0  ;;  %v1129_v41 = vpop.f32.mrf.mxu0 }
 0x658   : > { %v7538_v4 = vpop.xlane.xlu1 %2902 }
 0x659   : > { %v7532_v26 = vpop.permute.xlu0 %2345  ;;  %9368 = vst [vmem:[#allocation154_spill] sm:$0xff] %v7538_v4 }
 0x65a   : > { %3587 = vperm.xlu1 %5190, %v3497_v53   ;;  %9366 = vst [vmem:[#allocation152_spill] sm:$0xff] %v7532_v26  ;;  %v1131_v53 = vpop.f32.mrf.mxu0  ;;  %v7552_v26 = vsub.f32 %v1129_v41, %v7452_v30 }
 0x65b   : > { %v7547_v0 = vsub.f32 %v1131_v53, %v7452_v30  ;;  %v3162_v30 = vmul.f32 0.0051020407, %v7382_v19 }
 0x65c   : > { %v1135_v51 = vpop.f32.mrf.mxu0  ;;  %v7542_v36 = vpop.permute.xlu1 %2330  ;;  %9373 = vst [vmem:[#allocation159_spill] sm:$0xff] %v7552_v26 }
 0x65d   : > { %v7536_v3 = vpop.xlane.xlu0 %2922  ;;  %9371 = vst [vmem:[#allocation157_spill] sm:$0xff] %v7547_v0  ;;  %v7560_v52 = vsub.f32 %v1135_v51, %v2281_v63 }
 0x65e   : > { %9367 = vst [vmem:[#allocation153_spill] sm:$0xff] %v7536_v3 }
 0x65f   : > { %9376 = vst [vmem:[#allocation162_spill] sm:$0xff] %v7560_v52 }
 0x660   : > { %v7549_v45 = vpop.xlane.xlu1 %2910 }
 0x661   : > { %v7540_v1 = vpop.permute.xlu0 %2355  ;;  %9372 = vst [vmem:[#allocation158_spill] sm:$0xff] %v7549_v45  ;;  %v2740_v45 = vmul.f32 %v7560_v52, %v7560_v52 }
 0x662   : > { %2435 = vperm.xlu0 %5189, %v2057_v15   ;;  %9369 = vst [vmem:[#allocation155_spill] sm:$0xff] %v7540_v1  ;;  %v1137_v15 = vpop.f32.mrf.mxu0  ;;  %v2739_v1 = vmul.f32 %v7547_v0, %v7547_v0 }
 0x663   : > { %v7554_v3 = vsub.f32 %v1137_v15, %v2281_v63 }
 0x664   : > { %v2988_v41 = vsel %vm1386_vm0, %v2739_v1, 0.0  ;;  %v7570_v15 = vpop.permute.xlu1 %2340  ;;  %v3163_v1 = vmul.f32 0.0051020407, %v7384_v13 }
 0x665   : > { %v7544_v44 = vpop.xlane.xlu0 %2930  ;;  %9374 = vst [vmem:[#allocation160_spill] sm:$0xff] %v7554_v3  ;;  %v2741_v53 = vmul.f32 %v7554_v3, %v7554_v3 }
 0x666   : > { %9370 = vst [vmem:[#allocation156_spill] sm:$0xff] %v7544_v44  ;;  %v2738_v44 = vmul.f32 %v7552_v26, %v7552_v26  ;;  %v7577_v26 = vpop.f32.mrf.mxu1 }
 0x667   : > { %v2992_v63 = vsel %vm1386_vm0, %v2741_v53, 0.0 }
 0x668   : > { %v2989_v0 = vadd.f32 %v2988_v41, %v2738_v44  ;;  %v7579_v3 = vpop.xlane.xlu1 %2918  ;;  %v2993_v19 = vadd.f32 %v2992_v63, %v2740_v45  ;;  %v3331_v44 = vadd.f32 0.001, %v3163_v1  ;;  %v2058_v45 = vmul.f32 0.0051020407, %v7436_v58 }
 0x669   : > { %v7556_v4 = vpop.permute.xlu0 %2365  ;;  %9379 = vst [vmem:[#allocation165_spill] sm:$0xff] %v7579_v3 }
 0x66a   : > { %9375 = vst [vmem:[#allocation161_spill] sm:$0xff] %v7556_v4  ;;  %v3330_v4 = vadd.f32 0.001, %v3162_v30 }
 0x66c   : > { %5197 = vrsqrt.f32 %v3330_v4  ;;  %v7584_v52 = vpop.permute.xlu1 %2350 }
 0x66d   : > { %v7566_v9 = vpop.xlane.xlu0 %2938  ;;  %5199 = vrsqrt.f32 %v3331_v44 }
 0x66e   : > { %9377 = vst [vmem:[#allocation163_spill] sm:$0xff] %v7566_v9  ;;  %v1957_v9 = vpop.f32.mrf.mxu1 }
 0x670   : > { %v7590_v30 = vpop.xlane.xlu1 %2926 }
 0x671   : > { %v7575_v51 = vpop.permute.xlu0 %2375  ;;  %9382 = vst [vmem:[#allocation168_spill] sm:$0xff] %v7590_v30  ;;  %v5364_v30 = vld [vmem:[%s6012_s28 + $0x18] sm:$0xff] }
 0x672   : > { %9378 = vst [vmem:[#allocation164_spill] sm:$0xff] %v7575_v51 }
 0x674   : > { %v7597_v4 = vpop.permute.xlu1 %2360 }
 0x675   : > { %v7581_v60 = vpop.xlane.xlu0 %2946 }
 0x676   : > { %9380 = vst [vmem:[#allocation166_spill] sm:$0xff] %v7581_v60 }
 0x678   : > { %v7588_v41 = vpop.f32.mrf.mxu1  ;;  %v7602_v60 = vpop.xlane.xlu1 %2934 }
 0x679   : > { %v7586_v53 = vpop.permute.xlu0 %2385  ;;  %v5198_v13 = vpop.eup %5197  ;;  %9386 = vst [vmem:[#allocation172_spill] sm:$0xff] %v7602_v60 }
 0x67a   : > { %9381 = vst [vmem:[#allocation167_spill] sm:$0xff] %v7586_v53  ;;  %v1962_v9 = vpop.f32.mrf.mxu1  ;;  %v5200_v44 = vpop.eup %5199 }
 0x67c   : > { %v7607_v58 = vpop.permute.xlu1 %2370 }
 0x67d   : > { %v7592_v3 = vpop.xlane.xlu0 %2954 }
 0x67e   : > { %2990 = vadd.xlane.f32.xlu1 %v2989_v0  ;;  %9383 = vst [vmem:[#allocation169_spill] sm:$0xff] %v7592_v3  ;;  %v2059_v3 = vmul.f32 0.0051020407, %v7443_v12 }
 0x681   : > { %2994 = vadd.xlane.f32.xlu0 %v2993_v19  ;;  %v7595_v0 = vpop.permute.xlu0 %2395  ;;  %v5363_v19 = vld [vmem:[%s6012_s28 + $0x10] sm:$0xff] }
 0x682   : > { %9384 = vst [vmem:[#allocation170_spill] sm:$0xff] %v7595_v0  ;;  %v3498_v1 = vmul.f32 %v5363_v19, %v5198_v13  ;;  %v1141_v19 = vpop.f32.mrf.mxu0 }
 0x685   : > { %v7599_v63 = vpop.xlane.xlu0 %2962 }
 0x686   : > { %9385 = vst [vmem:[#allocation171_spill] sm:$0xff] %v7599_v63  ;;  %v7612_v63 = vpop.xlane.xlu1 %2942 }
 0x689   : > { %v7605_v9 = vpop.permute.xlu0 %2405 }
 0x68a   : > { %9387 = vst [vmem:[#allocation173_spill] sm:$0xff] %v7605_v9  ;;  %v7618_v12 = vpop.permute.xlu1 %2380  ;;  %v1143_v9 = vpop.f32.mrf.mxu0 }
 0x68d   : > { %v7609_v0 = vpop.xlane.xlu0 %2970 }
 0x68e   : > { %9388 = vst [vmem:[#allocation174_spill] sm:$0xff] %v7609_v0  ;;  %v7622_v53 = vpop.xlane.xlu1 %2950 }
 0x68f   : > { %2440 = vperm.xlu1 %5190, %v2058_v45   ;;  %v3499_v45 = vmul.f32 %v5364_v30, %v5200_v44  ;;  %9391 = vst [vmem:[#allocation177_spill] sm:$0xff] %v7622_v53  ;;  %v7634_v44 = vsub.f32 %v1143_v9, %v7465_v49 }
 0x691   : > { %v7614_v13 = vpop.permute.xlu0 %2415  ;;  %9392 = vst [vmem:[#allocation178_spill] sm:$0xff] %v7634_v44 }
 0x692   : > { %v7638_v53 = vpop.permute.xlu1 %2390 }
 0x693   : > { %3592 = vperm.xlu1 %5190, %v3498_v1  }
 0x697   : > { %2445 = vperm.xlu0 %5189, %v2059_v3   ;;  %v1147_v3 = vpop.f32.mrf.mxu0 }
 0x698   : > { %v7652_v9 = vsub.f32 %v1147_v3, %v7501_v24 }
 0x69a   : > { %9395 = vst [vmem:[#allocation181_spill] sm:$0xff] %v7652_v9 }
 0x69b   : > { %3597 = vperm.xlu0 %5189, %v3499_v45   ;;  %v1149_v45 = vpop.f32.mrf.mxu0 }
 0x69c   : > { %v7616_v1 = vpop.xlane.xlu0 %2978 }
 0x69d   : > { %9389 = vst [vmem:[#allocation175_spill] sm:$0xff] %v7616_v1 }
 0x6a4   : > { %v7620_v60 = vpop.permute.xlu0 %2425 }
 0x6a5   : > { %9390 = vst [vmem:[#allocation176_spill] sm:$0xff] %v7620_v60 }
 0x6a8   : > { %v3583_v0 = vpop.permute.xlu0 %3582 }
 0x6a9   : > { %v4000_v51 = vmul.f32 %v3583_v0, %v6833_v28  ;;  %v4001_v30 = vmul.f32 %v3583_v0, %v6829_v47  ;;  %v7641_v47 = vsub.f32 %v1141_v19, %v7465_v49  ;;  %v7644_v28 = vsub.f32 %v1149_v45, %v7501_v24  ;;  %v7665_v24 = vpop.f32.mrf.mxu1 }
 0x6aa   : > { %v2743_v0 = vmul.f32 %v7634_v44, %v7634_v44  ;;  %v3164_v19 = vmul.f32 0.0051020407, %v7417_v37  ;;  %v3165_v37 = vmul.f32 0.0051020407, %v7419_v31  ;;  %v5365_v31 = vld [vmem:[%s6012_s28 + $0x20] sm:$0xff] }
 0x6ab   : > { %v4588_v1 = vadd.f32 %v6580_v55, %v4000_v51  ;;  %v4589_v60 = vadd.f32 %v6580_v55, %v4001_v30  ;;  %9393 = vst [vmem:[#allocation179_spill] sm:$0xff] %v7641_v47  ;;  %9394 = vst [vmem:[#allocation180_spill] sm:$0xff] %v7644_v28  ;;  %v7654_v51 = vpop.xlane.xlu1 %2958  ;;  %v2742_v55 = vmul.f32 %v7641_v47, %v7641_v47  ;;  %v1967_v47 = vpop.f32.mrf.mxu1 }
 0x6ac   : > { %9396 = vst [vmem:[#allocation182_spill] sm:$0xff] %v7654_v51  ;;  %v2745_v49 = vmul.f32 %v7644_v28, %v7644_v28  ;;  %v3332_v3 = vadd.f32 0.001, %v3164_v19  ;;  %v2060_v47 = vmul.f32 0.0051020407, %v7494_v42 }
 0x6ad   : > { %4756 = vst [vmem:[%s7631_s9] sm:$0xff] %v4588_v1  ;;  %4757 = vst.msk [vmem:[%s7631_s9 + $0x8] sm:$0xff] %vm1386_vm0, %v4589_v60  ;;  %v2996_v1 = vsel %vm1386_vm0, %v2743_v0, 0.0  ;;  %v2744_v60 = vmul.f32 %v7652_v9, %v7652_v9  ;;  %v3333_v0 = vadd.f32 0.001, %v3165_v37  ;;  %v7672_v9 = vpop.f32.mrf.mxu1 }
 0x6ae   : > { %v3000_v30 = vsel %vm1386_vm0, %v2745_v49, 0.0  ;;  %v2997_v45 = vadd.f32 %v2996_v1, %v2742_v55  ;;  %5201 = vrsqrt.f32 %v3332_v3 }
 0x6af   : > { %v7667_v44 = vpop.permute.xlu1 %2400  ;;  %v3001_v51 = vadd.f32 %v3000_v30, %v2744_v60  ;;  %v1972_v55 = vpop.f32.mrf.mxu1  ;;  %5203 = vrsqrt.f32 %v3333_v0  ;;  %v5366_v0 = vld [vmem:[%s6012_s28 + $0x28] sm:$0xff] }
 0x6b3   : > { %v7670_v28 = vpop.xlane.xlu1 %2966 }
 0x6b7   : > { %2998 = vadd.xlane.f32.xlu1 %v2997_v45  ;;  %v7674_v49 = vpop.permute.xlu1 %2410 }
 0x6ba   : > { %3002 = vadd.xlane.f32.xlu0 %v3001_v51  ;;  %v2061_v51 = vmul.f32 0.0051020407, %v7509_v18 }
 0x6bb   : > { %v7676_v19 = vpop.xlane.xlu1 %2974  ;;  %v5202_v1 = vpop.eup %5201 }
 0x6bc   : > { %9397 = vst [vmem:[#allocation183_spill] sm:$0xff] %v7676_v19  ;;  %v3500_v30 = vmul.f32 %v5365_v31, %v5202_v1  ;;  %v5204_v3 = vpop.eup %5203  ;;  %v1153_v1 = vpop.f32.mrf.mxu0 }
 0x6bd   : > { %v3501_v55 = vmul.f32 %v5366_v0, %v5204_v3  ;;  %v7699_v0 = vsub.f32 %v1153_v1, %v7478_v7 }
 0x6be   : > { %v1155_v18 = vpop.f32.mrf.mxu0 }
 0x6bf   : > { %v7679_v60 = vpop.permute.xlu1 %2420 }
 0x6c8   : > { %2450 = vperm.xlu1 %5190, %v2060_v47  }
 0x6cc   : > { %3602 = vperm.xlu1 %5190, %v3500_v30  }
 0x6ce   : > { %v7683_v45 = vpop.xlane.xlu1 %2982 }
 0x6cf   : > { %9398 = vst [vmem:[#allocation184_spill] sm:$0xff] %v7683_v45  ;;  %v7696_v45 = vsub.f32 %v1155_v18, %v7478_v7 }
 0x6d0   : > { %2455 = vperm.xlu0 %5189, %v2061_v51   ;;  %v1159_v51 = vpop.f32.mrf.mxu0 }
 0x6d2   : > { %v7685_v37 = vpop.permute.xlu1 %2430  ;;  %v1161_v3 = vpop.f32.mrf.mxu0 }
 0x6d4   : > { %3607 = vperm.xlu0 %5189, %v3501_v55  }
 0x6d6   : > { %v3588_v42 = vpop.permute.xlu1 %3587 }
 0x6d7   : > { %v4002_v47 = vmul.f32 %v3588_v42, %v6831_v48  ;;  %v4003_v19 = vmul.f32 %v3588_v42, %v6827_v27  ;;  %v7702_v48 = vsub.f32 %v1161_v3, %v7513_v50  ;;  %v2747_v27 = vmul.f32 %v7696_v45, %v7696_v45 }
 0x6d8   : > { %v3166_v42 = vmul.f32 0.0051020407, %v7446_v11  ;;  %v3167_v3 = vmul.f32 0.0051020407, %v7455_v29 }
 0x6d9   : > { %v4590_v31 = vadd.f32 %v6601_v2, %v4002_v47  ;;  %v4591_v30 = vadd.f32 %v6601_v2, %v4003_v19  ;;  %9399 = vst [vmem:[#allocation185_spill] sm:$0xff] %v7702_v48  ;;  %v7707_v2 = vsub.f32 %v1159_v51, %v7513_v50  ;;  %v2746_v19 = vmul.f32 %v7699_v0, %v7699_v0 }
 0x6da   : > { %v2749_v55 = vmul.f32 %v7702_v48, %v7702_v48  ;;  %v3004_v7 = vsel %vm1386_vm0, %v2747_v27, 0.0  ;;  %v3334_v50 = vadd.f32 0.001, %v3166_v42  ;;  %v3335_v11 = vadd.f32 0.001, %v3167_v3 }
 0x6db   : > { %4758 = vst [vmem:[%s7631_s9 + $0x10] sm:$0xff] %v4590_v31  ;;  %4759 = vst.msk [vmem:[%s7631_s9 + $0x18] sm:$0xff] %vm1386_vm0, %v4591_v30  ;;  %v2748_v47 = vmul.f32 %v7707_v2, %v7707_v2  ;;  %v3005_v31 = vadd.f32 %v3004_v7, %v2746_v19  ;;  %v7718_v30 = vpop.f32.mrf.mxu1  ;;  %v5367_v7 = vld [vmem:[%s6012_s28 + $0x30] sm:$0xff]  ;;  %v2063_v42 = vmul.f32 0.0051020407, %v7588_v41 }
 0x6dc   : > { %9400 = vst [vmem:[#allocation186_spill] sm:$0xff] %v7707_v2  ;;  %v3008_v1 = vsel %vm1386_vm0, %v2749_v55, 0.0  ;;  %5205 = vrsqrt.f32 %v3334_v50  ;;  %v2062_v55 = vmul.f32 0.0051020407, %v7577_v26  ;;  %v5368_v26 = vld [vmem:[%s6012_s28 + $0x38] sm:$0xff] }
 0x6dd   : > { %v1977_v18 = vpop.f32.mrf.mxu1  ;;  %v3009_v51 = vadd.f32 %v3008_v1, %v2748_v47  ;;  %5207 = vrsqrt.f32 %v3335_v11  ;;  %v7726_v47 = vpop.xlane.xlu0 %2986 }
 0x6de   : > { %v1165_v11 = vpop.f32.mrf.mxu0 }
 0x6e9   : > { %v5206_v19 = vpop.eup %5205 }
 0x6ea   : > { %v3502_v2 = vmul.f32 %v5367_v7, %v5206_v19  ;;  %v5208_v29 = vpop.eup %5207  ;;  %v1167_v7 = vpop.f32.mrf.mxu0 }
 0x6eb   : > { %v3503_v18 = vmul.f32 %v5368_v26, %v5208_v29 }
 0x6ee   : > { %v7721_v48 = vpop.f32.mrf.mxu1 }
 0x6f0   : > { %3006 = vadd.xlane.f32.xlu1 %v3005_v31  ;;  %v1982_v27 = vpop.f32.mrf.mxu1  ;;  %v7730_v31 = vpop.permute.xlu0 %2435 }
 0x6f3   : > { %3010 = vadd.xlane.f32.xlu0 %v3009_v51 }
 0x701   : > { %2460 = vperm.xlu1 %5190, %v2062_v55  }
 0x705   : > { %3612 = vperm.xlu1 %5190, %v3502_v2  }
 0x707   : > { %v7728_v1 = vpop.xlane.xlu1 %2990 }
 0x709   : > { %2465 = vperm.xlu0 %5189, %v2063_v42  }
 0x70a   : > { %v7735_v51 = vpop.xlane.xlu0 %2994 }
 0x70b   : > { %v7732_v50 = vpop.permute.xlu1 %2440 }
 0x70d   : > { %3617 = vperm.xlu0 %5189, %v3503_v18  }
 0x70f   : > { %v3593_v2 = vpop.permute.xlu1 %3592 }
 0x710   : > { %v4004_v41 = vmul.f32 %v3593_v2, %v6845_v57  ;;  %v4005_v3 = vmul.f32 %v3593_v2, %v6837_v32  ;;  %v1171_v57 = vpop.f32.mrf.mxu0 }
 0x712   : > { %v4592_v27 = vadd.f32 %v6587_v62, %v4004_v41  ;;  %v4593_v55 = vadd.f32 %v6587_v62, %v4005_v3  ;;  %v7741_v19 = vpop.permute.xlu0 %2445  ;;  %v7754_v62 = vsub.f32 %v1167_v7, %v7496_v16  ;;  %v1173_v2 = vpop.f32.mrf.mxu0  ;;  %v7757_v41 = vsub.f32 %v1165_v11, %v7496_v16 }
 0x713   : > { %v7760_v3 = vsub.f32 %v1173_v2, %v7523_v8 }
 0x714   : > { %4760 = vst [vmem:[%s7631_s9 + $0x20] sm:$0xff] %v4592_v27  ;;  %4761 = vst.msk [vmem:[%s7631_s9 + $0x28] sm:$0xff] %vm1386_vm0, %v4593_v55  ;;  %v3168_v55 = vmul.f32 0.0051020407, %v7449_v59  ;;  %v2064_v59 = vmul.f32 0.0051020407, %v7665_v24 }
 0x715   : > { %9401 = vst [vmem:[#allocation187_spill] sm:$0xff] %v7760_v3  ;;  %v2753_v27 = vmul.f32 %v7760_v3, %v7760_v3 }
 0x716   : > { %v3598_v42 = vpop.permute.xlu0 %3597 }
 0x717   : > { %v4006_v29 = vmul.f32 %v3598_v42, %v6868_v34  ;;  %v4007_v26 = vmul.f32 %v3598_v42, %v6866_v20  ;;  %v2751_v20 = vmul.f32 %v7754_v62, %v7754_v62  ;;  %v7765_v34 = vsub.f32 %v1171_v57, %v7523_v8 }
 0x718   : > { %v3016_v7 = vsel %vm1386_vm0, %v2753_v27, 0.0 }
 0x719   : > { %v4594_v18 = vadd.f32 %v6593_v5, %v4006_v29  ;;  %v4595_v32 = vadd.f32 %v6593_v5, %v4007_v26  ;;  %9402 = vst [vmem:[#allocation188_spill] sm:$0xff] %v7765_v34  ;;  %v2750_v5 = vmul.f32 %v7757_v41, %v7757_v41  ;;  %v3012_v16 = vsel %vm1386_vm0, %v2751_v20, 0.0 }
 0x71a   : > { %v2752_v11 = vmul.f32 %v7765_v34, %v7765_v34  ;;  %v3336_v29 = vadd.f32 0.001, %v3168_v55  ;;  %v3169_v26 = vmul.f32 0.0051020407, %v7467_v56  ;;  %v2065_v20 = vmul.f32 0.0051020407, %v7672_v9 }
 0x71b   : > { %4762 = vst [vmem:[%s7631_s9 + $0x30] sm:$0xff] %v4594_v18  ;;  %4763 = vst.msk [vmem:[%s7631_s9 + $0x38] sm:$0xff] %vm1386_vm0, %v4595_v32  ;;  %v3013_v42 = vadd.f32 %v3012_v16, %v2750_v5  ;;  %v5369_v32 = vld [vmem:[%s6012_s28 + $0x40] sm:$0xff]  ;;  %v5370_v56 = vld [vmem:[%s6012_s28 + $0x48] sm:$0xff] }
 0x71c   : > { %v3017_v8 = vadd.f32 %v3016_v7, %v2752_v11  ;;  %5209 = vrsqrt.f32 %v3336_v29  ;;  %v3337_v57 = vadd.f32 0.001, %v3169_v26 }
 0x71e   : > { %5211 = vrsqrt.f32 %v3337_v57 }
 0x729   : > { %3014 = vadd.xlane.f32.xlu1 %v3013_v42  ;;  %v5210_v18 = vpop.eup %5209  ;;  %v1177_v42 = vpop.f32.mrf.mxu0 }
 0x72a   : > { %v3504_v2 = vmul.f32 %v5369_v32, %v5210_v18 }
 0x72b   : > { %v5212_v27 = vpop.eup %5211  ;;  %v1179_v57 = vpop.f32.mrf.mxu0 }
 0x72c   : > { %3018 = vadd.xlane.f32.xlu0 %v3017_v8  ;;  %v3505_v16 = vmul.f32 %v5370_v56, %v5212_v27  ;;  %v7807_v27 = vsub.f32 %v1177_v42, %v7507_v61 }
 0x73a   : > { %2470 = vperm.xlu1 %5190, %v2064_v59  }
 0x73e   : > { %3622 = vperm.xlu1 %5190, %v3504_v2  }
 0x740   : > { %v7780_v5 = vpop.xlane.xlu1 %2998 }
 0x742   : > { %2475 = vperm.xlu0 %5189, %v2065_v20  }
 0x743   : > { %v7785_v11 = vpop.xlane.xlu0 %3002 }
 0x744   : > { %v7782_v55 = vpop.permute.xlu1 %2450 }
 0x746   : > { %3627 = vperm.xlu0 %5189, %v3505_v16  }
 0x748   : > { %v3603_v24 = vpop.permute.xlu1 %3602 }
 0x749   : > { %v4008_v7 = vmul.f32 %v3603_v24, %v6876_v38  ;;  %v4009_v9 = vmul.f32 %v3603_v24, %v6870_v35  ;;  %v1183_v38 = vpop.f32.mrf.mxu0  ;;  %v3170_v24 = vmul.f32 0.0051020407, %v7462_v43  ;;  %v2066_v43 = vmul.f32 0.0051020407, %v7718_v30 }
 0x74b   : > { %v4596_v29 = vadd.f32 %v6610_v21, %v4008_v7  ;;  %v4597_v8 = vadd.f32 %v6610_v21, %v4009_v9  ;;  %v7791_v26 = vpop.permute.xlu0 %2455  ;;  %v7804_v21 = vsub.f32 %v1179_v57, %v7507_v61  ;;  %v1185_v20 = vpop.f32.mrf.mxu0 }
 0x74c   : > { %v7810_v56 = vsub.f32 %v1185_v20, %v7534_v33 }
 0x74d   : > { %4764 = vst [vmem:[%s7631_s9 + $0x40] sm:$0xff] %v4596_v29  ;;  %4765 = vst.msk [vmem:[%s7631_s9 + $0x48] sm:$0xff] %vm1386_vm0, %v4597_v8  ;;  %v3338_v29 = vadd.f32 0.001, %v3170_v24  ;;  %v3171_v8 = vmul.f32 0.0051020407, %v7488_v23  ;;  %v1189_v24 = vpop.f32.mrf.mxu0 }
 0x74e   : > { %9403 = vst [vmem:[#allocation189_spill] sm:$0xff] %v7804_v21  ;;  %9404 = vst [vmem:[#allocation190_spill] sm:$0xff] %v7810_v56  ;;  %v2757_v16 = vmul.f32 %v7810_v56, %v7810_v56  ;;  %v5372_v23 = vld [vmem:[%s6012_s28 + $0x58] sm:$0xff] }
 0x74f   : > { %v3608_v59 = vpop.permute.xlu0 %3607  ;;  %5213 = vrsqrt.f32 %v3338_v29  ;;  %v3339_v57 = vadd.f32 0.001, %v3171_v8 }
 0x750   : > { %v4010_v18 = vmul.f32 %v3608_v59, %v6900_v40  ;;  %v4011_v32 = vmul.f32 %v3608_v59, %v6898_v10  ;;  %v2755_v10 = vmul.f32 %v7804_v21, %v7804_v21  ;;  %v7815_v40 = vsub.f32 %v1183_v38, %v7534_v33 }
 0x751   : > { %v3024_v9 = vsel %vm1386_vm0, %v2757_v16, 0.0  ;;  %5215 = vrsqrt.f32 %v3339_v57  ;;  %v2067_v38 = vmul.f32 0.0051020407, %v7721_v48 }
 0x752   : > { %v4598_v2 = vadd.f32 %v6605_v17, %v4010_v18  ;;  %v4599_v35 = vadd.f32 %v6605_v17, %v4011_v32  ;;  %9405 = vst [vmem:[#allocation191_spill] sm:$0xff] %v7815_v40  ;;  %v2754_v17 = vmul.f32 %v7807_v27, %v7807_v27  ;;  %v3020_v61 = vsel %vm1386_vm0, %v2755_v10, 0.0  ;;  %v5371_v18 = vld [vmem:[%s6012_s28 + $0x50] sm:$0xff] }
 0x753   : > { %v2756_v7 = vmul.f32 %v7815_v40, %v7815_v40  ;;  %v9435_v40 = vld [vmem:[#allocation4_spill] sm:$0xff] }
 0x754   : > { %4766 = vst [vmem:[%s7631_s9 + $0x50] sm:$0xff] %v4598_v2  ;;  %4767 = vst.msk [vmem:[%s7631_s9 + $0x58] sm:$0xff] %vm1386_vm0, %v4599_v35  ;;  %v3021_v42 = vadd.f32 %v3020_v61, %v2754_v17 }
 0x755   : > { %v3025_v33 = vadd.f32 %v3024_v9, %v2756_v7 }
 0x75c   : > { %v5214_v59 = vpop.eup %5213 }
 0x75d   : > { %v3506_v32 = vmul.f32 %v5371_v18, %v5214_v59  ;;  %v7857_v59 = vsub.f32 %v1189_v24, %v7516_v6 }
 0x75e   : > { %v5216_v35 = vpop.eup %5215 }
 0x75f   : > { %v3507_v10 = vmul.f32 %v5372_v23, %v5216_v35  ;;  %9407 = vst [vmem:[#allocation193_spill] sm:$0xff] %v7857_v59 }
 0x762   : > { %3022 = vadd.xlane.f32.xlu1 %v3021_v42  ;;  %v1191_v42 = vpop.f32.mrf.mxu0 }
 0x765   : > { %3026 = vadd.xlane.f32.xlu0 %v3025_v33 }
 0x773   : > { %2480 = vperm.xlu1 %5190, %v2066_v43  }
 0x777   : > { %3632 = vperm.xlu1 %5190, %v3506_v32  }
 0x779   : > { %v7830_v2 = vpop.xlane.xlu1 %3006 }
 0x77b   : > { %2485 = vperm.xlu0 %5189, %v2067_v38   ;;  %v2758_v38 = vmul.f32 %v7857_v59, %v7857_v59 }
 0x77c   : > { %v7835_v17 = vpop.xlane.xlu0 %3010 }
 0x77d   : > { %v7832_v20 = vpop.permute.xlu1 %2460 }
 0x77f   : > { %3637 = vperm.xlu0 %5189, %v3507_v10  }
 0x781   : > { %v3613_v30 = vpop.permute.xlu1 %3612 }
 0x782   : > { %v4012_v16 = vmul.f32 %v3613_v30, %v6908_v46  ;;  %v4013_v48 = vmul.f32 %v3613_v30, %v6902_v22  ;;  %v1195_v46 = vpop.f32.mrf.mxu0 }
 0x784   : > { %v4600_v61 = vadd.f32 %v6621_v25, %v4012_v16  ;;  %v4601_v7 = vadd.f32 %v6621_v25, %v4013_v48  ;;  %v7841_v9 = vpop.permute.xlu0 %2465  ;;  %v7854_v25 = vsub.f32 %v1191_v42, %v7516_v6  ;;  %v1197_v43 = vpop.f32.mrf.mxu0  ;;  %v5373_v42 = vld [vmem:[%s6012_s28 + $0x60] sm:$0xff] }
 0x785   : > { %v7860_v18 = vsub.f32 %v1197_v43, %v7542_v36 }
 0x786   : > { %4768 = vst [vmem:[%s7631_s9 + $0x60] sm:$0xff] %v4600_v61  ;;  %4769 = vst.msk [vmem:[%s7631_s9 + $0x68] sm:$0xff] %vm1386_vm0, %v4601_v7  ;;  %v2759_v32 = vmul.f32 %v7854_v25, %v7854_v25  ;;  %v1201_v43 = vpop.f32.mrf.mxu0 }
 0x787   : > { %9406 = vst [vmem:[#allocation192_spill] sm:$0xff] %v7854_v25  ;;  %9408 = vst [vmem:[#allocation194_spill] sm:$0xff] %v7860_v18  ;;  %v2761_v35 = vmul.f32 %v7860_v18, %v7860_v18 }
 0x788   : > { %v3618_v29 = vpop.permute.xlu0 %3617  ;;  %v3028_v23 = vsel %vm1386_vm0, %v2759_v32, 0.0  ;;  %v9412_v32 = vld [vmem:[#allocation77_spill] sm:$0xff] }
 0x789   : > { %v4014_v33 = vmul.f32 %v3618_v29, %v6932_v39  ;;  %v4015_v8 = vmul.f32 %v3618_v29, %v6930_v54  ;;  %v9409_v39 = vld [vmem:[#allocation139_spill] sm:$0xff]  ;;  %v3032_v30 = vsel %vm1386_vm0, %v2761_v35, 0.0  ;;  %v3029_v16 = vadd.f32 %v3028_v23, %v2758_v38  ;;  %v9413_v35 = vld [vmem:[#allocation76_spill] sm:$0xff]  ;;  %v1203_v23 = vpop.f32.mrf.mxu0 }
 0x78a   : > { %v3172_v54 = vmul.f32 0.0051020407, %v9409_v39 }
 0x78b   : > { %v4602_v57 = vadd.f32 %v6614_v14, %v4014_v33  ;;  %v4603_v22 = vadd.f32 %v6614_v14, %v4015_v8  ;;  %v7866_v14 = vsub.f32 %v1195_v46, %v7542_v36  ;;  %v9411_v36 = vld [vmem:[#allocation145_spill] sm:$0xff]  ;;  %v5374_v46 = vld [vmem:[%s6012_s28 + $0x68] sm:$0xff] }
 0x78c   : > { %v3340_v6 = vadd.f32 0.001, %v3172_v54  ;;  %v3173_v48 = vmul.f32 0.0051020407, %v9411_v36 }
 0x78d   : > { %4770 = vst [vmem:[%s7631_s9 + $0x70] sm:$0xff] %v4602_v57  ;;  %4771 = vst.msk [vmem:[%s7631_s9 + $0x78] sm:$0xff] %vm1386_vm0, %v4603_v22  ;;  %v2760_v10 = vmul.f32 %v7866_v14, %v7866_v14 }
 0x78e   : > { %9410 = vst [vmem:[#allocation139_spill] sm:$0xff] %v7866_v14  ;;  %5217 = vrsqrt.f32 %v3340_v6  ;;  %v3341_v61 = vadd.f32 0.001, %v3173_v48  ;;  %v1207_v48 = vpop.f32.mrf.mxu0  ;;  %v9434_v14 = vld [vmem:[#allocation144_spill] sm:$0xff] }
 0x78f   : > { %v3033_v24 = vadd.f32 %v3032_v30, %v2760_v10  ;;  %v9414_v10 = vld [vmem:[#allocation3_spill] sm:$0xff] }
 0x790   : > { %5219 = vrsqrt.f32 %v3341_v61  ;;  %v9415_v61 = vld [vmem:[#allocation79_spill] sm:$0xff] }
 0x79b   : > { %3030 = vadd.xlane.f32.xlu1 %v3029_v16  ;;  %v5218_v7 = vpop.eup %5217 }
 0x79c   : > { %v3508_v29 = vmul.f32 %v5373_v42, %v5218_v7  ;;  %v9416_v42 = vld [vmem:[#allocation78_spill] sm:$0xff] }
 0x79d   : > { %v5220_v33 = vpop.eup %5219 }
 0x79e   : > { %3034 = vadd.xlane.f32.xlu0 %v3033_v24  ;;  %v3509_v57 = vmul.f32 %v5374_v46, %v5220_v33  ;;  %v9417_v33 = vld [vmem:[#allocation149_spill] sm:$0xff] }
 0x79f   : > { %v7897_v46 = vsub.f32 %v1203_v23, %v9417_v33 }
 0x7a1   : > { %9418 = vst [vmem:[#allocation145_spill] sm:$0xff] %v7897_v46  ;;  %v2763_v23 = vmul.f32 %v7897_v46, %v7897_v46 }
 0x7ac   : > { %3642 = vperm.xlu1 %5190, %v3508_v29  }
 0x7b2   : > { %v7878_v8 = vpop.xlane.xlu1 %3014 }
 0x7b4   : > { %3647 = vperm.xlu0 %5189, %v3509_v57   ;;  %v1209_v57 = vpop.f32.mrf.mxu0 }
 0x7b5   : > { %v7883_v39 = vpop.xlane.xlu0 %3018 }
 0x7b6   : > { %v7881_v22 = vpop.permute.xlu1 %2470 }
 0x7ba   : > { %v3623_v54 = vpop.permute.xlu1 %3622 }
 0x7bb   : > { %v4016_v38 = vmul.f32 %v3623_v54, %v9412_v32  ;;  %v4017_v6 = vmul.f32 %v3623_v54, %v9413_v35  ;;  %v9419_v54 = vld [vmem:[#allocation2_spill] sm:$0xff]  ;;  %v7902_v35 = vsub.f32 %v1201_v43, %v9417_v33 }
 0x7bd   : > { %v4604_v30 = vadd.f32 %v9414_v10, %v4016_v38  ;;  %v4605_v16 = vadd.f32 %v9414_v10, %v4017_v6  ;;  %v7889_v36 = vpop.permute.xlu0 %2475  ;;  %9420 = vst [vmem:[#allocation77_spill] sm:$0xff] %v7902_v35  ;;  %v7905_v6 = vsub.f32 %v1209_v57, %v7570_v15  ;;  %v9422_v10 = vld [vmem:[#allocation142_spill] sm:$0xff] }
 0x7bf   : > { %4772 = vst [vmem:[%s7631_s9 + $0x80] sm:$0xff] %v4604_v30  ;;  %4773 = vst.msk [vmem:[%s7631_s9 + $0x88] sm:$0xff] %vm1386_vm0, %v4605_v16  ;;  %v3174_v30 = vmul.f32 0.0051020407, %v9422_v10  ;;  %v7914_v16 = vsub.f32 %v1207_v48, %v7570_v15  ;;  %v2765_v43 = vmul.f32 %v7905_v6, %v7905_v6  ;;  %v9424_v15 = vld [vmem:[#allocation147_spill] sm:$0xff] }
 0x7c0   : > { %9421 = vst [vmem:[#allocation76_spill] sm:$0xff] %v7905_v6  ;;  %v3175_v48 = vmul.f32 0.0051020407, %v9424_v15  ;;  %v9425_v15 = vld [vmem:[#allocation81_spill] sm:$0xff] }
 0x7c1   : > { %v3628_v24 = vpop.permute.xlu0 %3627  ;;  %9423 = vst [vmem:[#allocation3_spill] sm:$0xff] %v7914_v16 }
 0x7c2   : > { %v4018_v7 = vmul.f32 %v3628_v24, %v9415_v61  ;;  %v4019_v29 = vmul.f32 %v3628_v24, %v9416_v42  ;;  %v2762_v24 = vmul.f32 %v7902_v35, %v7902_v35  ;;  %v3342_v61 = vadd.f32 0.001, %v3174_v30 }
 0x7c3   : > { %v2764_v42 = vmul.f32 %v7914_v16, %v7914_v16 }
 0x7c4   : > { %v4606_v32 = vadd.f32 %v9419_v54, %v4018_v7  ;;  %v4607_v38 = vadd.f32 %v9419_v54, %v4019_v29  ;;  %v3036_v7 = vsel %vm1386_vm0, %v2763_v23, 0.0  ;;  %v3040_v29 = vsel %vm1386_vm0, %v2765_v43, 0.0  ;;  %v5376_v23 = vld [vmem:[%s6012_s28 + $0x78] sm:$0xff] }
 0x7c5   : > { %v3037_v33 = vadd.f32 %v3036_v7, %v2762_v24  ;;  %5221 = vrsqrt.f32 %v3342_v61  ;;  %v3041_v57 = vadd.f32 %v3040_v29, %v2764_v42  ;;  %v3343_v54 = vadd.f32 0.001, %v3175_v48  ;;  %v1213_v24 = vpop.f32.mrf.mxu0 }
 0x7c6   : > { %4774 = vst [vmem:[%s7631_s9 + $0x90] sm:$0xff] %v4606_v32  ;;  %4775 = vst.msk [vmem:[%s7631_s9 + $0x98] sm:$0xff] %vm1386_vm0, %v4607_v38  ;;  %v5375_v38 = vld [vmem:[%s6012_s28 + $0x70] sm:$0xff] }
 0x7c7   : > { %5223 = vrsqrt.f32 %v3343_v54  ;;  %v1215_v7 = vpop.f32.mrf.mxu0 }
 0x7d0   : > { %3038 = vadd.xlane.f32.xlu1 %v3037_v33  ;;  %v1219_v33 = vpop.f32.mrf.mxu0 }
 0x7d1   : > { %v7959_v3 = vsub.f32 %v1219_v33, %v7584_v52 }
 0x7d2   : > { %v5222_v32 = vpop.eup %5221  ;;  %v1221_v16 = vpop.f32.mrf.mxu0 }
 0x7d3   : > { %3042 = vadd.xlane.f32.xlu0 %v3041_v57  ;;  %v3510_v10 = vmul.f32 %v5375_v38, %v5222_v32  ;;  %v9426_v57 = vld [vmem:[#allocation80_spill] sm:$0xff]  ;;  %v9427_v32 = vld [vmem:[#allocation5_spill] sm:$0xff]  ;;  %9436 = vst [vmem:[#allocation2_spill] sm:$0xff] %v7959_v3 }
 0x7d4   : > { %v5224_v30 = vpop.eup %5223 }
 0x7d5   : > { %v3511_v6 = vmul.f32 %v5376_v23, %v5224_v30  ;;  %v9428_v30 = vld [vmem:[#allocation152_spill] sm:$0xff] }
 0x7d6   : > { %v7940_v23 = vsub.f32 %v1215_v7, %v9428_v30  ;;  %v3176_v7 = vmul.f32 0.0051020407, %v9434_v14 }
 0x7d8   : > { %9429 = vst [vmem:[#allocation79_spill] sm:$0xff] %v7940_v23  ;;  %v2767_v56 = vmul.f32 %v7940_v23, %v7940_v23  ;;  %v9448_v23 = vld [vmem:[#allocation6_spill] sm:$0xff] }
 0x7da   : > { %v3044_v14 = vsel %vm1386_vm0, %v2767_v56, 0.0 }
 0x7e1   : > { %3652 = vperm.xlu1 %5190, %v3510_v10  }
 0x7e9   : > { %3657 = vperm.xlu0 %5189, %v3511_v6  }
 0x7eb   : > { %v7927_v43 = vpop.xlane.xlu1 %3022 }
 0x7ee   : > { %v7931_v42 = vpop.xlane.xlu0 %3026 }
 0x7ef   : > { %v7929_v61 = vpop.permute.xlu1 %2480 }
 0x7f3   : > { %v3633_v29 = vpop.permute.xlu1 %3632 }
 0x7f4   : > { %v4020_v48 = vmul.f32 %v3633_v29, %v9425_v15  ;;  %v4021_v54 = vmul.f32 %v3633_v29, %v9426_v57  ;;  %v7946_v15 = vsub.f32 %v1213_v24, %v9428_v30  ;;  %v7949_v29 = vsub.f32 %v1221_v16, %v7584_v52  ;;  %v9437_v30 = vld [vmem:[#allocation150_spill] sm:$0xff] }
 0x7f6   : > { %v4608_v38 = vadd.f32 %v9427_v32, %v4020_v48  ;;  %v4609_v10 = vadd.f32 %v9427_v32, %v4021_v54  ;;  %v7937_v6 = vpop.permute.xlu0 %2485  ;;  %9430 = vst [vmem:[#allocation78_spill] sm:$0xff] %v7946_v15  ;;  %9431 = vst [vmem:[#allocation149_spill] sm:$0xff] %v7949_v29  ;;  %v9432_v48 = vld [vmem:[#allocation83_spill] sm:$0xff]  ;;  %v9433_v54 = vld [vmem:[#allocation82_spill] sm:$0xff]  ;;  %v2766_v16 = vmul.f32 %v7946_v15, %v7946_v15 }
 0x7f7   : > { %v2769_v24 = vmul.f32 %v7949_v29, %v7949_v29 }
 0x7f8   : > { %4776 = vst [vmem:[%s7631_s9 + $0xa0] sm:$0xff] %v4608_v38  ;;  %4777 = vst.msk [vmem:[%s7631_s9 + $0xa8] sm:$0xff] %vm1386_vm0, %v4609_v10  ;;  %v3045_v33 = vadd.f32 %v3044_v14, %v2766_v16 }
 0x7f9   : > { %v3048_v52 = vsel %vm1386_vm0, %v2769_v24, 0.0  ;;  %v1225_v24 = vpop.f32.mrf.mxu0 }
 0x7fa   : > { %v3638_v18 = vpop.permute.xlu0 %3637 }
 0x7fb   : > { %v4022_v57 = vmul.f32 %v3638_v18, %v9432_v48  ;;  %v4023_v32 = vmul.f32 %v3638_v18, %v9433_v54  ;;  %v3344_v18 = vadd.f32 0.001, %v3176_v7  ;;  %v3177_v48 = vmul.f32 0.0051020407, %v9437_v30  ;;  %v9439_v30 = vld [vmem:[#allocation84_spill] sm:$0xff] }
 0x7fd   : > { %v4610_v38 = vadd.f32 %v9435_v40, %v4022_v57  ;;  %v4611_v10 = vadd.f32 %v9435_v40, %v4023_v32  ;;  %v2768_v40 = vmul.f32 %v7959_v3, %v7959_v3  ;;  %5225 = vrsqrt.f32 %v3344_v18  ;;  %v1227_v18 = vpop.f32.mrf.mxu0 }
 0x7fe   : > { %v3345_v54 = vadd.f32 0.001, %v3177_v48 }
 0x7ff   : > { %4778 = vst [vmem:[%s7631_s9 + $0xb0] sm:$0xff] %v4610_v38  ;;  %4779 = vst.msk [vmem:[%s7631_s9 + $0xb8] sm:$0xff] %vm1386_vm0, %v4611_v10  ;;  %v3049_v57 = vadd.f32 %v3048_v52, %v2768_v40  ;;  %v5377_v38 = vld [vmem:[%s6012_s28 + $0x80] sm:$0xff]  ;;  %v5378_v10 = vld [vmem:[%s6012_s28 + $0x88] sm:$0xff] }
 0x800   : > { %5227 = vrsqrt.f32 %v3345_v54  ;;  %v9438_v40 = vld [vmem:[#allocation85_spill] sm:$0xff]  ;;  %v9440_v54 = vld [vmem:[#allocation7_spill] sm:$0xff] }
 0x805   : > { %3046 = vadd.xlane.f32.xlu1 %v3045_v33  ;;  %v1231_v33 = vpop.f32.mrf.mxu0 }
 0x806   : > { %v8003_v15 = vsub.f32 %v1231_v33, %v7597_v4 }
 0x808   : > { %3050 = vadd.xlane.f32.xlu0 %v3049_v57  ;;  %9449 = vst [vmem:[#allocation80_spill] sm:$0xff] %v8003_v15 }
 0x80a   : > { %v5226_v32 = vpop.eup %5225 }
 0x80b   : > { %v3512_v7 = vmul.f32 %v5377_v38, %v5226_v32 }
 0x80d   : > { %v5228_v56 = vpop.eup %5227 }
 0x80e   : > { %v3513_v29 = vmul.f32 %v5378_v10, %v5228_v56 }
 0x816   : > { %3662 = vperm.xlu1 %5190, %v3512_v7   ;;  %v9441_v7 = vld [vmem:[#allocation155_spill] sm:$0xff] }
 0x817   : > { %v7984_v3 = vsub.f32 %v1227_v18, %v9441_v7  ;;  %v7990_v10 = vsub.f32 %v1225_v24, %v9441_v7 }
 0x819   : > { %9442 = vst [vmem:[#allocation142_spill] sm:$0xff] %v7984_v3  ;;  %9443 = vst [vmem:[#allocation147_spill] sm:$0xff] %v7990_v10  ;;  %v2771_v34 = vmul.f32 %v7984_v3, %v7984_v3  ;;  %v2770_v24 = vmul.f32 %v7990_v10, %v7990_v10  ;;  %v9461_v10 = vld [vmem:[#allocation8_spill] sm:$0xff] }
 0x81e   : > { %3667 = vperm.xlu0 %5189, %v3513_v29   ;;  %v1233_v29 = vpop.f32.mrf.mxu0 }
 0x824   : > { %v7975_v16 = vpop.xlane.xlu1 %3030 }
 0x827   : > { %v7979_v57 = vpop.xlane.xlu0 %3034 }
 0x828   : > { %v3643_v14 = vpop.permute.xlu1 %3642 }
 0x829   : > { %v4024_v52 = vmul.f32 %v3643_v14, %v9438_v40  ;;  %v4025_v48 = vmul.f32 %v3643_v14, %v9439_v30  ;;  %v7993_v14 = vsub.f32 %v1233_v29, %v7597_v4  ;;  %v9445_v40 = vld [vmem:[#allocation87_spill] sm:$0xff]  ;;  %v9446_v30 = vld [vmem:[#allocation86_spill] sm:$0xff] }
 0x82b   : > { %v4612_v32 = vadd.f32 %v9440_v54, %v4024_v52  ;;  %v4613_v38 = vadd.f32 %v9440_v54, %v4025_v48  ;;  %9444 = vst [vmem:[#allocation81_spill] sm:$0xff] %v7993_v14  ;;  %v9447_v54 = vld [vmem:[#allocation146_spill] sm:$0xff]  ;;  %v2773_v7 = vmul.f32 %v7993_v14, %v7993_v14 }
 0x82c   : > { %v3178_v18 = vmul.f32 0.0051020407, %v9447_v54 }
 0x82d   : > { %4780 = vst [vmem:[%s7631_s9 + $0xc0] sm:$0xff] %v4612_v32  ;;  %4781 = vst.msk [vmem:[%s7631_s9 + $0xc8] sm:$0xff] %vm1386_vm0, %v4613_v38  ;;  %v3056_v4 = vsel %vm1386_vm0, %v2773_v7, 0.0  ;;  %v1237_v7 = vpop.f32.mrf.mxu0 }
 0x82e   : > { %v3346_v29 = vadd.f32 0.001, %v3178_v18 }
 0x82f   : > { %v3648_v56 = vpop.permute.xlu0 %3647 }
 0x830   : > { %v4026_v52 = vmul.f32 %v3648_v56, %v9445_v40  ;;  %v4027_v48 = vmul.f32 %v3648_v56, %v9446_v30  ;;  %v3052_v56 = vsel %vm1386_vm0, %v2771_v34, 0.0  ;;  %5229 = vrsqrt.f32 %v3346_v29  ;;  %v9450_v40 = vld [vmem:[#allocation154_spill] sm:$0xff]  ;;  %v1239_v29 = vpop.f32.mrf.mxu0 }
 0x831   : > { %v3053_v33 = vadd.f32 %v3052_v56, %v2770_v24 }
 0x832   : > { %v4614_v32 = vadd.f32 %v9448_v23, %v4026_v52  ;;  %v4615_v38 = vadd.f32 %v9448_v23, %v4027_v48  ;;  %v2772_v23 = vmul.f32 %v8003_v15, %v8003_v15  ;;  %v3179_v52 = vmul.f32 0.0051020407, %v9450_v40  ;;  %v9452_v40 = vld [vmem:[#allocation88_spill] sm:$0xff] }
 0x834   : > { %4782 = vst [vmem:[%s7631_s9 + $0xd0] sm:$0xff] %v4614_v32  ;;  %4783 = vst.msk [vmem:[%s7631_s9 + $0xd8] sm:$0xff] %vm1386_vm0, %v4615_v38  ;;  %v3057_v30 = vadd.f32 %v3056_v4, %v2772_v23  ;;  %v3347_v48 = vadd.f32 0.001, %v3179_v52  ;;  %v5379_v32 = vld [vmem:[%s6012_s28 + $0x90] sm:$0xff]  ;;  %v5380_v38 = vld [vmem:[%s6012_s28 + $0x98] sm:$0xff] }
 0x835   : > { %v9451_v23 = vld [vmem:[#allocation89_spill] sm:$0xff] }
 0x836   : > { %5231 = vrsqrt.f32 %v3347_v48  ;;  %v9453_v48 = vld [vmem:[#allocation9_spill] sm:$0xff] }
 0x83a   : > { %3054 = vadd.xlane.f32.xlu1 %v3053_v33  ;;  %v1243_v33 = vpop.f32.mrf.mxu0 }
 0x83b   : > { %v8047_v46 = vsub.f32 %v1243_v33, %v7607_v58 }
 0x83d   : > { %3058 = vadd.xlane.f32.xlu0 %v3057_v30  ;;  %v5230_v54 = vpop.eup %5229  ;;  %9462 = vst [vmem:[#allocation82_spill] sm:$0xff] %v8047_v46 }
 0x83e   : > { %v3514_v18 = vmul.f32 %v5379_v32, %v5230_v54 }
 0x843   : > { %v5232_v34 = vpop.eup %5231 }
 0x844   : > { %v3515_v14 = vmul.f32 %v5380_v38, %v5232_v34 }
 0x84b   : > { %3672 = vperm.xlu1 %5190, %v3514_v18   ;;  %v9454_v18 = vld [vmem:[#allocation161_spill] sm:$0xff] }
 0x84c   : > { %v8028_v15 = vsub.f32 %v1239_v29, %v9454_v18  ;;  %v8034_v38 = vsub.f32 %v1237_v7, %v9454_v18 }
 0x84e   : > { %9455 = vst [vmem:[#allocation5_spill] sm:$0xff] %v8028_v15  ;;  %9456 = vst [vmem:[#allocation152_spill] sm:$0xff] %v8034_v38  ;;  %v2775_v3 = vmul.f32 %v8028_v15, %v8028_v15  ;;  %v2774_v7 = vmul.f32 %v8034_v38, %v8034_v38  ;;  %v9474_v38 = vld [vmem:[#allocation10_spill] sm:$0xff] }
 0x853   : > { %3677 = vperm.xlu0 %5189, %v3515_v14   ;;  %v1245_v14 = vpop.f32.mrf.mxu0 }
 0x859   : > { %v8019_v24 = vpop.xlane.xlu1 %3038 }
 0x85c   : > { %v8023_v30 = vpop.xlane.xlu0 %3042 }
 0x85d   : > { %v3653_v56 = vpop.permute.xlu1 %3652 }
 0x85e   : > { %v4028_v4 = vmul.f32 %v3653_v56, %v9451_v23  ;;  %v4029_v52 = vmul.f32 %v3653_v56, %v9452_v40  ;;  %v8037_v56 = vsub.f32 %v1245_v14, %v7607_v58  ;;  %v9458_v23 = vld [vmem:[#allocation91_spill] sm:$0xff]  ;;  %v9459_v40 = vld [vmem:[#allocation90_spill] sm:$0xff] }
 0x860   : > { %v4616_v54 = vadd.f32 %v9453_v48, %v4028_v4  ;;  %v4617_v32 = vadd.f32 %v9453_v48, %v4029_v52  ;;  %9457 = vst [vmem:[#allocation83_spill] sm:$0xff] %v8037_v56  ;;  %v9460_v48 = vld [vmem:[#allocation148_spill] sm:$0xff]  ;;  %v2777_v18 = vmul.f32 %v8037_v56, %v8037_v56 }
 0x861   : > { %v3180_v29 = vmul.f32 0.0051020407, %v9460_v48 }
 0x862   : > { %4784 = vst [vmem:[%s7631_s9 + $0xe0] sm:$0xff] %v4616_v54  ;;  %4785 = vst.msk [vmem:[%s7631_s9 + $0xe8] sm:$0xff] %vm1386_vm0, %v4617_v32  ;;  %v3064_v58 = vsel %vm1386_vm0, %v2777_v18, 0.0  ;;  %v1249_v18 = vpop.f32.mrf.mxu0 }
 0x863   : > { %v3348_v14 = vadd.f32 0.001, %v3180_v29 }
 0x864   : > { %v3658_v34 = vpop.permute.xlu0 %3657 }
 0x865   : > { %v4030_v4 = vmul.f32 %v3658_v34, %v9458_v23  ;;  %v4031_v52 = vmul.f32 %v3658_v34, %v9459_v40  ;;  %v3060_v34 = vsel %vm1386_vm0, %v2775_v3, 0.0  ;;  %5233 = vrsqrt.f32 %v3348_v14  ;;  %v9463_v23 = vld [vmem:[#allocation158_spill] sm:$0xff]  ;;  %v1251_v14 = vpop.f32.mrf.mxu0 }
 0x866   : > { %v3061_v33 = vadd.f32 %v3060_v34, %v2774_v7 }
 0x867   : > { %v4618_v54 = vadd.f32 %v9461_v10, %v4030_v4  ;;  %v4619_v32 = vadd.f32 %v9461_v10, %v4031_v52  ;;  %v2776_v10 = vmul.f32 %v8047_v46, %v8047_v46  ;;  %v3181_v4 = vmul.f32 0.0051020407, %v9463_v23  ;;  %v9465_v23 = vld [vmem:[#allocation92_spill] sm:$0xff] }
 0x869   : > { %4786 = vst [vmem:[%s7631_s9 + $0xf0] sm:$0xff] %v4618_v54  ;;  %4787 = vst.msk [vmem:[%s7631_s9 + $0xf8] sm:$0xff] %vm1386_vm0, %v4619_v32  ;;  %v3065_v40 = vadd.f32 %v3064_v58, %v2776_v10  ;;  %v3349_v52 = vadd.f32 0.001, %v3181_v4  ;;  %v5381_v54 = vld [vmem:[%s6012_s28 + $0xa0] sm:$0xff]  ;;  %v5382_v32 = vld [vmem:[%s6012_s28 + $0xa8] sm:$0xff] }
 0x86a   : > { %v9464_v10 = vld [vmem:[#allocation93_spill] sm:$0xff] }
 0x86b   : > { %5235 = vrsqrt.f32 %v3349_v52  ;;  %v9466_v52 = vld [vmem:[#allocation11_spill] sm:$0xff] }
 0x86f   : > { %3062 = vadd.xlane.f32.xlu1 %v3061_v33  ;;  %v1255_v33 = vpop.f32.mrf.mxu0 }
 0x870   : > { %v8091_v35 = vsub.f32 %v1255_v33, %v7618_v12 }
 0x872   : > { %3066 = vadd.xlane.f32.xlu0 %v3065_v40  ;;  %v5234_v48 = vpop.eup %5233  ;;  %9475 = vst [vmem:[#allocation85_spill] sm:$0xff] %v8091_v35 }
 0x873   : > { %v3516_v29 = vmul.f32 %v5381_v54, %v5234_v48 }
 0x878   : > { %v5236_v3 = vpop.eup %5235 }
 0x879   : > { %v3517_v56 = vmul.f32 %v5382_v32, %v5236_v3 }
 0x880   : > { %3682 = vperm.xlu1 %5190, %v3516_v29   ;;  %v9467_v29 = vld [vmem:[#allocation164_spill] sm:$0xff] }
 0x881   : > { %v8072_v46 = vsub.f32 %v1251_v14, %v9467_v29  ;;  %v8078_v32 = vsub.f32 %v1249_v18, %v9467_v29 }
 0x883   : > { %9468 = vst [vmem:[#allocation144_spill] sm:$0xff] %v8072_v46  ;;  %9469 = vst [vmem:[#allocation4_spill] sm:$0xff] %v8078_v32  ;;  %v2779_v15 = vmul.f32 %v8072_v46, %v8072_v46  ;;  %v2778_v18 = vmul.f32 %v8078_v32, %v8078_v32  ;;  %v9487_v32 = vld [vmem:[#allocation12_spill] sm:$0xff] }
 0x888   : > { %3687 = vperm.xlu0 %5189, %v3517_v56   ;;  %v1257_v56 = vpop.f32.mrf.mxu0 }
 0x88e   : > { %v8063_v7 = vpop.xlane.xlu1 %3046 }
 0x891   : > { %v8067_v40 = vpop.xlane.xlu0 %3050 }
 0x892   : > { %v3663_v34 = vpop.permute.xlu1 %3662 }
 0x893   : > { %v4032_v58 = vmul.f32 %v3663_v34, %v9464_v10  ;;  %v4033_v4 = vmul.f32 %v3663_v34, %v9465_v23  ;;  %v8081_v34 = vsub.f32 %v1257_v56, %v7618_v12  ;;  %v9471_v10 = vld [vmem:[#allocation95_spill] sm:$0xff]  ;;  %v9472_v23 = vld [vmem:[#allocation94_spill] sm:$0xff] }
 0x895   : > { %v4620_v48 = vadd.f32 %v9466_v52, %v4032_v58  ;;  %v4621_v54 = vadd.f32 %v9466_v52, %v4033_v4  ;;  %9470 = vst [vmem:[#allocation150_spill] sm:$0xff] %v8081_v34  ;;  %v9473_v52 = vld [vmem:[#allocation151_spill] sm:$0xff]  ;;  %v2781_v29 = vmul.f32 %v8081_v34, %v8081_v34 }
 0x896   : > { %v3182_v14 = vmul.f32 0.0051020407, %v9473_v52 }
 0x897   : > { %4788 = vst [vmem:[%s7631_s9 + $0x100] sm:$0xff] %v4620_v48  ;;  %4789 = vst.msk [vmem:[%s7631_s9 + $0x108] sm:$0xff] %vm1386_vm0, %v4621_v54  ;;  %v3072_v12 = vsel %vm1386_vm0, %v2781_v29, 0.0  ;;  %v1261_v29 = vpop.f32.mrf.mxu0 }
 0x898   : > { %v3350_v56 = vadd.f32 0.001, %v3182_v14 }
 0x899   : > { %v3668_v3 = vpop.permute.xlu0 %3667 }
 0x89a   : > { %v4034_v58 = vmul.f32 %v3668_v3, %v9471_v10  ;;  %v4035_v4 = vmul.f32 %v3668_v3, %v9472_v23  ;;  %v3068_v3 = vsel %vm1386_vm0, %v2779_v15, 0.0  ;;  %5237 = vrsqrt.f32 %v3350_v56  ;;  %v9476_v10 = vld [vmem:[#allocation165_spill] sm:$0xff]  ;;  %v1263_v56 = vpop.f32.mrf.mxu0 }
 0x89b   : > { %v3069_v33 = vadd.f32 %v3068_v3, %v2778_v18 }
 0x89c   : > { %v4622_v48 = vadd.f32 %v9474_v38, %v4034_v58  ;;  %v4623_v54 = vadd.f32 %v9474_v38, %v4035_v4  ;;  %v2780_v38 = vmul.f32 %v8091_v35, %v8091_v35  ;;  %v3183_v58 = vmul.f32 0.0051020407, %v9476_v10  ;;  %v9478_v10 = vld [vmem:[#allocation96_spill] sm:$0xff] }
 0x89e   : > { %4790 = vst [vmem:[%s7631_s9 + $0x110] sm:$0xff] %v4622_v48  ;;  %4791 = vst.msk [vmem:[%s7631_s9 + $0x118] sm:$0xff] %vm1386_vm0, %v4623_v54  ;;  %v3073_v23 = vadd.f32 %v3072_v12, %v2780_v38  ;;  %v3351_v4 = vadd.f32 0.001, %v3183_v58  ;;  %v5383_v48 = vld [vmem:[%s6012_s28 + $0xb0] sm:$0xff]  ;;  %v5384_v54 = vld [vmem:[%s6012_s28 + $0xb8] sm:$0xff] }
 0x89f   : > { %v9477_v38 = vld [vmem:[#allocation97_spill] sm:$0xff] }
 0x8a0   : > { %5239 = vrsqrt.f32 %v3351_v4  ;;  %v9479_v4 = vld [vmem:[#allocation13_spill] sm:$0xff] }
 0x8a4   : > { %3070 = vadd.xlane.f32.xlu1 %v3069_v33  ;;  %v1267_v33 = vpop.f32.mrf.mxu0 }
 0x8a5   : > { %v8135_v25 = vsub.f32 %v1267_v33, %v7638_v53 }
 0x8a7   : > { %3074 = vadd.xlane.f32.xlu0 %v3073_v23  ;;  %v5238_v52 = vpop.eup %5237  ;;  %9488 = vst [vmem:[#allocation87_spill] sm:$0xff] %v8135_v25 }
 0x8a8   : > { %v3518_v14 = vmul.f32 %v5383_v48, %v5238_v52 }
 0x8ad   : > { %v5240_v15 = vpop.eup %5239 }
 0x8ae   : > { %v3519_v34 = vmul.f32 %v5384_v54, %v5240_v15 }
 0x8b5   : > { %3692 = vperm.xlu1 %5190, %v3518_v14   ;;  %v9480_v14 = vld [vmem:[#allocation167_spill] sm:$0xff] }
 0x8b6   : > { %v8116_v35 = vsub.f32 %v1263_v56, %v9480_v14  ;;  %v8122_v54 = vsub.f32 %v1261_v29, %v9480_v14 }
 0x8b8   : > { %9481 = vst [vmem:[#allocation84_spill] sm:$0xff] %v8116_v35  ;;  %9482 = vst [vmem:[#allocation7_spill] sm:$0xff] %v8122_v54  ;;  %v2783_v46 = vmul.f32 %v8116_v35, %v8116_v35  ;;  %v2782_v29 = vmul.f32 %v8122_v54, %v8122_v54  ;;  %v9500_v54 = vld [vmem:[#allocation14_spill] sm:$0xff] }
 0x8bd   : > { %3697 = vperm.xlu0 %5189, %v3519_v34   ;;  %v1269_v34 = vpop.f32.mrf.mxu0 }
 0x8c3   : > { %v8107_v18 = vpop.xlane.xlu1 %3054 }
 0x8c6   : > { %v8111_v23 = vpop.xlane.xlu0 %3058 }
 0x8c7   : > { %v3673_v3 = vpop.permute.xlu1 %3672 }
 0x8c8   : > { %v4036_v12 = vmul.f32 %v3673_v3, %v9477_v38  ;;  %v4037_v58 = vmul.f32 %v3673_v3, %v9478_v10  ;;  %v8125_v3 = vsub.f32 %v1269_v34, %v7638_v53  ;;  %v9484_v38 = vld [vmem:[#allocation99_spill] sm:$0xff]  ;;  %v9485_v10 = vld [vmem:[#allocation98_spill] sm:$0xff] }
 0x8ca   : > { %v4624_v52 = vadd.f32 %v9479_v4, %v4036_v12  ;;  %v4625_v48 = vadd.f32 %v9479_v4, %v4037_v58  ;;  %9483 = vst [vmem:[#allocation155_spill] sm:$0xff] %v8125_v3  ;;  %v9486_v4 = vld [vmem:[#allocation153_spill] sm:$0xff]  ;;  %v2785_v14 = vmul.f32 %v8125_v3, %v8125_v3 }
 0x8cb   : > { %v3184_v56 = vmul.f32 0.0051020407, %v9486_v4 }
 0x8cc   : > { %4792 = vst [vmem:[%s7631_s9 + $0x120] sm:$0xff] %v4624_v52  ;;  %4793 = vst.msk [vmem:[%s7631_s9 + $0x128] sm:$0xff] %vm1386_vm0, %v4625_v48  ;;  %v3080_v53 = vsel %vm1386_vm0, %v2785_v14, 0.0  ;;  %v1273_v14 = vpop.f32.mrf.mxu0 }
 0x8cd   : > { %v3352_v34 = vadd.f32 0.001, %v3184_v56 }
 0x8ce   : > { %v3678_v15 = vpop.permute.xlu0 %3677 }
 0x8cf   : > { %v4038_v12 = vmul.f32 %v3678_v15, %v9484_v38  ;;  %v4039_v58 = vmul.f32 %v3678_v15, %v9485_v10  ;;  %v3076_v15 = vsel %vm1386_vm0, %v2783_v46, 0.0  ;;  %5241 = vrsqrt.f32 %v3352_v34  ;;  %v9489_v38 = vld [vmem:[#allocation168_spill] sm:$0xff]  ;;  %v1275_v34 = vpop.f32.mrf.mxu0 }
 0x8d0   : > { %v3077_v33 = vadd.f32 %v3076_v15, %v2782_v29 }
 0x8d1   : > { %v4626_v52 = vadd.f32 %v9487_v32, %v4038_v12  ;;  %v4627_v48 = vadd.f32 %v9487_v32, %v4039_v58  ;;  %v2784_v32 = vmul.f32 %v8135_v25, %v8135_v25  ;;  %v3185_v12 = vmul.f32 0.0051020407, %v9489_v38  ;;  %v9491_v38 = vld [vmem:[#allocation100_spill] sm:$0xff] }
 0x8d3   : > { %4794 = vst [vmem:[%s7631_s9 + $0x130] sm:$0xff] %v4626_v52  ;;  %4795 = vst.msk [vmem:[%s7631_s9 + $0x138] sm:$0xff] %vm1386_vm0, %v4627_v48  ;;  %v3081_v10 = vadd.f32 %v3080_v53, %v2784_v32  ;;  %v3353_v58 = vadd.f32 0.001, %v3185_v12  ;;  %v5385_v52 = vld [vmem:[%s6012_s28 + $0xc0] sm:$0xff]  ;;  %v5386_v48 = vld [vmem:[%s6012_s28 + $0xc8] sm:$0xff] }
 0x8d4   : > { %v9490_v32 = vld [vmem:[#allocation101_spill] sm:$0xff] }
 0x8d5   : > { %5243 = vrsqrt.f32 %v3353_v58  ;;  %v9492_v58 = vld [vmem:[#allocation15_spill] sm:$0xff] }
 0x8d9   : > { %3078 = vadd.xlane.f32.xlu1 %v3077_v33  ;;  %v1279_v33 = vpop.f32.mrf.mxu0 }
 0x8da   : > { %v8179_v59 = vsub.f32 %v1279_v33, %v7667_v44 }
 0x8dc   : > { %3082 = vadd.xlane.f32.xlu0 %v3081_v10  ;;  %v5242_v4 = vpop.eup %5241  ;;  %9501 = vst [vmem:[#allocation154_spill] sm:$0xff] %v8179_v59 }
 0x8dd   : > { %v3520_v56 = vmul.f32 %v5385_v52, %v5242_v4 }
 0x8e2   : > { %v5244_v46 = vpop.eup %5243 }
 0x8e3   : > { %v3521_v3 = vmul.f32 %v5386_v48, %v5244_v46 }
 0x8ea   : > { %3702 = vperm.xlu1 %5190, %v3520_v56   ;;  %v9493_v56 = vld [vmem:[#allocation170_spill] sm:$0xff] }
 0x8eb   : > { %v8160_v25 = vsub.f32 %v1275_v34, %v9493_v56  ;;  %v8166_v48 = vsub.f32 %v1273_v14, %v9493_v56 }
 0x8ed   : > { %9494 = vst [vmem:[#allocation86_spill] sm:$0xff] %v8160_v25  ;;  %9495 = vst [vmem:[#allocation146_spill] sm:$0xff] %v8166_v48  ;;  %v2787_v35 = vmul.f32 %v8160_v25, %v8160_v25  ;;  %v2786_v14 = vmul.f32 %v8166_v48, %v8166_v48  ;;  %v9513_v48 = vld [vmem:[#allocation16_spill] sm:$0xff] }
 0x8f2   : > { %3707 = vperm.xlu0 %5189, %v3521_v3   ;;  %v1281_v3 = vpop.f32.mrf.mxu0 }
 0x8f8   : > { %v8151_v29 = vpop.xlane.xlu1 %3062 }
 0x8fb   : > { %v8155_v10 = vpop.xlane.xlu0 %3066 }
 0x8fc   : > { %v3683_v15 = vpop.permute.xlu1 %3682 }
 0x8fd   : > { %v4040_v53 = vmul.f32 %v3683_v15, %v9490_v32  ;;  %v4041_v12 = vmul.f32 %v3683_v15, %v9491_v38  ;;  %v8169_v15 = vsub.f32 %v1281_v3, %v7667_v44  ;;  %v9497_v32 = vld [vmem:[#allocation103_spill] sm:$0xff]  ;;  %v9498_v38 = vld [vmem:[#allocation102_spill] sm:$0xff] }
 0x8ff   : > { %v4628_v4 = vadd.f32 %v9492_v58, %v4040_v53  ;;  %v4629_v52 = vadd.f32 %v9492_v58, %v4041_v12  ;;  %9496 = vst [vmem:[#allocation6_spill] sm:$0xff] %v8169_v15  ;;  %v9499_v58 = vld [vmem:[#allocation156_spill] sm:$0xff]  ;;  %v2789_v56 = vmul.f32 %v8169_v15, %v8169_v15 }
 0x900   : > { %v3186_v34 = vmul.f32 0.0051020407, %v9499_v58 }
 0x901   : > { %4796 = vst [vmem:[%s7631_s9 + $0x140] sm:$0xff] %v4628_v4  ;;  %4797 = vst.msk [vmem:[%s7631_s9 + $0x148] sm:$0xff] %vm1386_vm0, %v4629_v52  ;;  %v3088_v44 = vsel %vm1386_vm0, %v2789_v56, 0.0  ;;  %v1285_v56 = vpop.f32.mrf.mxu0 }
 0x902   : > { %v3354_v3 = vadd.f32 0.001, %v3186_v34 }
 0x903   : > { %v3688_v46 = vpop.permute.xlu0 %3687 }
 0x904   : > { %v4042_v53 = vmul.f32 %v3688_v46, %v9497_v32  ;;  %v4043_v12 = vmul.f32 %v3688_v46, %v9498_v38  ;;  %v3084_v46 = vsel %vm1386_vm0, %v2787_v35, 0.0  ;;  %5245 = vrsqrt.f32 %v3354_v3  ;;  %v9502_v32 = vld [vmem:[#allocation172_spill] sm:$0xff]  ;;  %v1287_v3 = vpop.f32.mrf.mxu0 }
 0x905   : > { %v3085_v33 = vadd.f32 %v3084_v46, %v2786_v14 }
 0x906   : > { %v4630_v4 = vadd.f32 %v9500_v54, %v4042_v53  ;;  %v4631_v52 = vadd.f32 %v9500_v54, %v4043_v12  ;;  %v2788_v54 = vmul.f32 %v8179_v59, %v8179_v59  ;;  %v3187_v53 = vmul.f32 0.0051020407, %v9502_v32  ;;  %v9504_v32 = vld [vmem:[#allocation104_spill] sm:$0xff] }
 0x908   : > { %4798 = vst [vmem:[%s7631_s9 + $0x150] sm:$0xff] %v4630_v4  ;;  %4799 = vst.msk [vmem:[%s7631_s9 + $0x158] sm:$0xff] %vm1386_vm0, %v4631_v52  ;;  %v3089_v38 = vadd.f32 %v3088_v44, %v2788_v54  ;;  %v3355_v12 = vadd.f32 0.001, %v3187_v53  ;;  %v5387_v4 = vld [vmem:[%s6012_s28 + $0xd0] sm:$0xff]  ;;  %v5388_v52 = vld [vmem:[%s6012_s28 + $0xd8] sm:$0xff] }
 0x909   : > { %v9503_v54 = vld [vmem:[#allocation105_spill] sm:$0xff] }
 0x90a   : > { %5247 = vrsqrt.f32 %v3355_v12  ;;  %v9505_v12 = vld [vmem:[#allocation17_spill] sm:$0xff] }
 0x90e   : > { %3086 = vadd.xlane.f32.xlu1 %v3085_v33  ;;  %v1291_v33 = vpop.f32.mrf.mxu0 }
 0x90f   : > { %v8223_v21 = vsub.f32 %v1291_v33, %v7674_v49 }
 0x911   : > { %3090 = vadd.xlane.f32.xlu0 %v3089_v38  ;;  %v5246_v58 = vpop.eup %5245  ;;  %9514 = vst [vmem:[#allocation161_spill] sm:$0xff] %v8223_v21 }
 0x912   : > { %v3522_v34 = vmul.f32 %v5387_v4, %v5246_v58 }
 0x917   : > { %v5248_v35 = vpop.eup %5247 }
 0x918   : > { %v3523_v15 = vmul.f32 %v5388_v52, %v5248_v35 }
 0x91f   : > { %3712 = vperm.xlu1 %5190, %v3522_v34   ;;  %v9506_v34 = vld [vmem:[#allocation173_spill] sm:$0xff] }
 0x920   : > { %v8204_v59 = vsub.f32 %v1287_v3, %v9506_v34  ;;  %v8210_v52 = vsub.f32 %v1285_v56, %v9506_v34 }
 0x922   : > { %9507 = vst [vmem:[#allocation89_spill] sm:$0xff] %v8204_v59  ;;  %9508 = vst [vmem:[#allocation88_spill] sm:$0xff] %v8210_v52  ;;  %v2791_v25 = vmul.f32 %v8204_v59, %v8204_v59  ;;  %v2790_v56 = vmul.f32 %v8210_v52, %v8210_v52 }
 0x927   : > { %3717 = vperm.xlu0 %5189, %v3523_v15   ;;  %v1293_v15 = vpop.f32.mrf.mxu0 }
 0x92d   : > { %v8195_v14 = vpop.xlane.xlu1 %3070 }
 0x930   : > { %v8199_v38 = vpop.xlane.xlu0 %3074 }
 0x931   : > { %v3693_v46 = vpop.permute.xlu1 %3692 }
 0x932   : > { %v4044_v44 = vmul.f32 %v3693_v46, %v9503_v54  ;;  %v4045_v53 = vmul.f32 %v3693_v46, %v9504_v32  ;;  %v8213_v46 = vsub.f32 %v1293_v15, %v7674_v49  ;;  %v9510_v54 = vld [vmem:[#allocation107_spill] sm:$0xff]  ;;  %v9511_v32 = vld [vmem:[#allocation106_spill] sm:$0xff] }
 0x934   : > { %v4632_v58 = vadd.f32 %v9505_v12, %v4044_v44  ;;  %v4633_v4 = vadd.f32 %v9505_v12, %v4045_v53  ;;  %9509 = vst [vmem:[#allocation9_spill] sm:$0xff] %v8213_v46  ;;  %v9512_v12 = vld [vmem:[#allocation163_spill] sm:$0xff]  ;;  %v2793_v34 = vmul.f32 %v8213_v46, %v8213_v46 }
 0x935   : > { %v3188_v3 = vmul.f32 0.0051020407, %v9512_v12  ;;  %v5389_v12 = vld [vmem:[%s6012_s28 + $0xe0] sm:$0xff] }
 0x936   : > { %4800 = vst [vmem:[%s7631_s9 + $0x160] sm:$0xff] %v4632_v58  ;;  %4801 = vst.msk [vmem:[%s7631_s9 + $0x168] sm:$0xff] %vm1386_vm0, %v4633_v4  ;;  %v3096_v49 = vsel %vm1386_vm0, %v2793_v34, 0.0  ;;  %v1297_v34 = vpop.f32.mrf.mxu0 }
 0x937   : > { %v3356_v15 = vadd.f32 0.001, %v3188_v3 }
 0x938   : > { %v3698_v35 = vpop.permute.xlu0 %3697 }
 0x939   : > { %v4046_v44 = vmul.f32 %v3698_v35, %v9510_v54  ;;  %v4047_v53 = vmul.f32 %v3698_v35, %v9511_v32  ;;  %v3092_v35 = vsel %vm1386_vm0, %v2791_v25, 0.0  ;;  %5249 = vrsqrt.f32 %v3356_v15  ;;  %v1299_v15 = vpop.f32.mrf.mxu0 }
 0x93a   : > { %v3093_v33 = vadd.f32 %v3092_v35, %v2790_v56  ;;  %v3189_v54 = vmul.f32 0.0051020407, %v7612_v63 }
 0x93b   : > { %v4634_v58 = vadd.f32 %v9513_v48, %v4046_v44  ;;  %v4635_v4 = vadd.f32 %v9513_v48, %v4047_v53  ;;  %v2792_v48 = vmul.f32 %v8223_v21, %v8223_v21  ;;  %v1303_v35 = vpop.f32.mrf.mxu0  ;;  %v9524_v21 = vld [vmem:[#allocation18_spill] sm:$0xff] }
 0x93c   : > { %v3357_v32 = vadd.f32 0.001, %v3189_v54  ;;  %v8267_v59 = vsub.f32 %v1303_v35, %v7679_v60 }
 0x93d   : > { %4802 = vst [vmem:[%s7631_s9 + $0x170] sm:$0xff] %v4634_v58  ;;  %4803 = vst.msk [vmem:[%s7631_s9 + $0x178] sm:$0xff] %vm1386_vm0, %v4635_v4  ;;  %v3097_v44 = vadd.f32 %v3096_v49, %v2792_v48  ;;  %v5390_v58 = vld [vmem:[%s6012_s28 + $0xe8] sm:$0xff]  ;;  %v9515_v48 = vld [vmem:[#allocation109_spill] sm:$0xff] }
 0x93e   : > { %5251 = vrsqrt.f32 %v3357_v32  ;;  %v9517_v32 = vld [vmem:[#allocation19_spill] sm:$0xff]  ;;  %9525 = vst [vmem:[#allocation8_spill] sm:$0xff] %v8267_v59 }
 0x943   : > { %3094 = vadd.xlane.f32.xlu1 %v3093_v33  ;;  %v9516_v33 = vld [vmem:[#allocation108_spill] sm:$0xff] }
 0x946   : > { %3098 = vadd.xlane.f32.xlu0 %v3097_v44  ;;  %v5250_v53 = vpop.eup %5249 }
 0x947   : > { %v3524_v3 = vmul.f32 %v5389_v12, %v5250_v53 }
 0x94b   : > { %v5252_v25 = vpop.eup %5251 }
 0x94c   : > { %v3525_v4 = vmul.f32 %v5390_v58, %v5252_v25  ;;  %v1305_v25 = vpop.f32.mrf.mxu0 }
 0x954   : > { %3722 = vperm.xlu1 %5190, %v3524_v3   ;;  %v8248_v3 = vsub.f32 %v1299_v15, %v7614_v13 }
 0x956   : > { %9518 = vst [vmem:[#allocation91_spill] sm:$0xff] %v8248_v3  ;;  %v2795_v46 = vmul.f32 %v8248_v3, %v8248_v3 }
 0x95c   : > { %3727 = vperm.xlu0 %5189, %v3525_v4   ;;  %v8254_v4 = vsub.f32 %v1297_v34, %v7614_v13 }
 0x95e   : > { %9519 = vst [vmem:[#allocation90_spill] sm:$0xff] %v8254_v4  ;;  %v2794_v13 = vmul.f32 %v8254_v4, %v8254_v4  ;;  %v9537_v4 = vld [vmem:[#allocation20_spill] sm:$0xff] }
 0x962   : > { %v8239_v56 = vpop.xlane.xlu1 %3078 }
 0x965   : > { %v8243_v44 = vpop.xlane.xlu0 %3082 }
 0x966   : > { %v3703_v63 = vpop.permute.xlu1 %3702 }
 0x967   : > { %v4048_v49 = vmul.f32 %v3703_v63, %v9515_v48  ;;  %v4049_v54 = vmul.f32 %v3703_v63, %v9516_v33  ;;  %v8257_v63 = vsub.f32 %v1305_v25, %v7679_v60  ;;  %v9521_v48 = vld [vmem:[#allocation111_spill] sm:$0xff]  ;;  %v9522_v33 = vld [vmem:[#allocation110_spill] sm:$0xff] }
 0x969   : > { %v4636_v53 = vadd.f32 %v9517_v32, %v4048_v49  ;;  %v4637_v12 = vadd.f32 %v9517_v32, %v4049_v54  ;;  %9520 = vst [vmem:[#allocation148_spill] sm:$0xff] %v8257_v63  ;;  %v9523_v32 = vld [vmem:[#allocation166_spill] sm:$0xff]  ;;  %v2797_v34 = vmul.f32 %v8257_v63, %v8257_v63 }
 0x96a   : > { %v3190_v15 = vmul.f32 0.0051020407, %v9523_v32 }
 0x96b   : > { %4804 = vst [vmem:[%s7631_s9 + $0x180] sm:$0xff] %v4636_v53  ;;  %4805 = vst.msk [vmem:[%s7631_s9 + $0x188] sm:$0xff] %vm1386_vm0, %v4637_v12  ;;  %v3104_v60 = vsel %vm1386_vm0, %v2797_v34, 0.0  ;;  %v1309_v34 = vpop.f32.mrf.mxu0 }
 0x96c   : > { %v3358_v25 = vadd.f32 0.001, %v3190_v15 }
 0x96d   : > { %v3708_v58 = vpop.permute.xlu0 %3707 }
 0x96e   : > { %v4050_v49 = vmul.f32 %v3708_v58, %v9521_v48  ;;  %v4051_v54 = vmul.f32 %v3708_v58, %v9522_v33  ;;  %v3100_v58 = vsel %vm1386_vm0, %v2795_v46, 0.0  ;;  %5253 = vrsqrt.f32 %v3358_v25  ;;  %v9526_v48 = vld [vmem:[#allocation177_spill] sm:$0xff]  ;;  %v1311_v25 = vpop.f32.mrf.mxu0 }
 0x96f   : > { %v3101_v35 = vadd.f32 %v3100_v58, %v2794_v13 }
 0x970   : > { %v4638_v53 = vadd.f32 %v9524_v21, %v4050_v49  ;;  %v4639_v12 = vadd.f32 %v9524_v21, %v4051_v54  ;;  %v2796_v21 = vmul.f32 %v8267_v59, %v8267_v59  ;;  %v3191_v49 = vmul.f32 0.0051020407, %v9526_v48  ;;  %v9528_v48 = vld [vmem:[#allocation112_spill] sm:$0xff] }
 0x972   : > { %4806 = vst [vmem:[%s7631_s9 + $0x190] sm:$0xff] %v4638_v53  ;;  %4807 = vst.msk [vmem:[%s7631_s9 + $0x198] sm:$0xff] %vm1386_vm0, %v4639_v12  ;;  %v3105_v33 = vadd.f32 %v3104_v60, %v2796_v21  ;;  %v3359_v54 = vadd.f32 0.001, %v3191_v49  ;;  %v5391_v53 = vld [vmem:[%s6012_s28 + $0xf0] sm:$0xff]  ;;  %v5392_v12 = vld [vmem:[%s6012_s28 + $0xf8] sm:$0xff] }
 0x973   : > { %v9527_v21 = vld [vmem:[#allocation113_spill] sm:$0xff] }
 0x974   : > { %5255 = vrsqrt.f32 %v3359_v54  ;;  %v9529_v54 = vld [vmem:[#allocation21_spill] sm:$0xff] }
 0x978   : > { %3102 = vadd.xlane.f32.xlu1 %v3101_v35  ;;  %v1315_v35 = vpop.f32.mrf.mxu0 }
 0x979   : > { %v8311_v52 = vsub.f32 %v1315_v35, %v7685_v37 }
 0x97b   : > { %3106 = vadd.xlane.f32.xlu0 %v3105_v33  ;;  %v5254_v32 = vpop.eup %5253  ;;  %9538 = vst [vmem:[#allocation11_spill] sm:$0xff] %v8311_v52 }
 0x97c   : > { %v3526_v15 = vmul.f32 %v5391_v53, %v5254_v32 }
 0x981   : > { %v5256_v46 = vpop.eup %5255 }
 0x982   : > { %v3527_v63 = vmul.f32 %v5392_v12, %v5256_v46 }
 0x989   : > { %3732 = vperm.xlu1 %5190, %v3526_v15   ;;  %v9530_v15 = vld [vmem:[#allocation176_spill] sm:$0xff] }
 0x98a   : > { %v8292_v59 = vsub.f32 %v1311_v25, %v9530_v15  ;;  %v8298_v12 = vsub.f32 %v1309_v34, %v9530_v15 }
 0x98c   : > { %9531 = vst [vmem:[#allocation158_spill] sm:$0xff] %v8292_v59  ;;  %9532 = vst [vmem:[#allocation93_spill] sm:$0xff] %v8298_v12  ;;  %v2799_v3 = vmul.f32 %v8292_v59, %v8292_v59  ;;  %v2798_v34 = vmul.f32 %v8298_v12, %v8298_v12  ;;  %v9548_v59 = vld [vmem:[#allocation22_spill] sm:$0xff] }
 0x991   : > { %3737 = vperm.xlu0 %5189, %v3527_v63   ;;  %v1317_v63 = vpop.f32.mrf.mxu0 }
 0x997   : > { %v8283_v13 = vpop.xlane.xlu1 %3086 }
 0x99a   : > { %v8287_v33 = vpop.xlane.xlu0 %3090 }
 0x99b   : > { %v3713_v58 = vpop.permute.xlu1 %3712 }
 0x99c   : > { %v4052_v60 = vmul.f32 %v3713_v58, %v9527_v21  ;;  %v4053_v49 = vmul.f32 %v3713_v58, %v9528_v48  ;;  %v8301_v58 = vsub.f32 %v1317_v63, %v7685_v37  ;;  %v9534_v21 = vld [vmem:[#allocation115_spill] sm:$0xff]  ;;  %v9535_v48 = vld [vmem:[#allocation114_spill] sm:$0xff] }
 0x99e   : > { %v4640_v32 = vadd.f32 %v9529_v54, %v4052_v60  ;;  %v4641_v53 = vadd.f32 %v9529_v54, %v4053_v49  ;;  %9533 = vst [vmem:[#allocation92_spill] sm:$0xff] %v8301_v58  ;;  %v9536_v54 = vld [vmem:[#allocation169_spill] sm:$0xff]  ;;  %v2801_v15 = vmul.f32 %v8301_v58, %v8301_v58 }
 0x99f   : > { %v3192_v25 = vmul.f32 0.0051020407, %v9536_v54 }
 0x9a0   : > { %4808 = vst [vmem:[%s7631_s9 + $0x1a0] sm:$0xff] %v4640_v32  ;;  %4809 = vst.msk [vmem:[%s7631_s9 + $0x1a8] sm:$0xff] %vm1386_vm0, %v4641_v53  ;;  %v3112_v37 = vsel %vm1386_vm0, %v2801_v15, 0.0  ;;  %v1321_v15 = vpop.f32.mrf.mxu0 }
 0x9a1   : > { %v3360_v63 = vadd.f32 0.001, %v3192_v25 }
 0x9a2   : > { %v3718_v46 = vpop.permute.xlu0 %3717 }
 0x9a3   : > { %v4054_v60 = vmul.f32 %v3718_v46, %v9534_v21  ;;  %v4055_v49 = vmul.f32 %v3718_v46, %v9535_v48  ;;  %v3108_v46 = vsel %vm1386_vm0, %v2799_v3, 0.0  ;;  %5257 = vrsqrt.f32 %v3360_v63  ;;  %v9539_v21 = vld [vmem:[#allocation182_spill] sm:$0xff]  ;;  %v1323_v63 = vpop.f32.mrf.mxu0 }
 0x9a4   : > { %v3109_v35 = vadd.f32 %v3108_v46, %v2798_v34 }
 0x9a5   : > { %v4642_v32 = vadd.f32 %v9537_v4, %v4054_v60  ;;  %v4643_v53 = vadd.f32 %v9537_v4, %v4055_v49  ;;  %v2800_v4 = vmul.f32 %v8311_v52, %v8311_v52  ;;  %v3193_v60 = vmul.f32 0.0051020407, %v9539_v21  ;;  %v9541_v21 = vld [vmem:[#allocation116_spill] sm:$0xff] }
 0x9a7   : > { %4810 = vst [vmem:[%s7631_s9 + $0x1b0] sm:$0xff] %v4642_v32  ;;  %4811 = vst.msk [vmem:[%s7631_s9 + $0x1b8] sm:$0xff] %vm1386_vm0, %v4643_v53  ;;  %v3113_v48 = vadd.f32 %v3112_v37, %v2800_v4  ;;  %v3361_v49 = vadd.f32 0.001, %v3193_v60  ;;  %v5393_v32 = vld [vmem:[%s6012_s28 + $0x100] sm:$0xff]  ;;  %v5394_v53 = vld [vmem:[%s6012_s28 + $0x108] sm:$0xff] }
 0x9a8   : > { %v9540_v4 = vld [vmem:[#allocation117_spill] sm:$0xff] }
 0x9a9   : > { %5259 = vrsqrt.f32 %v3361_v49  ;;  %v9542_v49 = vld [vmem:[#allocation23_spill] sm:$0xff] }
 0x9ad   : > { %3110 = vadd.xlane.f32.xlu1 %v3109_v35  ;;  %v1327_v35 = vpop.f32.mrf.mxu0 }
 0x9ae   : > { %v8355_v12 = vsub.f32 %v1327_v35, %v7732_v50 }
 0x9b0   : > { %3114 = vadd.xlane.f32.xlu0 %v3113_v48  ;;  %v5258_v54 = vpop.eup %5257  ;;  %9549 = vst [vmem:[#allocation94_spill] sm:$0xff] %v8355_v12 }
 0x9b1   : > { %v3528_v25 = vmul.f32 %v5393_v32, %v5258_v54 }
 0x9b6   : > { %v5260_v3 = vpop.eup %5259 }
 0x9b7   : > { %v3529_v58 = vmul.f32 %v5394_v53, %v5260_v3  ;;  %v8342_v53 = vsub.f32 %v1321_v15, %v7730_v31 }
 0x9be   : > { %3742 = vperm.xlu1 %5190, %v3528_v25   ;;  %v8336_v25 = vsub.f32 %v1323_v63, %v7730_v31  ;;  %v2802_v31 = vmul.f32 %v8342_v53, %v8342_v53 }
 0x9c0   : > { %9543 = vst [vmem:[#allocation164_spill] sm:$0xff] %v8336_v25  ;;  %v2803_v52 = vmul.f32 %v8336_v25, %v8336_v25 }
 0x9c6   : > { %3747 = vperm.xlu0 %5189, %v3529_v58   ;;  %v1329_v58 = vpop.f32.mrf.mxu0 }
 0x9cc   : > { %v8327_v34 = vpop.xlane.xlu1 %3094 }
 0x9cf   : > { %v8331_v48 = vpop.xlane.xlu0 %3098 }
 0x9d0   : > { %v3723_v46 = vpop.permute.xlu1 %3722 }
 0x9d1   : > { %v4056_v37 = vmul.f32 %v3723_v46, %v9540_v4  ;;  %v4057_v60 = vmul.f32 %v3723_v46, %v9541_v21  ;;  %v8345_v46 = vsub.f32 %v1329_v58, %v7732_v50  ;;  %v9545_v4 = vld [vmem:[#allocation119_spill] sm:$0xff]  ;;  %v9546_v21 = vld [vmem:[#allocation118_spill] sm:$0xff] }
 0x9d3   : > { %v4644_v54 = vadd.f32 %v9542_v49, %v4056_v37  ;;  %v4645_v32 = vadd.f32 %v9542_v49, %v4057_v60  ;;  %9544 = vst [vmem:[#allocation95_spill] sm:$0xff] %v8345_v46  ;;  %v9547_v49 = vld [vmem:[#allocation171_spill] sm:$0xff]  ;;  %v2805_v15 = vmul.f32 %v8345_v46, %v8345_v46 }
 0x9d4   : > { %v3194_v63 = vmul.f32 0.0051020407, %v9547_v49  ;;  %v5395_v49 = vld [vmem:[%s6012_s28 + $0x110] sm:$0xff] }
 0x9d5   : > { %4812 = vst [vmem:[%s7631_s9 + $0x1c0] sm:$0xff] %v4644_v54  ;;  %4813 = vst.msk [vmem:[%s7631_s9 + $0x1c8] sm:$0xff] %vm1386_vm0, %v4645_v32  ;;  %v3120_v50 = vsel %vm1386_vm0, %v2805_v15, 0.0  ;;  %v1333_v15 = vpop.f32.mrf.mxu0 }
 0x9d6   : > { %v3362_v58 = vadd.f32 0.001, %v3194_v63 }
 0x9d7   : > { %v3728_v3 = vpop.permute.xlu0 %3727 }
 0x9d8   : > { %v4058_v37 = vmul.f32 %v3728_v3, %v9545_v4  ;;  %v4059_v60 = vmul.f32 %v3728_v3, %v9546_v21  ;;  %v3116_v3 = vsel %vm1386_vm0, %v2803_v52, 0.0  ;;  %5261 = vrsqrt.f32 %v3362_v58  ;;  %v1335_v58 = vpop.f32.mrf.mxu0 }
 0x9d9   : > { %v3117_v35 = vadd.f32 %v3116_v3, %v2802_v31  ;;  %v3195_v4 = vmul.f32 0.0051020407, %v7670_v28 }
 0x9da   : > { %v4646_v54 = vadd.f32 %v9548_v59, %v4058_v37  ;;  %v4647_v32 = vadd.f32 %v9548_v59, %v4059_v60  ;;  %v2804_v59 = vmul.f32 %v8355_v12, %v8355_v12  ;;  %v1339_v3 = vpop.f32.mrf.mxu0  ;;  %v9559_v12 = vld [vmem:[#allocation24_spill] sm:$0xff] }
 0x9db   : > { %v3363_v21 = vadd.f32 0.001, %v3195_v4  ;;  %v8399_v25 = vsub.f32 %v1339_v3, %v7782_v55 }
 0x9dc   : > { %4814 = vst [vmem:[%s7631_s9 + $0x1d0] sm:$0xff] %v4646_v54  ;;  %4815 = vst.msk [vmem:[%s7631_s9 + $0x1d8] sm:$0xff] %vm1386_vm0, %v4647_v32  ;;  %v3121_v37 = vadd.f32 %v3120_v50, %v2804_v59  ;;  %v5396_v54 = vld [vmem:[%s6012_s28 + $0x118] sm:$0xff] }
 0x9dd   : > { %5263 = vrsqrt.f32 %v3363_v21  ;;  %v9550_v59 = vld [vmem:[#allocation121_spill] sm:$0xff]  ;;  %9560 = vst [vmem:[#allocation97_spill] sm:$0xff] %v8399_v25 }
 0x9de   : > { %v9552_v21 = vld [vmem:[#allocation25_spill] sm:$0xff] }
 0x9e2   : > { %3118 = vadd.xlane.f32.xlu1 %v3117_v35  ;;  %v9551_v35 = vld [vmem:[#allocation120_spill] sm:$0xff] }
 0x9e5   : > { %3122 = vadd.xlane.f32.xlu0 %v3121_v37  ;;  %v5262_v60 = vpop.eup %5261 }
 0x9e6   : > { %v3530_v63 = vmul.f32 %v5395_v49, %v5262_v60 }
 0x9ea   : > { %v5264_v52 = vpop.eup %5263 }
 0x9eb   : > { %v3531_v32 = vmul.f32 %v5396_v54, %v5264_v52  ;;  %v1341_v52 = vpop.f32.mrf.mxu0 }
 0x9f3   : > { %3752 = vperm.xlu1 %5190, %v3530_v63   ;;  %v8380_v63 = vsub.f32 %v1335_v58, %v7741_v19 }
 0x9f5   : > { %9553 = vst [vmem:[#allocation151_spill] sm:$0xff] %v8380_v63  ;;  %v2807_v46 = vmul.f32 %v8380_v63, %v8380_v63  ;;  %v9570_v63 = vld [vmem:[#allocation26_spill] sm:$0xff] }
 0x9fb   : > { %3757 = vperm.xlu0 %5189, %v3531_v32   ;;  %v8386_v32 = vsub.f32 %v1333_v15, %v7741_v19 }
 0x9fd   : > { %9554 = vst [vmem:[#allocation10_spill] sm:$0xff] %v8386_v32  ;;  %v2806_v19 = vmul.f32 %v8386_v32, %v8386_v32 }
 0xa01   : > { %v8371_v31 = vpop.xlane.xlu1 %3102 }
 0xa04   : > { %v8375_v37 = vpop.xlane.xlu0 %3106 }
 0xa05   : > { %v3733_v28 = vpop.permute.xlu1 %3732 }
 0xa06   : > { %v4060_v50 = vmul.f32 %v3733_v28, %v9550_v59  ;;  %v4061_v4 = vmul.f32 %v3733_v28, %v9551_v35  ;;  %v8389_v28 = vsub.f32 %v1341_v52, %v7782_v55  ;;  %v9556_v59 = vld [vmem:[#allocation123_spill] sm:$0xff]  ;;  %v9557_v35 = vld [vmem:[#allocation122_spill] sm:$0xff] }
 0xa08   : > { %v4648_v60 = vadd.f32 %v9552_v21, %v4060_v50  ;;  %v4649_v49 = vadd.f32 %v9552_v21, %v4061_v4  ;;  %9555 = vst [vmem:[#allocation165_spill] sm:$0xff] %v8389_v28  ;;  %v9558_v21 = vld [vmem:[#allocation174_spill] sm:$0xff]  ;;  %v2809_v15 = vmul.f32 %v8389_v28, %v8389_v28 }
 0xa09   : > { %v3196_v58 = vmul.f32 0.0051020407, %v9558_v21 }
 0xa0a   : > { %4816 = vst [vmem:[%s7631_s9 + $0x1e0] sm:$0xff] %v4648_v60  ;;  %4817 = vst.msk [vmem:[%s7631_s9 + $0x1e8] sm:$0xff] %vm1386_vm0, %v4649_v49  ;;  %v3128_v55 = vsel %vm1386_vm0, %v2809_v15, 0.0  ;;  %v1345_v15 = vpop.f32.mrf.mxu0 }
 0xa0b   : > { %v3364_v52 = vadd.f32 0.001, %v3196_v58 }
 0xa0c   : > { %v3738_v54 = vpop.permute.xlu0 %3737 }
 0xa0d   : > { %v4062_v50 = vmul.f32 %v3738_v54, %v9556_v59  ;;  %v4063_v4 = vmul.f32 %v3738_v54, %v9557_v35  ;;  %v3124_v54 = vsel %vm1386_vm0, %v2807_v46, 0.0  ;;  %5265 = vrsqrt.f32 %v3364_v52  ;;  %v9561_v59 = vld [vmem:[#allocation183_spill] sm:$0xff]  ;;  %v1347_v52 = vpop.f32.mrf.mxu0 }
 0xa0e   : > { %v3125_v3 = vadd.f32 %v3124_v54, %v2806_v19 }
 0xa0f   : > { %v4650_v60 = vadd.f32 %v9559_v12, %v4062_v50  ;;  %v4651_v49 = vadd.f32 %v9559_v12, %v4063_v4  ;;  %v2808_v12 = vmul.f32 %v8399_v25, %v8399_v25  ;;  %v3197_v50 = vmul.f32 0.0051020407, %v9561_v59  ;;  %v9563_v59 = vld [vmem:[#allocation124_spill] sm:$0xff] }
 0xa11   : > { %4818 = vst [vmem:[%s7631_s9 + $0x1f0] sm:$0xff] %v4650_v60  ;;  %4819 = vst.msk [vmem:[%s7631_s9 + $0x1f8] sm:$0xff] %vm1386_vm0, %v4651_v49  ;;  %v3129_v35 = vadd.f32 %v3128_v55, %v2808_v12  ;;  %v3365_v4 = vadd.f32 0.001, %v3197_v50  ;;  %v5397_v60 = vld [vmem:[%s6012_s28 + $0x120] sm:$0xff]  ;;  %v5398_v49 = vld [vmem:[%s6012_s28 + $0x128] sm:$0xff] }
 0xa12   : > { %v9562_v12 = vld [vmem:[#allocation125_spill] sm:$0xff] }
 0xa13   : > { %5267 = vrsqrt.f32 %v3365_v4  ;;  %v9564_v4 = vld [vmem:[#allocation27_spill] sm:$0xff] }
 0xa17   : > { %3126 = vadd.xlane.f32.xlu1 %v3125_v3  ;;  %v1351_v3 = vpop.f32.mrf.mxu0 }
 0xa18   : > { %v8443_v32 = vsub.f32 %v1351_v3, %v7832_v20 }
 0xa1a   : > { %3130 = vadd.xlane.f32.xlu0 %v3129_v35  ;;  %v5266_v21 = vpop.eup %5265  ;;  %9571 = vst [vmem:[#allocation167_spill] sm:$0xff] %v8443_v32 }
 0xa1b   : > { %v3532_v58 = vmul.f32 %v5397_v60, %v5266_v21 }
 0xa20   : > { %v5268_v46 = vpop.eup %5267 }
 0xa21   : > { %v3533_v28 = vmul.f32 %v5398_v49, %v5268_v46  ;;  %v8430_v49 = vsub.f32 %v1345_v15, %v7791_v26 }
 0xa28   : > { %3762 = vperm.xlu1 %5190, %v3532_v58   ;;  %v8424_v58 = vsub.f32 %v1347_v52, %v7791_v26  ;;  %v2810_v26 = vmul.f32 %v8430_v49, %v8430_v49 }
 0xa2a   : > { %9565 = vst [vmem:[#allocation96_spill] sm:$0xff] %v8424_v58  ;;  %v2811_v25 = vmul.f32 %v8424_v58, %v8424_v58 }
 0xa30   : > { %3767 = vperm.xlu0 %5189, %v3533_v28   ;;  %v1353_v28 = vpop.f32.mrf.mxu0 }
 0xa36   : > { %v8415_v19 = vpop.xlane.xlu1 %3110 }
 0xa39   : > { %v8419_v35 = vpop.xlane.xlu0 %3114 }
 0xa3a   : > { %v3743_v54 = vpop.permute.xlu1 %3742 }
 0xa3b   : > { %v4064_v55 = vmul.f32 %v3743_v54, %v9562_v12  ;;  %v4065_v50 = vmul.f32 %v3743_v54, %v9563_v59  ;;  %v8433_v54 = vsub.f32 %v1353_v28, %v7832_v20  ;;  %v9567_v12 = vld [vmem:[#allocation127_spill] sm:$0xff]  ;;  %v9568_v59 = vld [vmem:[#allocation126_spill] sm:$0xff] }
 0xa3d   : > { %v4652_v21 = vadd.f32 %v9564_v4, %v4064_v55  ;;  %v4653_v60 = vadd.f32 %v9564_v4, %v4065_v50  ;;  %9566 = vst [vmem:[#allocation13_spill] sm:$0xff] %v8433_v54  ;;  %v9569_v4 = vld [vmem:[#allocation175_spill] sm:$0xff]  ;;  %v2813_v15 = vmul.f32 %v8433_v54, %v8433_v54 }
 0xa3e   : > { %v3198_v52 = vmul.f32 0.0051020407, %v9569_v4 }
 0xa3f   : > { %4820 = vst [vmem:[%s7631_s9 + $0x200] sm:$0xff] %v4652_v21  ;;  %4821 = vst.msk [vmem:[%s7631_s9 + $0x208] sm:$0xff] %vm1386_vm0, %v4653_v60  ;;  %v3136_v20 = vsel %vm1386_vm0, %v2813_v15, 0.0  ;;  %v1357_v15 = vpop.f32.mrf.mxu0 }
 0xa40   : > { %v3366_v28 = vadd.f32 0.001, %v3198_v52 }
 0xa41   : > { %v3748_v46 = vpop.permute.xlu0 %3747 }
 0xa42   : > { %v4066_v55 = vmul.f32 %v3748_v46, %v9567_v12  ;;  %v4067_v50 = vmul.f32 %v3748_v46, %v9568_v59  ;;  %v3132_v46 = vsel %vm1386_vm0, %v2811_v25, 0.0  ;;  %5269 = vrsqrt.f32 %v3366_v28  ;;  %v9572_v12 = vld [vmem:[#allocation184_spill] sm:$0xff]  ;;  %v1359_v28 = vpop.f32.mrf.mxu0 }
 0xa43   : > { %v3133_v3 = vadd.f32 %v3132_v46, %v2810_v26 }
 0xa44   : > { %v4654_v21 = vadd.f32 %v9570_v63, %v4066_v55  ;;  %v4655_v60 = vadd.f32 %v9570_v63, %v4067_v50  ;;  %v2812_v63 = vmul.f32 %v8443_v32, %v8443_v32  ;;  %v3199_v55 = vmul.f32 0.0051020407, %v9572_v12  ;;  %v9574_v12 = vld [vmem:[#allocation128_spill] sm:$0xff] }
 0xa45   : > { %v9579_v32 = vld [vmem:[#allocation28_spill] sm:$0xff] }
 0xa46   : > { %4822 = vst [vmem:[%s7631_s9 + $0x210] sm:$0xff] %v4654_v21  ;;  %4823 = vst.msk [vmem:[%s7631_s9 + $0x218] sm:$0xff] %vm1386_vm0, %v4655_v60  ;;  %v3137_v59 = vadd.f32 %v3136_v20, %v2812_v63  ;;  %v3367_v50 = vadd.f32 0.001, %v3199_v55  ;;  %v5399_v21 = vld [vmem:[%s6012_s28 + $0x130] sm:$0xff]  ;;  %v5400_v60 = vld [vmem:[%s6012_s28 + $0x138] sm:$0xff] }
 0xa47   : > { %v9573_v63 = vld [vmem:[#allocation129_spill] sm:$0xff] }
 0xa48   : > { %5271 = vrsqrt.f32 %v3367_v50  ;;  %v9575_v50 = vld [vmem:[#allocation29_spill] sm:$0xff] }
 0xa4c   : > { %3134 = vadd.xlane.f32.xlu1 %v3133_v3  ;;  %v1363_v3 = vpop.f32.mrf.mxu0 }
 0xa4d   : > { %v8487_v58 = vsub.f32 %v1363_v3, %v7881_v22 }
 0xa4f   : > { %3138 = vadd.xlane.f32.xlu0 %v3137_v59  ;;  %v5270_v4 = vpop.eup %5269  ;;  %9580 = vst [vmem:[#allocation98_spill] sm:$0xff] %v8487_v58 }
 0xa50   : > { %v3534_v52 = vmul.f32 %v5399_v21, %v5270_v4 }
 0xa55   : > { %v5272_v25 = vpop.eup %5271 }
 0xa56   : > { %v3535_v54 = vmul.f32 %v5400_v60, %v5272_v25  ;;  %v8474_v60 = vsub.f32 %v1357_v15, %v7841_v9 }
 0xa5d   : > { %3772 = vperm.xlu1 %5190, %v3534_v52   ;;  %v8468_v52 = vsub.f32 %v1359_v28, %v7841_v9  ;;  %v3200_v28 = vmul.f32 0.0051020407, %v7726_v47  ;;  %v2814_v9 = vmul.f32 %v8474_v60, %v8474_v60 }
 0xa5f   : > { %v3368_v47 = vadd.f32 0.001, %v3200_v28 }
 0xa61   : > { %5273 = vrsqrt.f32 %v3368_v47 }
 0xa65   : > { %3777 = vperm.xlu0 %5189, %v3535_v54   ;;  %v1365_v54 = vpop.f32.mrf.mxu0 }
 0xa6b   : > { %v8459_v26 = vpop.xlane.xlu1 %3118 }
 0xa6e   : > { %v8463_v59 = vpop.xlane.xlu0 %3122 }
 0xa6f   : > { %v3753_v46 = vpop.permute.xlu1 %3752 }
 0xa70   : > { %v4068_v20 = vmul.f32 %v3753_v46, %v9573_v63  ;;  %v4069_v55 = vmul.f32 %v3753_v46, %v9574_v12  ;;  %v8477_v46 = vsub.f32 %v1365_v54, %v7881_v22  ;;  %v9577_v63 = vld [vmem:[#allocation131_spill] sm:$0xff]  ;;  %v9578_v12 = vld [vmem:[#allocation130_spill] sm:$0xff] }
 0xa72   : > { %v4656_v4 = vadd.f32 %v9575_v50, %v4068_v20  ;;  %v4657_v21 = vadd.f32 %v9575_v50, %v4069_v55  ;;  %9576 = vst [vmem:[#allocation99_spill] sm:$0xff] %v8477_v46  ;;  %v2815_v50 = vmul.f32 %v8468_v52, %v8468_v52  ;;  %v2817_v15 = vmul.f32 %v8477_v46, %v8477_v46  ;;  %v9586_v46 = vld [vmem:[#allocation30_spill] sm:$0xff] }
 0xa74   : > { %4824 = vst [vmem:[%s7631_s9 + $0x220] sm:$0xff] %v4656_v4  ;;  %4825 = vst.msk [vmem:[%s7631_s9 + $0x228] sm:$0xff] %vm1386_vm0, %v4657_v21  ;;  %v3140_v54 = vsel %vm1386_vm0, %v2815_v50, 0.0  ;;  %v3144_v22 = vsel %vm1386_vm0, %v2817_v15, 0.0  ;;  %v1369_v15 = vpop.f32.mrf.mxu0 }
 0xa75   : > { %v3141_v3 = vadd.f32 %v3140_v54, %v2814_v9 }
 0xa76   : > { %v3758_v25 = vpop.permute.xlu0 %3757  ;;  %v1371_v47 = vpop.f32.mrf.mxu0 }
 0xa77   : > { %v4070_v20 = vmul.f32 %v3758_v25, %v9577_v63  ;;  %v4071_v55 = vmul.f32 %v3758_v25, %v9578_v12  ;;  %v3201_v25 = vmul.f32 0.0051020407, %v7728_v1  ;;  %v5274_v12 = vpop.eup %5273 }
 0xa78   : > { %v1375_v54 = vpop.f32.mrf.mxu0 }
 0xa79   : > { %v4658_v4 = vadd.f32 %v9579_v32, %v4070_v20  ;;  %v4659_v21 = vadd.f32 %v9579_v32, %v4071_v55  ;;  %v2816_v32 = vmul.f32 %v8487_v58, %v8487_v58  ;;  %v3369_v20 = vadd.f32 0.001, %v3201_v25  ;;  %v5401_v55 = vld [vmem:[%s6012_s28 + $0x140] sm:$0xff] }
 0xa7a   : > { %v3536_v28 = vmul.f32 %v5401_v55, %v5274_v12  ;;  %v8531_v58 = vsub.f32 %v1375_v54, %v7929_v61 }
 0xa7b   : > { %4826 = vst [vmem:[%s7631_s9 + $0x230] sm:$0xff] %v4658_v4  ;;  %4827 = vst.msk [vmem:[%s7631_s9 + $0x238] sm:$0xff] %vm1386_vm0, %v4659_v21  ;;  %v3145_v63 = vadd.f32 %v3144_v22, %v2816_v32  ;;  %5275 = vrsqrt.f32 %v3369_v20  ;;  %v5402_v4 = vld [vmem:[%s6012_s28 + $0x148] sm:$0xff]  ;;  %v9581_v32 = vld [vmem:[#allocation133_spill] sm:$0xff] }
 0xa7c   : > { %v9583_v20 = vld [vmem:[#allocation31_spill] sm:$0xff] }
 0xa81   : > { %3142 = vadd.xlane.f32.xlu1 %v3141_v3  ;;  %v9582_v3 = vld [vmem:[#allocation132_spill] sm:$0xff] }
 0xa84   : > { %3146 = vadd.xlane.f32.xlu0 %v3145_v63 }
 0xa88   : > { %v5276_v50 = vpop.eup %5275 }
 0xa89   : > { %v3537_v21 = vmul.f32 %v5402_v4, %v5276_v50  ;;  %v1377_v50 = vpop.f32.mrf.mxu0 }
 0xa92   : > { %3782 = vperm.xlu1 %5190, %v3536_v28   ;;  %v8512_v28 = vsub.f32 %v1371_v47, %v7889_v36  ;;  %v3202_v47 = vmul.f32 0.0051020407, %v7735_v51 }
 0xa94   : > { %v3370_v51 = vadd.f32 0.001, %v3202_v47  ;;  %v3207_v47 = vmul.f32 0.0051020407, %v7878_v8 }
 0xa96   : > { %5277 = vrsqrt.f32 %v3370_v51 }
 0xa9a   : > { %3787 = vperm.xlu0 %5189, %v3537_v21   ;;  %v8518_v21 = vsub.f32 %v1369_v15, %v7889_v36 }
 0xa9c   : > { %v2818_v36 = vmul.f32 %v8518_v21, %v8518_v21 }
 0xaa0   : > { %v8503_v9 = vpop.xlane.xlu1 %3126 }
 0xaa3   : > { %v8507_v63 = vpop.xlane.xlu0 %3130 }
 0xaa4   : > { %v3763_v1 = vpop.permute.xlu1 %3762 }
 0xaa5   : > { %v4072_v22 = vmul.f32 %v3763_v1, %v9581_v32  ;;  %v4073_v25 = vmul.f32 %v3763_v1, %v9582_v3  ;;  %v8521_v1 = vsub.f32 %v1377_v50, %v7929_v61  ;;  %v9584_v32 = vld [vmem:[#allocation135_spill] sm:$0xff]  ;;  %v9585_v3 = vld [vmem:[#allocation134_spill] sm:$0xff]  ;;  %v3203_v61 = vmul.f32 0.0051020407, %v7780_v5 }
 0xaa6   : > { %v3211_v5 = vmul.f32 0.0051020407, %v7975_v16 }
 0xaa7   : > { %v4660_v12 = vadd.f32 %v9583_v20, %v4072_v22  ;;  %v4661_v55 = vadd.f32 %v9583_v20, %v4073_v25  ;;  %v2819_v20 = vmul.f32 %v8512_v28, %v8512_v28  ;;  %v2821_v15 = vmul.f32 %v8521_v1, %v8521_v1 }
 0xaa9   : > { %4828 = vst [vmem:[%s7631_s9 + $0x240] sm:$0xff] %v4660_v12  ;;  %4829 = vst.msk [vmem:[%s7631_s9 + $0x248] sm:$0xff] %vm1386_vm0, %v4661_v55  ;;  %v3148_v50 = vsel %vm1386_vm0, %v2819_v20, 0.0  ;;  %v3375_v20 = vadd.f32 0.001, %v3207_v47 }
 0xaab   : > { %v3768_v4 = vpop.permute.xlu0 %3767 }
 0xaac   : > { %v4074_v22 = vmul.f32 %v3768_v4, %v9584_v32  ;;  %v4075_v25 = vmul.f32 %v3768_v4, %v9585_v3  ;;  %v2820_v4 = vmul.f32 %v8531_v58, %v8531_v58  ;;  %v3149_v32 = vadd.f32 %v3148_v50, %v2818_v36 }
 0xaad   : > { %v3205_v3 = vmul.f32 0.0051020407, %v7830_v2  ;;  %v3213_v2 = vmul.f32 0.0051020407, %v8019_v24  ;;  %v3379_v50 = vadd.f32 0.001, %v3211_v5  ;;  %v1381_v24 = vpop.f32.mrf.mxu0 }
 0xaae   : > { %v4662_v12 = vadd.f32 %v9586_v46, %v4074_v22  ;;  %v4663_v55 = vadd.f32 %v9586_v46, %v4075_v25  ;;  %v3152_v46 = vsel %vm1386_vm0, %v2821_v15, 0.0  ;;  %v3371_v22 = vadd.f32 0.001, %v3203_v61  ;;  %v5403_v15 = vld [vmem:[%s6012_s28 + $0x150] sm:$0xff] }
 0xaaf   : > { %v3153_v54 = vadd.f32 %v3152_v46, %v2820_v4  ;;  %v3373_v25 = vadd.f32 0.001, %v3205_v3  ;;  %v3381_v8 = vadd.f32 0.001, %v3213_v2  ;;  %v3215_v46 = vmul.f32 0.0051020407, %v8063_v7 }
 0xab0   : > { %4830 = vst [vmem:[%s7631_s9 + $0x250] sm:$0xff] %v4662_v12  ;;  %4831 = vst.msk [vmem:[%s7631_s9 + $0x258] sm:$0xff] %vm1386_vm0, %v4663_v55  ;;  %5279 = vrsqrt.f32 %v3371_v22  ;;  %v3209_v12 = vmul.f32 0.0051020407, %v7927_v43  ;;  %v5278_v55 = vpop.eup %5277  ;;  %v5405_v22 = vld [vmem:[%s6012_s28 + $0x168] sm:$0xff] }
 0xab1   : > { %5281 = vrsqrt.f32 %v3373_v25  ;;  %v3538_v51 = vmul.f32 %v5403_v15, %v5278_v55  ;;  %v3383_v16 = vadd.f32 0.001, %v3215_v46  ;;  %v3221_v5 = vmul.f32 0.0051020407, %v8195_v14  ;;  %v1383_v15 = vpop.f32.mrf.mxu0  ;;  %v5407_v2 = vld [vmem:[%s6012_s28 + $0x188] sm:$0xff]  ;;  %v9588_v46 = vld [vmem:[#allocation136_spill] sm:$0xff] }
 0xab2   : > { %5283 = vrsqrt.f32 %v3375_v20  ;;  %v3377_v36 = vadd.f32 0.001, %v3209_v12  ;;  %v3219_v20 = vmul.f32 0.0051020407, %v8151_v29  ;;  %v5406_v12 = vld [vmem:[%s6012_s28 + $0x178] sm:$0xff] }
 0xab4   : > { %5285 = vrsqrt.f32 %v3377_v36 }
 0xab5   : > { %5287 = vrsqrt.f32 %v3379_v50 }
 0xab6   : > { %3150 = vadd.xlane.f32.xlu1 %v3149_v32  ;;  %v5404_v32 = vld [vmem:[%s6012_s28 + $0x158] sm:$0xff]  ;;  %5289 = vrsqrt.f32 %v3381_v8 }
 0xab7   : > { %5291 = vrsqrt.f32 %v3383_v16  ;;  %v9587_v8 = vld [vmem:[#allocation137_spill] sm:$0xff] }
 0xab8   : > { %v9589_v16 = vld [vmem:[#allocation33_spill] sm:$0xff] }
 0xab9   : > { %3154 = vadd.xlane.f32.xlu0 %v3153_v54  ;;  %v3217_v54 = vmul.f32 0.0051020407, %v8107_v18  ;;  %v3387_v18 = vadd.f32 0.001, %v3219_v20 }
 0xabb   : > { %v3385_v47 = vadd.f32 0.001, %v3217_v54 }
 0xabd   : > { %v5280_v4 = vpop.eup %5279  ;;  %5293 = vrsqrt.f32 %v3385_v47  ;;  %v5408_v47 = vld [vmem:[%s6012_s28 + $0x198] sm:$0xff] }
 0xabe   : > { %v3539_v43 = vmul.f32 %v5404_v32, %v5280_v4  ;;  %v5282_v61 = vpop.eup %5281  ;;  %5295 = vrsqrt.f32 %v3387_v18 }
 0xabf   : > { %v3541_v3 = vmul.f32 %v5405_v22, %v5282_v61  ;;  %v5284_v25 = vpop.eup %5283  ;;  %v3389_v61 = vadd.f32 0.001, %v3221_v5  ;;  %v5409_v5 = vld [vmem:[%s6012_s28 + $0x1a8] sm:$0xff] }
 0xac0   : > { %v3543_v55 = vmul.f32 %v5406_v12, %v5284_v25  ;;  %v3223_v25 = vmul.f32 0.0051020407, %v8239_v56  ;;  %v8576_v12 = vsub.f32 %v1381_v24, %v7937_v6  ;;  %v3225_v56 = vmul.f32 0.0051020407, %v8283_v13  ;;  %v9592_v24 = vld [vmem:[#allocation32_spill] sm:$0xff] }
 0xac1   : > { %v5286_v36 = vpop.eup %5285  ;;  %5297 = vrsqrt.f32 %v3389_v61 }
 0xac2   : > { %v3545_v50 = vmul.f32 %v5407_v2, %v5286_v36  ;;  %v5288_v4 = vpop.eup %5287  ;;  %v3391_v18 = vadd.f32 0.001, %v3223_v25  ;;  %v3393_v13 = vadd.f32 0.001, %v3225_v56  ;;  %v3206_v25 = vmul.f32 0.0051020407, %v7835_v17 }
 0xac3   : > { %v3547_v20 = vmul.f32 %v5408_v47, %v5288_v4 }
 0xac4   : > { %5299 = vrsqrt.f32 %v3391_v18  ;;  %v3208_v18 = vmul.f32 0.0051020407, %v7883_v39  ;;  %v3233_v39 = vmul.f32 0.0051020407, %v8459_v26  ;;  %v3214_v26 = vmul.f32 0.0051020407, %v8023_v30 }
 0xac5   : > { %5301 = vrsqrt.f32 %v3393_v13  ;;  %v5414_v13 = vld [vmem:[%s6012_s28 + $0x1f8] sm:$0xff]  ;;  %v3218_v30 = vmul.f32 0.0051020407, %v8111_v23 }
 0xac7   : > { %3792 = vperm.xlu1 %5190, %v3538_v51  }
 0xacf   : > { %3797 = vperm.xlu0 %5189, %v3539_v43   ;;  %v8564_v43 = vsub.f32 %v1383_v15, %v7937_v6  ;;  %v3204_v6 = vmul.f32 0.0051020407, %v7785_v11 }
 0xad3   : > { %3807 = vperm.xlu0 %5189, %v3541_v3   ;;  %v5290_v3 = vpop.eup %5289 }
 0xad4   : > { %v3549_v15 = vmul.f32 %v5409_v5, %v5290_v3  ;;  %v3372_v3 = vadd.f32 0.001, %v3204_v6  ;;  %v5413_v6 = vld [vmem:[%s6012_s28 + $0x1e8] sm:$0xff] }
 0xad5   : > { %v8556_v7 = vpop.xlane.xlu1 %3134 }
 0xad6   : > { %5303 = vrsqrt.f32 %v3372_v3  ;;  %v5415_v3 = vld [vmem:[%s6012_s28 + $0x208] sm:$0xff] }
 0xad7   : > { %3817 = vperm.xlu0 %5189, %v3543_v55   ;;  %v2823_v55 = vmul.f32 %v8564_v43, %v8564_v43 }
 0xad8   : > { %v8566_v14 = vpop.xlane.xlu0 %3138 }
 0xad9   : > { %v3773_v51 = vpop.permute.xlu1 %3772  ;;  %v3156_v61 = vsel %vm1386_vm0, %v2823_v55, 0.0  ;;  %v3229_v55 = vmul.f32 0.0051020407, %v8371_v31  ;;  %v3210_v31 = vmul.f32 0.0051020407, %v7931_v42 }
 0xada   : > { %v4076_v29 = vmul.f32 %v3773_v51, %v9587_v8  ;;  %v4077_v32 = vmul.f32 %v3773_v51, %v9588_v46  ;;  %v9590_v51 = vld [vmem:[#allocation140_spill] sm:$0xff]  ;;  %v5292_v8 = vpop.eup %5291 }
 0xadb   : > { %3827 = vperm.xlu0 %5189, %v3545_v50   ;;  %v9591_v50 = vld [vmem:[#allocation138_spill] sm:$0xff]  ;;  %v3397_v17 = vadd.f32 0.001, %v3229_v55 }
 0xadc   : > { %v4664_v54 = vadd.f32 %v9589_v16, %v4076_v29  ;;  %v4665_v22 = vadd.f32 %v9589_v16, %v4077_v32  ;;  %v2822_v32 = vmul.f32 %v8576_v12, %v8576_v12  ;;  %v3227_v16 = vmul.f32 0.0051020407, %v8327_v34  ;;  %v5416_v55 = vld [vmem:[%s6012_s28 + $0x160] sm:$0xff] }
 0xadd   : > { %v3374_v34 = vadd.f32 0.001, %v3206_v25 }
 0xade   : > { %4832 = vst [vmem:[%s7631_s9 + $0x260] sm:$0xff] %v4664_v54  ;;  %4833 = vst.msk [vmem:[%s7631_s9 + $0x268] sm:$0xff] %vm1386_vm0, %v4665_v22  ;;  %v5410_v54 = vld [vmem:[%s6012_s28 + $0x1b8] sm:$0xff]  ;;  %v5294_v22 = vpop.eup %5293  ;;  %v3157_v47 = vadd.f32 %v3156_v61, %v2822_v32  ;;  %v3212_v32 = vmul.f32 0.0051020407, %v7979_v57 }
 0xadf   : > { %3837 = vperm.xlu0 %5189, %v3547_v20   ;;  %v3551_v11 = vmul.f32 %v5410_v54, %v5292_v8  ;;  %v3395_v20 = vadd.f32 0.001, %v3227_v16  ;;  %v3235_v61 = vmul.f32 0.0051020407, %v8503_v9  ;;  %v3237_v57 = vmul.f32 0.0051020407, %v8556_v7 }
 0xae0   : > { %v3778_v36 = vpop.permute.xlu0 %3777  ;;  %v3380_v54 = vadd.f32 0.001, %v3212_v32  ;;  %v3382_v9 = vadd.f32 0.001, %v3214_v26 }
 0xae1   : > { %v4078_v2 = vmul.f32 %v3778_v36, %v9590_v51  ;;  %v4079_v4 = vmul.f32 %v3778_v36, %v9591_v50  ;;  %v5411_v36 = vld [vmem:[%s6012_s28 + $0x1c8] sm:$0xff]  ;;  %5305 = vrsqrt.f32 %v3395_v20  ;;  %v3231_v51 = vmul.f32 0.0051020407, %v8415_v19 }
 0xae2   : > { %v3553_v5 = vmul.f32 %v5411_v36, %v5294_v22  ;;  %5307 = vrsqrt.f32 %v3374_v34  ;;  %v3401_v19 = vadd.f32 0.001, %v3233_v39  ;;  %v3403_v22 = vadd.f32 0.001, %v3235_v61  ;;  %v5417_v34 = vld [vmem:[%s6012_s28 + $0x218] sm:$0xff]  ;;  %v5422_v61 = vld [vmem:[%s6012_s28 + $0x190] sm:$0xff] }
 0xae3   : > { %v4666_v29 = vadd.f32 %v9592_v24, %v4078_v2  ;;  %v4667_v46 = vadd.f32 %v9592_v24, %v4079_v4  ;;  %3847 = vperm.xlu0 %5189, %v3549_v15   ;;  %v5296_v15 = vpop.eup %5295  ;;  %v5412_v2 = vld [vmem:[%s6012_s28 + $0x1d8] sm:$0xff]  ;;  %v3376_v4 = vadd.f32 0.001, %v3208_v18  ;;  %5309 = vrsqrt.f32 %v3397_v17  ;;  %v5418_v17 = vld [vmem:[%s6012_s28 + $0x170] sm:$0xff] }
 0xae4   : > { %v5298_v56 = vpop.eup %5297  ;;  %v3555_v50 = vmul.f32 %v5412_v2, %v5296_v15  ;;  %v3399_v8 = vadd.f32 0.001, %v3231_v51  ;;  %v3216_v20 = vmul.f32 0.0051020407, %v8067_v40  ;;  %v3405_v15 = vadd.f32 0.001, %v3237_v57 }
 0xae5   : > { %4834 = vst [vmem:[%s7631_s9 + $0x270] sm:$0xff] %v4666_v29  ;;  %4835 = vst.msk [vmem:[%s7631_s9 + $0x278] sm:$0xff] %vm1386_vm0, %v4667_v46  ;;  %v3557_v24 = vmul.f32 %v5413_v6, %v5298_v56  ;;  %v5300_v29 = vpop.eup %5299  ;;  %5311 = vrsqrt.f32 %v3376_v4  ;;  %v3378_v46 = vadd.f32 0.001, %v3210_v31  ;;  %v3386_v40 = vadd.f32 0.001, %v3218_v30 }
 0xae6   : > { %5313 = vrsqrt.f32 %v3399_v8  ;;  %v3559_v42 = vmul.f32 %v5414_v13, %v5300_v29  ;;  %v5302_v16 = vpop.eup %5301  ;;  %v3384_v56 = vadd.f32 0.001, %v3216_v20  ;;  %v3220_v31 = vmul.f32 0.0051020407, %v8155_v10  ;;  %v5420_v8 = vld [vmem:[%s6012_s28 + $0x180] sm:$0xff]  ;;  %v5423_v10 = vld [vmem:[%s6012_s28 + $0x248] sm:$0xff] }
 0xae7   : > { %3857 = vperm.xlu0 %5189, %v3551_v11   ;;  %5315 = vrsqrt.f32 %v3378_v46  ;;  %v5304_v11 = vpop.eup %5303  ;;  %v3561_v25 = vmul.f32 %v5415_v3, %v5302_v16  ;;  %v5424_v57 = vld [vmem:[%s6012_s28 + $0x1a0] sm:$0xff]  ;;  %v5425_v20 = vld [vmem:[%s6012_s28 + $0x258] sm:$0xff] }
 0xae8   : > { %5317 = vrsqrt.f32 %v3401_v19  ;;  %v3540_v36 = vmul.f32 %v5416_v55, %v5304_v11  ;;  %v3388_v32 = vadd.f32 0.001, %v3220_v31  ;;  %v3222_v19 = vmul.f32 0.0051020407, %v8199_v38 }
 0xae9   : > { %5319 = vrsqrt.f32 %v3380_v54  ;;  %v3224_v11 = vmul.f32 0.0051020407, %v8243_v44  ;;  %v3226_v38 = vmul.f32 0.0051020407, %v8287_v33 }
 0xaea   : > { %5321 = vrsqrt.f32 %v3403_v22  ;;  %v3390_v26 = vadd.f32 0.001, %v3222_v19  ;;  %v3230_v19 = vmul.f32 0.0051020407, %v8375_v37  ;;  %v5430_v37 = vld [vmem:[%s6012_s28 + $0x1e0] sm:$0xff] }
 0xaeb   : > { %3867 = vperm.xlu0 %5189, %v3553_v5   ;;  %3158 = vadd.xlane.f32.xlu1 %v3157_v47  ;;  %5323 = vrsqrt.f32 %v3382_v9  ;;  %v3394_v33 = vadd.f32 0.001, %v3226_v38 }
 0xaec   : > { %5325 = vrsqrt.f32 %v3405_v15  ;;  %v5426_v15 = vld [vmem:[%s6012_s28 + $0x1b0] sm:$0xff] }
 0xaed   : > { %5327 = vrsqrt.f32 %v3384_v56  ;;  %v9594_v56 = vld [vmem:[#allocation141_spill] sm:$0xff] }
 0xaee   : > { %v5306_v47 = vpop.eup %5305  ;;  %5329 = vrsqrt.f32 %v3386_v40 }
 0xaef   : > { %3877 = vperm.xlu0 %5189, %v3555_v50   ;;  %v5308_v5 = vpop.eup %5307  ;;  %v3563_v7 = vmul.f32 %v5417_v34, %v5306_v47  ;;  %v5419_v50 = vld [vmem:[%s6012_s28 + $0x228] sm:$0xff]  ;;  %5331 = vrsqrt.f32 %v3388_v32 }
 0xaf0   : > { %v5310_v18 = vpop.eup %5309  ;;  %v3542_v51 = vmul.f32 %v5418_v17, %v5308_v5  ;;  %5333 = vrsqrt.f32 %v3390_v26  ;;  %v3392_v5 = vadd.f32 0.001, %v3224_v11  ;;  %v3398_v11 = vadd.f32 0.001, %v3230_v19 }
 0xaf1   : > { %v3565_v4 = vmul.f32 %v5419_v50, %v5310_v18 }
 0xaf2   : > { %v5312_v2 = vpop.eup %5311 }
 0xaf3   : > { %3887 = vperm.xlu0 %5189, %v3557_v24   ;;  %v5314_v23 = vpop.eup %5313  ;;  %v3544_v39 = vmul.f32 %v5420_v8, %v5312_v2  ;;  %v5421_v24 = vld [vmem:[%s6012_s28 + $0x238] sm:$0xff]  ;;  %v9595_v2 = vld [vmem:[#allocation35_spill] sm:$0xff]  ;;  %v3228_v8 = vmul.f32 0.0051020407, %v8331_v48 }
 0xaf4   : > { %v5316_v6 = vpop.eup %5315  ;;  %v3567_v29 = vmul.f32 %v5421_v24, %v5314_v23  ;;  %v9597_v48 = vld [vmem:[#allocation157_spill] sm:$0xff] }
 0xaf5   : > { %v5318_v46 = vpop.eup %5317  ;;  %v3546_v13 = vmul.f32 %v5422_v61, %v5316_v6  ;;  %v3396_v32 = vadd.f32 0.001, %v3228_v8  ;;  %v9596_v61 = vld [vmem:[#allocation159_spill] sm:$0xff]  ;;  %v5437_v8 = vld [vmem:[%s6012_s28 + $0x240] sm:$0xff] }
 0xaf6   : > { %v3569_v16 = vmul.f32 %v5423_v10, %v5318_v46 }
 0xaf7   : > { %3897 = vperm.xlu0 %5189, %v3559_v42   ;;  %v5320_v42 = vpop.eup %5319 }
 0xaf8   : > { %v5322_v54 = vpop.eup %5321  ;;  %v3548_v3 = vmul.f32 %v5424_v57, %v5320_v42 }
 0xaf9   : > { %v3571_v55 = vmul.f32 %v5425_v20, %v5322_v54  ;;  %v3234_v20 = vmul.f32 0.0051020407, %v8463_v59  ;;  %v3238_v59 = vmul.f32 0.0051020407, %v8566_v14 }
 0xafb   : > { %3907 = vperm.xlu0 %5189, %v3561_v25   ;;  %v5324_v25 = vpop.eup %5323 }
 0xafc   : > { %3802 = vperm.xlu1 %5190, %v3540_v36   ;;  %v5326_v36 = vpop.eup %5325  ;;  %v3550_v44 = vmul.f32 %v5426_v15, %v5324_v25  ;;  %v3236_v15 = vmul.f32 0.0051020407, %v8507_v63 }
 0xafd   : > { %v5328_v34 = vpop.eup %5327 }
 0xafe   : > { %v5330_v31 = vpop.eup %5329 }
 0xaff   : > { %3917 = vperm.xlu0 %5189, %v3563_v7   ;;  %v9593_v7 = vld [vmem:[#allocation143_spill] sm:$0xff]  ;;  %v5332_v10 = vpop.eup %5331 }
 0xb00   : > { %3812 = vperm.xlu1 %5190, %v3542_v51   ;;  %v3556_v57 = vmul.f32 %v5430_v37, %v5332_v10 }
 0xb03   : > { %3927 = vperm.xlu0 %5189, %v3565_v4   ;;  %v5427_v4 = vld [vmem:[%s6012_s28 + $0x268] sm:$0xff] }
 0xb04   : > { %3822 = vperm.xlu1 %5190, %v3544_v39   ;;  %v3573_v23 = vmul.f32 %v5427_v4, %v5326_v36  ;;  %v5428_v39 = vld [vmem:[%s6012_s28 + $0x1c0] sm:$0xff] }
 0xb05   : > { %v3552_v6 = vmul.f32 %v5428_v39, %v5328_v34 }
 0xb07   : > { %3937 = vperm.xlu0 %5189, %v3567_v29   ;;  %v5429_v29 = vld [vmem:[%s6012_s28 + $0x1d0] sm:$0xff] }
 0xb08   : > { %3832 = vperm.xlu1 %5190, %v3546_v13   ;;  %v3554_v46 = vmul.f32 %v5429_v29, %v5330_v31 }
 0xb0a   : > { %v3143_v22 = vpop.xlane.xlu1 %3142 }
 0xb0b   : > { %v3239_v47 = vmul.f32 0.0051020407, %v3143_v22  ;;  %3947 = vperm.xlu0 %5189, %v3569_v16   ;;  %v9598_v16 = vld [vmem:[#allocation34_spill] sm:$0xff]  ;;  %v3232_v22 = vmul.f32 0.0051020407, %v8419_v35 }
 0xb0c   : > { %3842 = vperm.xlu1 %5190, %v3548_v3   ;;  %v5334_v3 = vpop.eup %5333 }
 0xb0d   : > { %v3407_v9 = vadd.f32 0.001, %v3239_v47  ;;  %v3147_v51 = vpop.xlane.xlu0 %3146  ;;  %v5431_v47 = vld [vmem:[%s6012_s28 + $0x278] sm:$0xff] }
 0xb0e   : > { %v3783_v30 = vpop.permute.xlu1 %3782 }
 0xb0f   : > { %5335 = vrsqrt.f32 %v3407_v9  ;;  %v4080_v18 = vmul.f32 %v3783_v30, %v9593_v7  ;;  %v4081_v17 = vmul.f32 %v3783_v30, %v9594_v56  ;;  %3957 = vperm.xlu0 %5189, %v3571_v55   ;;  %v3400_v9 = vadd.f32 0.001, %v3232_v22  ;;  %v5432_v55 = vld [vmem:[%s6012_s28 + $0x1f0] sm:$0xff] }
 0xb10   : > { %3852 = vperm.xlu1 %5190, %v3550_v44   ;;  %5337 = vrsqrt.f32 %v3392_v5  ;;  %v3558_v36 = vmul.f32 %v5432_v55, %v5334_v3  ;;  %v3402_v30 = vadd.f32 0.001, %v3234_v20  ;;  %v5433_v44 = vld [vmem:[%s6012_s28 + $0x200] sm:$0xff]  ;;  %v3404_v7 = vadd.f32 0.001, %v3236_v15 }
 0xb11   : > { %v4668_v40 = vadd.f32 %v9595_v2, %v4080_v18  ;;  %v4669_v50 = vadd.f32 %v9595_v2, %v4081_v17  ;;  %5339 = vrsqrt.f32 %v3394_v33  ;;  %v5434_v18 = vld [vmem:[%s6012_s28 + $0x210] sm:$0xff]  ;;  %v3406_v33 = vadd.f32 0.001, %v3238_v59 }
 0xb12   : > { %5341 = vrsqrt.f32 %v3396_v32  ;;  %v3240_v2 = vmul.f32 0.0051020407, %v3147_v51 }
 0xb13   : > { %4836 = vst [vmem:[%s7631_s9 + $0x280] sm:$0xff] %v4668_v40  ;;  %4837 = vst.msk [vmem:[%s7631_s9 + $0x288] sm:$0xff] %vm1386_vm0, %v4669_v50  ;;  %3967 = vperm.xlu0 %5189, %v3573_v23   ;;  %5343 = vrsqrt.f32 %v3398_v11  ;;  %v5435_v40 = vld [vmem:[%s6012_s28 + $0x220] sm:$0xff]  ;;  %v5436_v23 = vld [vmem:[%s6012_s28 + $0x230] sm:$0xff] }
 0xb14   : > { %3862 = vperm.xlu1 %5190, %v3552_v6   ;;  %5345 = vrsqrt.f32 %v3400_v9  ;;  %v3408_v4 = vadd.f32 0.001, %v3240_v2  ;;  %v9601_v9 = vld [vmem:[#allocation37_spill] sm:$0xff] }
 0xb15   : > { %v3788_v24 = vpop.permute.xlu0 %3787  ;;  %5347 = vrsqrt.f32 %v3402_v30  ;;  %v9603_v30 = vld [vmem:[#allocation178_spill] sm:$0xff] }
 0xb16   : > { %v4082_v13 = vmul.f32 %v3788_v24, %v9596_v61  ;;  %v4083_v42 = vmul.f32 %v3788_v24, %v9597_v48  ;;  %5349 = vrsqrt.f32 %v3404_v7  ;;  %v5438_v24 = vld [vmem:[%s6012_s28 + $0x250] sm:$0xff] }
 0xb17   : > { %5351 = vrsqrt.f32 %v3406_v33  ;;  %v5440_v61 = vld [vmem:[%s6012_s28 + $0x270] sm:$0xff]  ;;  %v9605_v33 = vld [vmem:[#allocation38_spill] sm:$0xff] }
 0xb18   : > { %v4670_v54 = vadd.f32 %v9598_v16, %v4082_v13  ;;  %v4671_v26 = vadd.f32 %v9598_v16, %v4083_v42  ;;  %3872 = vperm.xlu1 %5190, %v3554_v46   ;;  %5353 = vrsqrt.f32 %v3408_v4  ;;  %v5439_v46 = vld [vmem:[%s6012_s28 + $0x260] sm:$0xff] }
 0xb1a   : > { %4838 = vst [vmem:[%s7631_s9 + $0x290] sm:$0xff] %v4670_v54  ;;  %4839 = vst.msk [vmem:[%s7631_s9 + $0x298] sm:$0xff] %vm1386_vm0, %v4671_v26  ;;  %v5441_v26 = vld [vmem:[%s6012_s28 + $0x280] sm:$0xff] }
 0xb1c   : > { %v5336_v25 = vpop.eup %5335  ;;  %3882 = vperm.xlu1 %5190, %v3556_v57   ;;  %v9599_v57 = vld [vmem:[#allocation162_spill] sm:$0xff] }
 0xb1d   : > { %v3575_v38 = vmul.f32 %v5431_v47, %v5336_v25  ;;  %v5338_v5 = vpop.eup %5337  ;;  %v9600_v25 = vld [vmem:[#allocation160_spill] sm:$0xff] }
 0xb1e   : > { %v5340_v35 = vpop.eup %5339  ;;  %v3560_v34 = vmul.f32 %v5433_v44, %v5338_v5  ;;  %v9602_v5 = vld [vmem:[#allocation179_spill] sm:$0xff]  ;;  %v9604_v44 = vld [vmem:[#allocation36_spill] sm:$0xff] }
 0xb1f   : > { %3977 = vperm.xlu0 %5189, %v3575_v38   ;;  %v3562_v56 = vmul.f32 %v5434_v18, %v5340_v35  ;;  %v5342_v17 = vpop.eup %5341 }
 0xb20   : > { %3892 = vperm.xlu1 %5190, %v3558_v36   ;;  %v3564_v50 = vmul.f32 %v5435_v40, %v5342_v17  ;;  %v5344_v63 = vpop.eup %5343 }
 0xb21   : > { %v3566_v31 = vmul.f32 %v5436_v23, %v5344_v63  ;;  %v5346_v14 = vpop.eup %5345  ;;  %v5442_v63 = vld [vmem:[%s6012_s28 + $0x288] sm:$0xff]  ;;  %v8682_v23 = vld [vmem:[%s6012_s28 + $0x290] sm:$0xff] }
 0xb22   : > { %v3568_v39 = vmul.f32 %v5437_v8, %v5346_v14  ;;  %v5348_v6 = vpop.eup %5347  ;;  %v9606_v14 = vld [vmem:[#allocation40_spill] sm:$0xff] }
 0xb23   : > { %v3570_v51 = vmul.f32 %v5438_v24, %v5348_v6  ;;  %v5350_v29 = vpop.eup %5349 }
 0xb24   : > { %3902 = vperm.xlu1 %5190, %v3560_v34   ;;  %v3572_v32 = vmul.f32 %v5439_v46, %v5350_v29  ;;  %v5352_v19 = vpop.eup %5351 }
 0xb25   : > { %v3574_v13 = vmul.f32 %v5440_v61, %v5352_v19  ;;  %v5354_v48 = vpop.eup %5353  ;;  %v9609_v61 = vld [vmem:[#allocation193_spill] sm:$0xff] }
 0xb26   : > { %v3576_v11 = vmul.f32 %v5441_v26, %v5354_v48  ;;  %v9610_v48 = vld [vmem:[#allocation192_spill] sm:$0xff] }
 0xb28   : > { %3912 = vperm.xlu1 %5190, %v3562_v56  }
 0xb2c   : > { %3922 = vperm.xlu1 %5190, %v3564_v50  }
 0xb30   : > { %3932 = vperm.xlu1 %5190, %v3566_v31  }
 0xb34   : > { %3942 = vperm.xlu1 %5190, %v3568_v39  }
 0xb38   : > { %3952 = vperm.xlu1 %5190, %v3570_v51  }
 0xb3c   : > { %3962 = vperm.xlu1 %5190, %v3572_v32  }
 0xb3f   : > { %v3151_v42 = vpop.xlane.xlu1 %3150 }
 0xb40   : > { %v3241_v10 = vmul.f32 0.0051020407, %v3151_v42  ;;  %3972 = vperm.xlu1 %5190, %v3574_v13  }
 0xb42   : > { %v3409_v16 = vadd.f32 0.001, %v3241_v10  ;;  %v3155_v54 = vpop.xlane.xlu0 %3154  ;;  %v9611_v10 = vmov 1  }
 0xb43   : > { %v3242_v22 = vmul.f32 0.0051020407, %v3155_v54  ;;  %v3793_v37 = vpop.permute.xlu1 %3792 }
 0xb44   : > { %5355 = vrsqrt.f32 %v3409_v16  ;;  %v4084_v3 = vmul.f32 %v3793_v37, %v9599_v57  ;;  %v4085_v47 = vmul.f32 %v3793_v37, %v9600_v25  ;;  %3982 = vperm.xlu1 %5190, %v3576_v11   ;;  %v9612_v16 = vld [vmem:[#allocation44_spill] sm:$0xff]  ;;  %v9614_v57 = vld [vmem:[#allocation145_spill] sm:$0xff]  ;;  %v9615_v25 = vld [vmem:[#allocation46_spill] sm:$0xff] }
 0xb45   : > { %v3410_v38 = vadd.f32 0.001, %v3242_v22  ;;  %v9613_v22 = vld [vmem:[#allocation77_spill] sm:$0xff] }
 0xb46   : > { %v4672_v20 = vadd.f32 %v9601_v9, %v4084_v3  ;;  %v4673_v55 = vadd.f32 %v9601_v9, %v4085_v47 }
 0xb47   : > { %5357 = vrsqrt.f32 %v3410_v38 }
 0xb48   : > { %4840 = vst [vmem:[%s7631_s9 + $0x2a0] sm:$0xff] %v4672_v20  ;;  %4841 = vst.msk [vmem:[%s7631_s9 + $0x2a8] sm:$0xff] %vm1386_vm0, %v4673_v55  ;;  %v9616_v20 = vld [vmem:[#allocation78_spill] sm:$0xff] }
 0xb4a   : > { %v3798_v36 = vpop.permute.xlu0 %3797 }
 0xb4b   : > { %v4086_v35 = vmul.f32 %v3798_v36, %v9602_v5  ;;  %v4087_v15 = vmul.f32 %v3798_v36, %v9603_v30  ;;  %v9617_v36 = vld [vmem:[#allocation79_spill] sm:$0xff] }
 0xb4d   : > { %v4674_v34 = vadd.f32 %v9604_v44, %v4086_v35  ;;  %v4675_v7 = vadd.f32 %v9604_v44, %v4087_v15  ;;  %v9618_v35 = vld [vmem:[#allocation48_spill] sm:$0xff] }
 0xb4e   : > { %v3808_v59 = vpop.permute.xlu0 %3807 }
 0xb4f   : > { %4842 = vst [vmem:[%s7631_s9 + $0x2b0] sm:$0xff] %v4674_v34  ;;  %4843 = vst.msk [vmem:[%s7631_s9 + $0x2b8] sm:$0xff] %vm1386_vm0, %v4675_v7  ;;  %v4090_v18 = vmul.f32 %v3808_v59, %v7699_v0  ;;  %v4091_v56 = vmul.f32 %v3808_v59, %v7696_v45  ;;  %v9619_v34 = vld [vmem:[#allocation147_spill] sm:$0xff]  ;;  %v9620_v59 = vld [vmem:[#allocation142_spill] sm:$0xff] }
 0xb51   : > { %v5356_v17 = vpop.eup %5355  ;;  %v4678_v2 = vadd.f32 %v9605_v33, %v4090_v18  ;;  %v4679_v40 = vadd.f32 %v9605_v33, %v4091_v56  ;;  %v9621_v56 = vld [vmem:[#allocation50_spill] sm:$0xff] }
 0xb52   : > { %v3818_v50 = vpop.permute.xlu0 %3817  ;;  %v3577_v4 = vmul.f32 %v5442_v63, %v5356_v17  ;;  %v9623_v63 = vld [vmem:[#allocation5_spill] sm:$0xff] }
 0xb53   : > { %4846 = vst [vmem:[%s7631_s9 + $0x2d0] sm:$0xff] %v4678_v2  ;;  %4847 = vst.msk [vmem:[%s7631_s9 + $0x2d8] sm:$0xff] %vm1386_vm0, %v4679_v40  ;;  %v4094_v31 = vmul.f32 %v3818_v50, %v7757_v41  ;;  %v4095_v45 = vmul.f32 %v3818_v50, %v7754_v62  ;;  %v9607_v41 = vld [vmem:[#allocation189_spill] sm:$0xff]  ;;  %v9608_v62 = vld [vmem:[#allocation42_spill] sm:$0xff] }
 0xb54   : > { %v5358_v0 = vpop.eup %5357  ;;  %3987 = vperm.xlu0 %5189, %v3577_v4   ;;  %v9622_v40 = vld [vmem:[#allocation152_spill] sm:$0xff] }
 0xb55   : > { %v4682_v8 = vadd.f32 %v9606_v14, %v4094_v31  ;;  %v4683_v39 = vadd.f32 %v9606_v14, %v4095_v45  ;;  %v3578_v6 = vmul.f32 %v5358_v0, %v8682_v23  ;;  %v9624_v31 = vld [vmem:[#allocation52_spill] sm:$0xff] }
 0xb56   : > { %v3828_v24 = vpop.permute.xlu0 %3827 }
 0xb57   : > { %4850 = vst [vmem:[%s7631_s9 + $0x2f0] sm:$0xff] %v4682_v8  ;;  %4851 = vst.msk [vmem:[%s7631_s9 + $0x2f8] sm:$0xff] %vm1386_vm0, %v4683_v39  ;;  %v4098_v51 = vmul.f32 %v3828_v24, %v7807_v27  ;;  %v4099_v29 = vmul.f32 %v3828_v24, %v9607_v41  ;;  %3992 = vperm.xlu1 %5190, %v3578_v6   ;;  %v8705_v27 = vld [vmem:[%s6012_s28 + $0x298] sm:$0xff]  ;;  %v9625_v8 = vld [vmem:[#allocation4_spill] sm:$0xff] }
 0xb58   : > { %v9626_v6 = vld [vmem:[#allocation144_spill] sm:$0xff] }
 0xb59   : > { %v4686_v46 = vadd.f32 %v9608_v62, %v4098_v51  ;;  %v4687_v32 = vadd.f32 %v9608_v62, %v4099_v29  ;;  %v9627_v51 = vld [vmem:[#allocation54_spill] sm:$0xff] }
 0xb5a   : > { %v3838_v19 = vpop.permute.xlu0 %3837 }
 0xb5b   : > { %4854 = vst [vmem:[%s7631_s9 + $0x310] sm:$0xff] %v4686_v46  ;;  %4855 = vst.msk [vmem:[%s7631_s9 + $0x318] sm:$0xff] %vm1386_vm0, %v4687_v32  ;;  %v4102_v13 = vmul.f32 %v3838_v19, %v9609_v61  ;;  %v4103_v42 = vmul.f32 %v3838_v19, %v9610_v48  ;;  %5192 = vset.pattern.permute.xlu1 %v9611_v10  ;;  %v9628_v46 = vld [vmem:[#allocation7_spill] sm:$0xff]  ;;  %v9629_v19 = vld [vmem:[#allocation84_spill] sm:$0xff] }
 0xb5c   : > { %4585 = vperm.xlu1 %5192, %v8705_v27   ;;  %v9630_v48 = vld [vmem:[#allocation56_spill] sm:$0xff] }
 0xb5d   : > { %v4690_v54 = vadd.f32 %v9612_v16, %v4102_v13  ;;  %v4691_v26 = vadd.f32 %v9612_v16, %v4103_v42 }
 0xb5e   : > { %v3848_v11 = vpop.permute.xlu0 %3847 }
 0xb5f   : > { %4858 = vst [vmem:[%s7631_s9 + $0x330] sm:$0xff] %v4690_v54  ;;  %4859 = vst.msk [vmem:[%s7631_s9 + $0x338] sm:$0xff] %vm1386_vm0, %v4691_v26  ;;  %v4106_v37 = vmul.f32 %v3848_v11, %v9613_v22  ;;  %v4107_v3 = vmul.f32 %v3848_v11, %v9614_v57  ;;  %v9631_v22 = vld [vmem:[#allocation146_spill] sm:$0xff] }
 0xb60   : > { %v9632_v57 = vld [vmem:[#allocation86_spill] sm:$0xff] }
 0xb61   : > { %v4694_v47 = vadd.f32 %v9615_v25, %v4106_v37  ;;  %v4695_v38 = vadd.f32 %v9615_v25, %v4107_v3 }
 0xb62   : > { %v3858_v9 = vpop.permute.xlu0 %3857 }
 0xb63   : > { %4862 = vst [vmem:[%s7631_s9 + $0x350] sm:$0xff] %v4694_v47  ;;  %4863 = vst.msk [vmem:[%s7631_s9 + $0x358] sm:$0xff] %vm1386_vm0, %v4695_v38  ;;  %v4110_v55 = vmul.f32 %v3858_v9, %v9616_v20  ;;  %v4111_v5 = vmul.f32 %v3858_v9, %v9617_v36  ;;  %v9633_v47 = vld [vmem:[#allocation58_spill] sm:$0xff]  ;;  %v9634_v20 = vld [vmem:[#allocation181_spill] sm:$0xff] }
 0xb64   : > { %v9635_v36 = vld [vmem:[#allocation180_spill] sm:$0xff] }
 0xb65   : > { %v4698_v30 = vadd.f32 %v9618_v35, %v4110_v55  ;;  %v4699_v15 = vadd.f32 %v9618_v35, %v4111_v5 }
 0xb66   : > { %v3868_v44 = vpop.permute.xlu0 %3867 }
 0xb67   : > { %4866 = vst [vmem:[%s7631_s9 + $0x370] sm:$0xff] %v4698_v30  ;;  %4867 = vst.msk [vmem:[%s7631_s9 + $0x378] sm:$0xff] %vm1386_vm0, %v4699_v15  ;;  %v4114_v7 = vmul.f32 %v3868_v44, %v9619_v34  ;;  %v4115_v18 = vmul.f32 %v3868_v44, %v9620_v59  ;;  %v9636_v30 = vld [vmem:[#allocation39_spill] sm:$0xff]  ;;  %v9637_v44 = vld [vmem:[#allocation88_spill] sm:$0xff] }
 0xb69   : > { %v4702_v17 = vadd.f32 %v9621_v56, %v4114_v7  ;;  %v4703_v33 = vadd.f32 %v9621_v56, %v4115_v18  ;;  %v9638_v7 = vld [vmem:[#allocation89_spill] sm:$0xff] }
 0xb6a   : > { %v3878_v2 = vpop.permute.xlu0 %3877 }
 0xb6b   : > { %4870 = vst [vmem:[%s7631_s9 + $0x390] sm:$0xff] %v4702_v17  ;;  %4871 = vst.msk [vmem:[%s7631_s9 + $0x398] sm:$0xff] %vm1386_vm0, %v4703_v33  ;;  %v4118_v50 = vmul.f32 %v3878_v2, %v9622_v40  ;;  %v4119_v4 = vmul.f32 %v3878_v2, %v9623_v63  ;;  %v9639_v17 = vld [vmem:[#allocation60_spill] sm:$0xff]  ;;  %v9640_v40 = vld [vmem:[#allocation186_spill] sm:$0xff] }
 0xb6c   : > { %v9641_v63 = vld [vmem:[#allocation185_spill] sm:$0xff] }
 0xb6d   : > { %v4706_v45 = vadd.f32 %v9624_v31, %v4118_v50  ;;  %v4707_v0 = vadd.f32 %v9624_v31, %v4119_v4 }
 0xb6e   : > { %v3888_v14 = vpop.permute.xlu0 %3887 }
 0xb6f   : > { %4874 = vst [vmem:[%s7631_s9 + $0x3b0] sm:$0xff] %v4706_v45  ;;  %4875 = vst.msk [vmem:[%s7631_s9 + $0x3b8] sm:$0xff] %vm1386_vm0, %v4707_v0  ;;  %v4122_v39 = vmul.f32 %v3888_v14, %v9625_v8  ;;  %v4123_v24 = vmul.f32 %v3888_v14, %v9626_v6  ;;  %v9642_v45 = vld [vmem:[#allocation41_spill] sm:$0xff]  ;;  %v9643_v8 = vld [vmem:[#allocation90_spill] sm:$0xff] }
 0xb70   : > { %v9644_v6 = vld [vmem:[#allocation91_spill] sm:$0xff] }
 0xb71   : > { %v4710_v41 = vadd.f32 %v9627_v51, %v4122_v39  ;;  %v4711_v29 = vadd.f32 %v9627_v51, %v4123_v24 }
 0xb72   : > { %v3898_v62 = vpop.permute.xlu0 %3897 }
 0xb73   : > { %4878 = vst [vmem:[%s7631_s9 + $0x3d0] sm:$0xff] %v4710_v41  ;;  %4879 = vst.msk [vmem:[%s7631_s9 + $0x3d8] sm:$0xff] %vm1386_vm0, %v4711_v29  ;;  %v4126_v32 = vmul.f32 %v3898_v62, %v9628_v46  ;;  %v4127_v61 = vmul.f32 %v3898_v62, %v9629_v19  ;;  %v9645_v41 = vld [vmem:[#allocation62_spill] sm:$0xff]  ;;  %v9646_v46 = vld [vmem:[#allocation188_spill] sm:$0xff] }
 0xb74   : > { %v3159_v13 = vpop.xlane.xlu1 %3158  ;;  %v9647_v19 = vld [vmem:[#allocation187_spill] sm:$0xff] }
 0xb75   : > { %v4714_v42 = vadd.f32 %v9630_v48, %v4126_v32  ;;  %v4715_v16 = vadd.f32 %v9630_v48, %v4127_v61  ;;  %v3243_v54 = vmul.f32 0.0051020407, %v3159_v13  ;;  %v9648_v48 = vld [vmem:[#allocation43_spill] sm:$0xff] }
 0xb76   : > { %v3908_v26 = vpop.permute.xlu0 %3907 }
 0xb77   : > { %4882 = vst [vmem:[%s7631_s9 + $0x3f0] sm:$0xff] %v4714_v42  ;;  %4883 = vst.msk [vmem:[%s7631_s9 + $0x3f8] sm:$0xff] %vm1386_vm0, %v4715_v16  ;;  %v3411_v11 = vadd.f32 0.001, %v3243_v54  ;;  %v4130_v37 = vmul.f32 %v3908_v26, %v9631_v22  ;;  %v4131_v3 = vmul.f32 %v3908_v26, %v9632_v57  ;;  %v9649_v54 = vld [vmem:[#allocation93_spill] sm:$0xff]  ;;  %v9651_v57 = vld [vmem:[#allocation64_spill] sm:$0xff] }
 0xb78   : > { %v3803_v25 = vpop.permute.xlu1 %3802 }
 0xb79   : > { %5359 = vrsqrt.f32 %v3411_v11  ;;  %v4718_v38 = vadd.f32 %v9633_v47, %v4130_v37  ;;  %v4719_v9 = vadd.f32 %v9633_v47, %v4131_v3  ;;  %v4088_v55 = vmul.f32 %v3803_v25, %v9634_v20  ;;  %v9650_v11 = vld [vmem:[#allocation158_spill] sm:$0xff]  ;;  %v9652_v47 = vld [vmem:[#allocation191_spill] sm:$0xff] }
 0xb7a   : > { %v4089_v5 = vmul.f32 %v3803_v25, %v9635_v36  ;;  %v3918_v35 = vpop.permute.xlu0 %3917 }
 0xb7b   : > { %4886 = vst [vmem:[%s7631_s9 + $0x410] sm:$0xff] %v4718_v38  ;;  %4887 = vst.msk [vmem:[%s7631_s9 + $0x418] sm:$0xff] %vm1386_vm0, %v4719_v9  ;;  %v4676_v15 = vadd.f32 %v9636_v30, %v4088_v55  ;;  %v4134_v34 = vmul.f32 %v3918_v35, %v9637_v44  ;;  %v4135_v59 = vmul.f32 %v3918_v35, %v9638_v7  ;;  %v9653_v9 = vld [vmem:[#allocation190_spill] sm:$0xff]  ;;  %v9655_v44 = vld [vmem:[#allocation164_spill] sm:$0xff] }
 0xb7c   : > { %v4677_v18 = vadd.f32 %v9636_v30, %v4089_v5  ;;  %v3813_v56 = vpop.permute.xlu1 %3812  ;;  %v9654_v5 = vld [vmem:[#allocation45_spill] sm:$0xff] }
 0xb7d   : > { %4844 = vst [vmem:[%s7631_s9 + $0x2c0] sm:$0xff] %v4676_v15  ;;  %v4722_v33 = vadd.f32 %v9639_v17, %v4134_v34  ;;  %v4723_v2 = vadd.f32 %v9639_v17, %v4135_v59  ;;  %v4092_v50 = vmul.f32 %v3813_v56, %v9640_v40  ;;  %v4093_v4 = vmul.f32 %v3813_v56, %v9641_v63  ;;  %v9658_v40 = vld [vmem:[#allocation194_spill] sm:$0xff] }
 0xb7e   : > { %4845 = vst.msk [vmem:[%s7631_s9 + $0x2c8] sm:$0xff] %vm1386_vm0, %v4677_v18  ;;  %v3928_v31 = vpop.permute.xlu0 %3927  ;;  %v9656_v18 = vld [vmem:[#allocation66_spill] sm:$0xff] }
 0xb7f   : > { %4890 = vst [vmem:[%s7631_s9 + $0x430] sm:$0xff] %v4722_v33  ;;  %4891 = vst.msk [vmem:[%s7631_s9 + $0x438] sm:$0xff] %vm1386_vm0, %v4723_v2  ;;  %v4680_v0 = vadd.f32 %v9642_v45, %v4092_v50  ;;  %v4681_v14 = vadd.f32 %v9642_v45, %v4093_v4  ;;  %v4138_v39 = vmul.f32 %v3928_v31, %v9643_v8  ;;  %v9657_v33 = vld [vmem:[#allocation139_spill] sm:$0xff] }
 0xb80   : > { %v4139_v24 = vmul.f32 %v3928_v31, %v9644_v6  ;;  %v3823_v51 = vpop.permute.xlu1 %3822  ;;  %v9660_v31 = vld [vmem:[#allocation10_spill] sm:$0xff] }
 0xb81   : > { %4848 = vst [vmem:[%s7631_s9 + $0x2e0] sm:$0xff] %v4680_v0  ;;  %4849 = vst.msk [vmem:[%s7631_s9 + $0x2e8] sm:$0xff] %vm1386_vm0, %v4681_v14  ;;  %v4726_v29 = vadd.f32 %v9645_v41, %v4138_v39  ;;  %v4096_v32 = vmul.f32 %v3823_v51, %v9646_v46  ;;  %v4097_v61 = vmul.f32 %v3823_v51, %v9647_v19  ;;  %v9661_v0 = vld [vmem:[#allocation151_spill] sm:$0xff]  ;;  %v9662_v39 = vld [vmem:[#allocation68_spill] sm:$0xff] }
 0xb82   : > { %v4727_v62 = vadd.f32 %v9645_v41, %v4139_v24  ;;  %v3938_v13 = vpop.permute.xlu0 %3937  ;;  %v9663_v51 = vld [vmem:[#allocation3_spill] sm:$0xff] }
 0xb83   : > { %4894 = vst [vmem:[%s7631_s9 + $0x450] sm:$0xff] %v4726_v29  ;;  %v4684_v42 = vadd.f32 %v9648_v48, %v4096_v32  ;;  %v4685_v16 = vadd.f32 %v9648_v48, %v4097_v61  ;;  %v4142_v26 = vmul.f32 %v3938_v13, %v9649_v54  ;;  %v4143_v22 = vmul.f32 %v3938_v13, %v9650_v11  ;;  %v9664_v29 = vld [vmem:[#allocation76_spill] sm:$0xff]  ;;  %v9665_v32 = vld [vmem:[#allocation49_spill] sm:$0xff]  ;;  %v9668_v11 = vld [vmem:[#allocation2_spill] sm:$0xff] }
 0xb84   : > { %4895 = vst.msk [vmem:[%s7631_s9 + $0x458] sm:$0xff] %vm1386_vm0, %v4727_v62  ;;  %v3833_v37 = vpop.permute.xlu1 %3832  ;;  %v9666_v48 = vld [vmem:[#allocation96_spill] sm:$0xff] }
 0xb85   : > { %4852 = vst [vmem:[%s7631_s9 + $0x300] sm:$0xff] %v4684_v42  ;;  %4853 = vst.msk [vmem:[%s7631_s9 + $0x308] sm:$0xff] %vm1386_vm0, %v4685_v16  ;;  %v4730_v3 = vadd.f32 %v9651_v57, %v4142_v26  ;;  %v4731_v25 = vadd.f32 %v9651_v57, %v4143_v22  ;;  %v4100_v38 = vmul.f32 %v3833_v37, %v9652_v47  ;;  %v9671_v47 = vld [vmem:[#allocation80_spill] sm:$0xff] }
 0xb86   : > { %v4101_v20 = vmul.f32 %v3833_v37, %v9653_v9  ;;  %v5360_v55 = vpop.eup %5359  ;;  %v3948_v36 = vpop.permute.xlu0 %3947  ;;  %v9669_v37 = vld [vmem:[#allocation149_spill] sm:$0xff] }
 0xb87   : > { %4898 = vst [vmem:[%s7631_s9 + $0x470] sm:$0xff] %v4730_v3  ;;  %4899 = vst.msk [vmem:[%s7631_s9 + $0x478] sm:$0xff] %vm1386_vm0, %v4731_v25  ;;  %v4688_v35 = vadd.f32 %v9654_v5, %v4100_v38  ;;  %v4146_v15 = vmul.f32 %v3948_v36, %v8342_v53  ;;  %v4147_v34 = vmul.f32 %v3948_v36, %v9655_v44  ;;  %v9672_v9 = vld [vmem:[#allocation81_spill] sm:$0xff]  ;;  %v9675_v44 = vld [vmem:[#allocation83_spill] sm:$0xff] }
 0xb88   : > { %v4689_v30 = vadd.f32 %v9654_v5, %v4101_v20  ;;  %v3843_v7 = vpop.permute.xlu1 %3842  ;;  %v3579_v59 = vmul.f32 %v5360_v55, %v8705_v27  ;;  %v9659_v27 = vld [vmem:[#allocation47_spill] sm:$0xff]  ;;  %v9673_v55 = vld [vmem:[#allocation53_spill] sm:$0xff] }
 0xb89   : > { %4856 = vst [vmem:[%s7631_s9 + $0x320] sm:$0xff] %v4688_v35  ;;  %v4734_v56 = vadd.f32 %v9656_v18, %v4146_v15  ;;  %v4735_v17 = vadd.f32 %v9656_v18, %v4147_v34  ;;  %v4104_v2 = vmul.f32 %v3843_v7, %v9657_v33  ;;  %v4105_v50 = vmul.f32 %v3843_v7, %v9658_v40  ;;  %v9677_v40 = vld [vmem:[#allocation72_spill] sm:$0xff] }
 0xb8a   : > { %4857 = vst.msk [vmem:[%s7631_s9 + $0x328] sm:$0xff] %vm1386_vm0, %v4689_v30  ;;  %3997 = vperm.xlu0 %5189, %v3579_v59   ;;  %v3958_v53 = vpop.permute.xlu0 %3957  ;;  %v9674_v30 = vld [vmem:[#allocation82_spill] sm:$0xff]  ;;  %v9676_v59 = vld [vmem:[#allocation55_spill] sm:$0xff] }
 0xb8b   : > { %4902 = vst [vmem:[%s7631_s9 + $0x490] sm:$0xff] %v4734_v56  ;;  %4903 = vst.msk [vmem:[%s7631_s9 + $0x498] sm:$0xff] %vm1386_vm0, %v4735_v17  ;;  %v4692_v63 = vadd.f32 %v9659_v27, %v4104_v2  ;;  %v4693_v4 = vadd.f32 %v9659_v27, %v4105_v50  ;;  %v4150_v45 = vmul.f32 %v3958_v53, %v9660_v31  ;;  %v9678_v27 = vld [vmem:[#allocation85_spill] sm:$0xff] }
 0xb8c   : > { %v4151_v14 = vmul.f32 %v3958_v53, %v9661_v0  ;;  %v3853_v8 = vpop.permute.xlu1 %3852 }
 0xb8d   : > { %4860 = vst [vmem:[%s7631_s9 + $0x340] sm:$0xff] %v4692_v63  ;;  %4861 = vst.msk [vmem:[%s7631_s9 + $0x348] sm:$0xff] %vm1386_vm0, %v4693_v4  ;;  %v4738_v6 = vadd.f32 %v9662_v39, %v4150_v45  ;;  %v4108_v41 = vmul.f32 %v3853_v8, %v9663_v51  ;;  %v4109_v62 = vmul.f32 %v3853_v8, %v9664_v29  ;;  %v9679_v4 = vld [vmem:[#allocation150_spill] sm:$0xff] }
 0xb8e   : > { %v4739_v24 = vadd.f32 %v9662_v39, %v4151_v14  ;;  %5191 = vset.pattern.permute.xlu0 %v9611_v10  ;;  %v3968_v46 = vpop.permute.xlu0 %3967  ;;  %v9667_v10 = vld [vmem:[#allocation70_spill] sm:$0xff]  ;;  %v9681_v14 = vld [vmem:[#allocation87_spill] sm:$0xff] }
 0xb8f   : > { %4906 = vst [vmem:[%s7631_s9 + $0x4b0] sm:$0xff] %v4738_v6  ;;  %v4696_v19 = vadd.f32 %v9665_v32, %v4108_v41  ;;  %v4697_v61 = vadd.f32 %v9665_v32, %v4109_v62  ;;  %v4154_v13 = vmul.f32 %v3968_v46, %v8430_v49  ;;  %v4155_v42 = vmul.f32 %v3968_v46, %v9666_v48  ;;  %v9670_v49 = vld [vmem:[#allocation51_spill] sm:$0xff]  ;;  %v9684_v62 = vld [vmem:[#allocation154_spill] sm:$0xff] }
 0xb90   : > { %4907 = vst.msk [vmem:[%s7631_s9 + $0x4b8] sm:$0xff] %vm1386_vm0, %v4739_v24  ;;  %4580 = vperm.xlu0 %5191, %v8682_v23   ;;  %v3863_v16 = vpop.permute.xlu1 %3862  ;;  %v9682_v39 = vld [vmem:[#allocation155_spill] sm:$0xff]  ;;  %v9685_v32 = vld [vmem:[#allocation6_spill] sm:$0xff] }
 0xb91   : > { %4864 = vst [vmem:[%s7631_s9 + $0x360] sm:$0xff] %v4696_v19  ;;  %4865 = vst.msk [vmem:[%s7631_s9 + $0x368] sm:$0xff] %vm1386_vm0, %v4697_v61  ;;  %v4742_v54 = vadd.f32 %v9667_v10, %v4154_v13  ;;  %v4743_v26 = vadd.f32 %v9667_v10, %v4155_v42  ;;  %v4112_v22 = vmul.f32 %v3863_v16, %v9668_v11  ;;  %v9683_v24 = vld [vmem:[#allocation59_spill] sm:$0xff]  ;;  %v9686_v61 = vld [vmem:[#allocation61_spill] sm:$0xff] }
 0xb92   : > { %v4113_v57 = vmul.f32 %v3863_v16, %v9669_v37  ;;  %v9687_v16 = vld [vmem:[#allocation161_spill] sm:$0xff]  ;;  %v9689_v11 = vld [vmem:[#allocation63_spill] sm:$0xff] }
 0xb93   : > { %4910 = vst [vmem:[%s7631_s9 + $0x4d0] sm:$0xff] %v4742_v54  ;;  %4911 = vst.msk [vmem:[%s7631_s9 + $0x4d8] sm:$0xff] %vm1386_vm0, %v4743_v26  ;;  %v4700_v3 = vadd.f32 %v9670_v49, %v4112_v22  ;;  %v9688_v54 = vld [vmem:[#allocation9_spill] sm:$0xff] }
 0xb94   : > { %v4701_v23 = vadd.f32 %v9670_v49, %v4113_v57  ;;  %v3873_v25 = vpop.permute.xlu1 %3872  ;;  %v9690_v49 = vld [vmem:[#allocation8_spill] sm:$0xff] }
 0xb95   : > { %4868 = vst [vmem:[%s7631_s9 + $0x380] sm:$0xff] %v4700_v3  ;;  %v4116_v38 = vmul.f32 %v3873_v25, %v9671_v47  ;;  %v4117_v20 = vmul.f32 %v3873_v25, %v9672_v9  ;;  %v9692_v47 = vld [vmem:[#allocation65_spill] sm:$0xff] }
 0xb96   : > { %4869 = vst.msk [vmem:[%s7631_s9 + $0x388] sm:$0xff] %vm1386_vm0, %v4701_v23  ;;  %v9691_v23 = vld [vmem:[#allocation148_spill] sm:$0xff] }
 0xb97   : > { %v4704_v36 = vadd.f32 %v9673_v55, %v4116_v38  ;;  %v4705_v5 = vadd.f32 %v9673_v55, %v4117_v20  ;;  %v9693_v55 = vld [vmem:[#allocation11_spill] sm:$0xff] }
 0xb98   : > { %v3883_v35 = vpop.permute.xlu1 %3882 }
 0xb99   : > { %4872 = vst [vmem:[%s7631_s9 + $0x3a0] sm:$0xff] %v4704_v36  ;;  %4873 = vst.msk [vmem:[%s7631_s9 + $0x3a8] sm:$0xff] %vm1386_vm0, %v4705_v5  ;;  %v4120_v15 = vmul.f32 %v3883_v35, %v9674_v30  ;;  %v4121_v34 = vmul.f32 %v3883_v35, %v9675_v44  ;;  %v9694_v5 = vld [vmem:[#allocation92_spill] sm:$0xff]  ;;  %v9695_v30 = vld [vmem:[#allocation67_spill] sm:$0xff] }
 0xb9a   : > { %v3978_v7 = vpop.permute.xlu0 %3977 }
 0xb9b   : > { %v4708_v18 = vadd.f32 %v9676_v59, %v4120_v15  ;;  %v4709_v56 = vadd.f32 %v9676_v59, %v4121_v34  ;;  %v4158_v17 = vmul.f32 %v3978_v7, %v8474_v60  ;;  %v4159_v33 = vmul.f32 %v3978_v7, %v8468_v52  ;;  %v9680_v60 = vld [vmem:[#allocation57_spill] sm:$0xff]  ;;  %v9696_v7 = vld [vmem:[#allocation94_spill] sm:$0xff] }
 0xb9c   : > { %v3893_v2 = vpop.permute.xlu1 %3892 }
 0xb9d   : > { %4876 = vst [vmem:[%s7631_s9 + $0x3c0] sm:$0xff] %v4708_v18  ;;  %4877 = vst.msk [vmem:[%s7631_s9 + $0x3c8] sm:$0xff] %vm1386_vm0, %v4709_v56  ;;  %v4746_v50 = vadd.f32 %v9677_v40, %v4158_v17  ;;  %v4747_v53 = vadd.f32 %v9677_v40, %v4159_v33  ;;  %v4124_v63 = vmul.f32 %v3893_v2, %v9678_v27  ;;  %v9697_v18 = vld [vmem:[#allocation95_spill] sm:$0xff]  ;;  %v9698_v17 = vld [vmem:[#allocation69_spill] sm:$0xff] }
 0xb9e   : > { %v4125_v31 = vmul.f32 %v3893_v2, %v9679_v4  ;;  %v9700_v27 = vld [vmem:[#allocation165_spill] sm:$0xff]  ;;  %v9701_v4 = vld [vmem:[#allocation71_spill] sm:$0xff] }
 0xb9f   : > { %4914 = vst [vmem:[%s7631_s9 + $0x4f0] sm:$0xff] %v4746_v50  ;;  %4915 = vst.msk [vmem:[%s7631_s9 + $0x4f8] sm:$0xff] %vm1386_vm0, %v4747_v53  ;;  %v4712_v45 = vadd.f32 %v9680_v60, %v4124_v63  ;;  %v9699_v50 = vld [vmem:[#allocation97_spill] sm:$0xff] }
 0xba0   : > { %v4713_v52 = vadd.f32 %v9680_v60, %v4125_v31  ;;  %v3903_v0 = vpop.permute.xlu1 %3902 }
 0xba1   : > { %4880 = vst [vmem:[%s7631_s9 + $0x3e0] sm:$0xff] %v4712_v45  ;;  %v4128_v8 = vmul.f32 %v3903_v0, %v9681_v14  ;;  %v4129_v6 = vmul.f32 %v3903_v0, %v9682_v39  ;;  %v9703_v14 = vld [vmem:[#allocation13_spill] sm:$0xff] }
 0xba2   : > { %4881 = vst.msk [vmem:[%s7631_s9 + $0x3e8] sm:$0xff] %vm1386_vm0, %v4713_v52  ;;  %v9702_v52 = vld [vmem:[#allocation167_spill] sm:$0xff]  ;;  %v9704_v39 = vld [vmem:[#allocation73_spill] sm:$0xff] }
 0xba3   : > { %v4716_v51 = vadd.f32 %v9683_v24, %v4128_v8  ;;  %v4717_v41 = vadd.f32 %v9683_v24, %v4129_v6 }
 0xba4   : > { %v3913_v29 = vpop.permute.xlu1 %3912 }
 0xba5   : > { %4884 = vst [vmem:[%s7631_s9 + $0x400] sm:$0xff] %v4716_v51  ;;  %4885 = vst.msk [vmem:[%s7631_s9 + $0x408] sm:$0xff] %vm1386_vm0, %v4717_v41  ;;  %v4132_v46 = vmul.f32 %v3913_v29, %v9684_v62  ;;  %v4133_v19 = vmul.f32 %v3913_v29, %v9685_v32  ;;  %v9705_v41 = vld [vmem:[#allocation98_spill] sm:$0xff]  ;;  %v9706_v62 = vld [vmem:[#allocation99_spill] sm:$0xff] }
 0xba6   : > { %v9707_v32 = vld [vmem:[#allocation75_spill] sm:$0xff] }
 0xba7   : > { %v4720_v13 = vadd.f32 %v9686_v61, %v4132_v46  ;;  %v4721_v48 = vadd.f32 %v9686_v61, %v4133_v19 }
 0xba8   : > { %v3923_v42 = vpop.permute.xlu1 %3922 }
 0xba9   : > { %4888 = vst [vmem:[%s7631_s9 + $0x420] sm:$0xff] %v4720_v13  ;;  %4889 = vst.msk [vmem:[%s7631_s9 + $0x428] sm:$0xff] %vm1386_vm0, %v4721_v48  ;;  %v4136_v10 = vmul.f32 %v3923_v42, %v9687_v16  ;;  %v4137_v26 = vmul.f32 %v3923_v42, %v9688_v54  ;;  %v9708_v16 = vld [vmem:[#allocation74_spill] sm:$0xff] }
 0xbab   : > { %v4724_v22 = vadd.f32 %v9689_v11, %v4136_v10  ;;  %v4725_v37 = vadd.f32 %v9689_v11, %v4137_v26 }
 0xbac   : > { %v3933_v57 = vpop.permute.xlu1 %3932 }
 0xbad   : > { %4892 = vst [vmem:[%s7631_s9 + $0x440] sm:$0xff] %v4724_v22  ;;  %4893 = vst.msk [vmem:[%s7631_s9 + $0x448] sm:$0xff] %vm1386_vm0, %v4725_v37  ;;  %v4140_v3 = vmul.f32 %v3933_v57, %v9690_v49  ;;  %v4141_v25 = vmul.f32 %v3933_v57, %v9691_v23 }
 0xbaf   : > { %v4728_v38 = vadd.f32 %v9692_v47, %v4140_v3  ;;  %v4729_v9 = vadd.f32 %v9692_v47, %v4141_v25 }
 0xbb0   : > { %v3943_v20 = vpop.permute.xlu1 %3942 }
 0xbb1   : > { %4896 = vst [vmem:[%s7631_s9 + $0x460] sm:$0xff] %v4728_v38  ;;  %4897 = vst.msk [vmem:[%s7631_s9 + $0x468] sm:$0xff] %vm1386_vm0, %v4729_v9  ;;  %v4144_v36 = vmul.f32 %v3943_v20, %v9693_v55  ;;  %v4145_v35 = vmul.f32 %v3943_v20, %v9694_v5 }
 0xbb3   : > { %v4732_v15 = vadd.f32 %v9695_v30, %v4144_v36  ;;  %v4733_v44 = vadd.f32 %v9695_v30, %v4145_v35 }
 0xbb4   : > { %v3953_v34 = vpop.permute.xlu1 %3952 }
 0xbb5   : > { %4900 = vst [vmem:[%s7631_s9 + $0x480] sm:$0xff] %v4732_v15  ;;  %4901 = vst.msk [vmem:[%s7631_s9 + $0x488] sm:$0xff] %vm1386_vm0, %v4733_v44  ;;  %v4148_v59 = vmul.f32 %v3953_v34, %v9696_v7  ;;  %v4149_v56 = vmul.f32 %v3953_v34, %v9697_v18 }
 0xbb7   : > { %v4736_v33 = vadd.f32 %v9698_v17, %v4148_v59  ;;  %v4737_v2 = vadd.f32 %v9698_v17, %v4149_v56 }
 0xbb8   : > { %v3963_v40 = vpop.permute.xlu1 %3962 }
 0xbb9   : > { %4904 = vst [vmem:[%s7631_s9 + $0x4a0] sm:$0xff] %v4736_v33  ;;  %4905 = vst.msk [vmem:[%s7631_s9 + $0x4a8] sm:$0xff] %vm1386_vm0, %v4737_v2  ;;  %v4152_v53 = vmul.f32 %v3963_v40, %v9699_v50  ;;  %v4153_v63 = vmul.f32 %v3963_v40, %v9700_v27 }
 0xbbb   : > { %v4740_v31 = vadd.f32 %v9701_v4, %v4152_v53  ;;  %v4741_v60 = vadd.f32 %v9701_v4, %v4153_v63 }
 0xbbc   : > { %v3973_v45 = vpop.permute.xlu1 %3972 }
 0xbbd   : > { %4908 = vst [vmem:[%s7631_s9 + $0x4c0] sm:$0xff] %v4740_v31  ;;  %4909 = vst.msk [vmem:[%s7631_s9 + $0x4c8] sm:$0xff] %vm1386_vm0, %v4741_v60  ;;  %v4156_v0 = vmul.f32 %v3973_v45, %v9702_v52  ;;  %v4157_v8 = vmul.f32 %v3973_v45, %v9703_v14 }
 0xbbf   : > { %v4744_v6 = vadd.f32 %v9704_v39, %v4156_v0  ;;  %v4745_v24 = vadd.f32 %v9704_v39, %v4157_v8 }
 0xbc0   : > { %v3983_v51 = vpop.permute.xlu1 %3982 }
 0xbc1   : > { %4912 = vst [vmem:[%s7631_s9 + $0x4e0] sm:$0xff] %v4744_v6  ;;  %4913 = vst.msk [vmem:[%s7631_s9 + $0x4e8] sm:$0xff] %vm1386_vm0, %v4745_v24  ;;  %v4160_v29 = vmul.f32 %v3983_v51, %v9705_v41  ;;  %v4161_v46 = vmul.f32 %v3983_v51, %v9706_v62 }
 0xbc3   : > { %v4748_v19 = vadd.f32 %v9707_v32, %v4160_v29  ;;  %v4749_v61 = vadd.f32 %v9707_v32, %v4161_v46 }
 0xbc5   : > { %4916 = vst [vmem:[%s7631_s9 + $0x500] sm:$0xff] %v4748_v19  ;;  %4917 = vst.msk [vmem:[%s7631_s9 + $0x508] sm:$0xff] %vm1386_vm0, %v4749_v61 }
 0xbcf   : > { %v3988_v13 = vpop.permute.xlu0 %3987 }
 0xbd0   : > { %v4162_v48 = vmul.f32 %v3988_v13, %v8518_v21  ;;  %v4163_v42 = vmul.f32 %v3988_v13, %v8512_v28 }
 0xbd2   : > { %v4750_v10 = vadd.f32 %v9708_v16, %v4162_v48  ;;  %v4751_v54 = vadd.f32 %v9708_v16, %v4163_v42  ;;  %v3993_v26 = vpop.permute.xlu1 %3992 }
 0xbd3   : > { %v4164_v28 = vmul.f32 %v3993_v26, %v8531_v58  ;;  %v4165_v3 = vmul.f32 %v3993_v26, %v8521_v1 }
 0xbd4   : > { %4918 = vst [vmem:[%s7631_s9 + $0x510] sm:$0xff] %v4750_v10  ;;  %4919 = vst.msk [vmem:[%s7631_s9 + $0x518] sm:$0xff] %vm1386_vm0, %v4751_v54 }
 0xbd7   : > { %v4586_v22 = vpop.permute.xlu1 %4585 }
 0xc05   : > { %v3998_v11 = vpop.permute.xlu0 %3997 }
 0xc06   : > { %v4166_v37 = vmul.f32 %v3998_v11, %v8576_v12  ;;  %v4167_v57 = vmul.f32 %v3998_v11, %v8564_v43 }
 0xc08   : > { %v4754_v21 = vadd.f32 %v4586_v22, %v4166_v37  ;;  %v4755_v49 = vadd.f32 %v4586_v22, %v4167_v57 }
 0xc0a   : > { %4922 = vst [vmem:[%s7631_s9 + $0x530] sm:$0xff] %v4754_v21  ;;  %4923 = vst.msk [vmem:[%s7631_s9 + $0x538] sm:$0xff] %vm1386_vm0, %v4755_v49 }
 0xc0b   : > { %v4581_v23 = vpop.permute.xlu0 %4580 }
 0xc0c   : > { %v4752_v25 = vadd.f32 %v4581_v23, %v4164_v28  ;;  %v4753_v47 = vadd.f32 %v4581_v23, %v4165_v3 }
 0xc0e   : > { %4920 = vst [vmem:[%s7631_s9 + $0x520] sm:$0xff] %v4752_v25  ;;  %4921 = vst.msk [vmem:[%s7631_s9 + $0x528] sm:$0xff] %vm1386_vm0, %v4753_v47 }
 0xc0f PF: > { %s14_s15 = sadd.s32 1, %s5449_s15  }
 0xc10   : > { %p11_p4 = scmp.ge.s32.totalorder %s14_s15, 4  }
 0xc12   :  { %13 = sbr.rel (!%p11_p4) target bundleno = 1 (0x1), region = 69 }

</bundles_post_ra>
